<compile_context>
chip_gen: v6e
topology: v6e:2x2x1
jax: 0.10.0
libtpu: 0.0.40
codegen_flags: <defaults>
</compile_context>

<pallas_src>
import jax
import jax.numpy as jnp
from jax import lax
from jax.experimental import pallas as pl
from jax.experimental.pallas import tpu as pltpu

LEAKY = 0.2
EPS = 1e-5


def _leaky(v):
    return jnp.where(v > 0, v, LEAKY * v)


# -----------------------------------------------------------------------------
# Fused down path:
#   3 x [Conv1d(k=7, p=3, s=1, bias=False) -> LeakyReLU(0.2) -> AvgPool1d(2,2)
#        -> (InstanceNorm1d) -> LeakyReLU(0.2)]
# One batch element per grid step; activations are (L, C) in VMEM throughout.
# -----------------------------------------------------------------------------
def _down_path_kernel(x_ref, w1_ref, w2_ref, w3_ref,
                      d1_ref, d2_ref, d3_ref, s1, s2, s3):

    def down(x, w_ref, scr, normalize):
        Lc, cin = x.shape
        zpad = jnp.zeros((3, cin), jnp.float32)
        xp = jnp.concatenate([zpad, x, zpad], axis=0)            # halo in VMEM
        # im2col: all 7 taps folded into ONE MXU contraction of size 7*cin.
        cols = jnp.concatenate([xp[k:k + Lc, :] for k in range(7)], axis=1)
        y = _leaky(jnp.dot(cols, w_ref[...], preferred_element_type=jnp.float32))
        # AvgPool1d(2,2): even/odd rows via sublane-strided loads (O(L) work).
        scr[...] = y
        p = 0.5 * (scr[pl.ds(0, Lc // 2, 2), :] + scr[pl.ds(1, Lc // 2, 2), :])
        if normalize:
            # InstanceNorm1d: per-(n,c) stats over length, biased var, eps=1e-5,
            # no affine.  Two-pass form for numerical safety.
            mean = jnp.mean(p, axis=0, keepdims=True)
            var = jnp.mean((p - mean) ** 2, axis=0, keepdims=True)
            p = (p - mean) * lax.rsqrt(var + EPS)
        # TODO(synk): Dropout is a no-op here (module uses dropout=0.0 everywhere).
        return _leaky(p)

    d1 = down(x_ref[...], w1_ref, s1, normalize=False)
    d1_ref[...] = d1
    d2 = down(d1, w2_ref, s2, normalize=True)
    d2_ref[...] = d2
    d3_ref[...] = down(d2, w3_ref, s3, normalize=True)


def down_path(x, w1, w2, w3):
    """x: (N, L, 1) f32 (NLC);  w*: (C_out, C_in, 7) torch Conv1d layout.
    Returns d1 (N, L/2, 16), d2 (N, L/4, 32), d3 (N, L/8, 32)."""
    N, L, _ = x.shape
    # Fold taps: f[k*C_in + i, o] = w[o, i, k]
    fold = lambda w: jnp.transpose(w, (2, 1, 0)).reshape(7 * w.shape[1], w.shape[0])
    f1, f2, f3 = fold(w1), fold(w2), fold(w3)
    c1, c2, c3 = w1.shape[0], w2.shape[0], w3.shape[0]
    return pl.pallas_call(
        _down_path_kernel,
        out_shape=(
            jax.ShapeDtypeStruct((N, L // 2, c1), jnp.float32),
            jax.ShapeDtypeStruct((N, L // 4, c2), jnp.float32),
            jax.ShapeDtypeStruct((N, L // 8, c3), jnp.float32),
        ),
        grid_spec=pltpu.PrefetchScalarGridSpec(
            num_scalar_prefetch=0,
            grid=(N,),
            in_specs=[
                pl.BlockSpec((None, L, 1), lambda n: (n, 0, 0)),
                pl.BlockSpec(f1.shape, lambda n: (0, 0)),
                pl.BlockSpec(f2.shape, lambda n: (0, 0)),
                pl.BlockSpec(f3.shape, lambda n: (0, 0)),
            ],
            out_specs=(
                pl.BlockSpec((None, L // 2, c1), lambda n: (n, 0, 0)),
                pl.BlockSpec((None, L // 4, c2), lambda n: (n, 0, 0)),
                pl.BlockSpec((None, L // 8, c3), lambda n: (n, 0, 0)),
            ),
            scratch_shapes=[
                pltpu.VMEM((L, c1), jnp.float32),
                pltpu.VMEM((L // 2, c2), jnp.float32),
                pltpu.VMEM((L // 4, c3), jnp.float32),
            ],
        ),
        compiler_params=pltpu.CompilerParams(dimension_semantics=("parallel",)),
    )(x, f1, f2, f3)


# -----------------------------------------------------------------------------
# UNetUp: ConvTranspose1d(k=7, s=2, p=3, output_padding=1, bias=False)
#         -> LeakyReLU(0.2) -> cat(., skip) along channels.
# Computed as two phase matmuls on the un-dilated input:
#   out[2m]   = x[m-1]W5 + x[m]W3 + x[m+1]W1
#   out[2m+1] = x[m-1]W6 + x[m]W4 + x[m+1]W2 + x[m+2]W0
# The skip concat is fused in-kernel: even/odd skip rows are read with
# sublane-strided loads and appended to the matching output phase.
# -----------------------------------------------------------------------------
def _up_kernel(x_ref, s_ref, we_ref, wo_ref, oe_ref, oo_ref):
    Lh, c_in = x_ref.shape
    x = x_ref[...]                                                # (Lh, C_in)
    xp = jnp.concatenate(
        [jnp.zeros((1, c_in), jnp.float32), x, jnp.zeros((2, c_in), jnp.float32)],
        axis=0)                                                   # (Lh+3, C_in)
    # cols block k corresponds to x[m + k - 1]
    cols = jnp.concatenate([xp[k:k + Lh, :] for k in range(4)], axis=1)
    ye = _leaky(jnp.dot(cols, we_ref[...], preferred_element_type=jnp.float32))
    yo = _leaky(jnp.dot(cols, wo_ref[...], preferred_element_type=jnp.float32))
    # Fused skip concat: even/odd rows of the skip via strided loads.
    oe_ref[...] = jnp.concatenate([ye, s_ref[pl.ds(0, Lh, 2), :]], axis=1)
    oo_ref[...] = jnp.concatenate([yo, s_ref[pl.ds(1, Lh, 2), :]], axis=1)


def unet_up(x, skip, w):
    """x: (N, Lh, C_in);  skip: (N, 2*Lh, C_s);  w: (C_in, C_out, 7) torch
    ConvTranspose1d layout.  Returns cat(upsampled, skip) -> (N, 2*Lh, C_out+C_s)."""
    N, Lh, c_in = x.shape
    c_out = w.shape[1]
    c_s = skip.shape[2]
    zero_blk = jnp.zeros((c_in, c_out), jnp.float32)
    we = jnp.concatenate([w[:, :, 5], w[:, :, 3], w[:, :, 1], zero_blk], axis=0)
    wo = jnp.concatenate([w[:, :, 6], w[:, :, 4], w[:, :, 2], w[:, :, 0]], axis=0)
    oe, oo = pl.pallas_call(
        _up_kernel,
        out_shape=(
            jax.ShapeDtypeStruct((N, Lh, c_out + c_s), jnp.float32),
            jax.ShapeDtypeStruct((N, Lh, c_out + c_s), jnp.float32),
        ),
        grid_spec=pltpu.PrefetchScalarGridSpec(
            num_scalar_prefetch=0,
            grid=(N,),
            in_specs=[
                pl.BlockSpec((None, Lh, c_in), lambda n: (n, 0, 0)),
                pl.BlockSpec((None, 2 * Lh, c_s), lambda n: (n, 0, 0)),
                pl.BlockSpec((4 * c_in, c_out), lambda n: (0, 0)),
                pl.BlockSpec((4 * c_in, c_out), lambda n: (0, 0)),
            ],
            out_specs=(
                pl.BlockSpec((None, Lh, c_out + c_s), lambda n: (n, 0, 0)),
                pl.BlockSpec((None, Lh, c_out + c_s), lambda n: (n, 0, 0)),
            ),
        ),
        compiler_params=pltpu.CompilerParams(dimension_semantics=("parallel",)),
    )(x, skip, we, wo)
    # Interleave the two phases (cheap contiguous XLA reshape glue).
    return jnp.stack([oe, oo], axis=2).reshape(N, 2 * Lh, c_out + c_s)


# -----------------------------------------------------------------------------
# final: Upsample(x2, nearest) + Conv1d(32->1, k=5, p=2, bias) + BatchNorm1d(1).
# Nearest-x2 upsample followed by a k=5 conv collapses into two 3-tap phase
# filters on the un-upsampled signal:
#   out[2m]   = (w0+w1) x[m-1] + (w2+w3) x[m] +  w4      x[m+1]
#   out[2m+1] =  w0     x[m-1] + (w1+w2) x[m] + (w3+w4)  x[m+1]
# Whole batch in one grid step because BatchNorm statistics couple all elements.
# -----------------------------------------------------------------------------
def _final_kernel(x_ref, we_ref, wo_ref, b_ref, oe_ref, oo_ref):
    N = x_ref.shape[0]
    L = x_ref.shape[1]
    c_in = x_ref.shape[2]
    cols_list = []
    for n in range(N):                                  # N is small & static
        x = x_ref[n]                                    # (L, C_in)
        z1 = jnp.zeros((1, c_in), jnp.float32)
        xp = jnp.concatenate([z1, x, z1], axis=0)       # (L+2, C_in)
        cols_list.append(
            jnp.concatenate([xp[k:k + L, :] for k in range(3)], axis=1))
    cols = jnp.concatenate(cols_list, axis=0)           # (N*L, 3*C_in)
    b = b_ref[...]                                      # (1, 1)
    ye = jnp.dot(cols, we_ref[...], preferred_element_type=jnp.float32) + b
    yo = jnp.dot(cols, wo_ref[...], preferred_element_type=jnp.float32) + b
    # BatchNorm1d(1), training-mode batch statistics (fresh module: gamma=1,
    # beta=0), biased variance, eps=1e-5.
    # TODO(synk): running-stat tracking (a training-time side effect) is not
    # modeled; eval-mode with default running stats would be a pure rescale.
    cnt = 2.0 * N * L
    s = jnp.sum(ye, axis=0, keepdims=True) + jnp.sum(yo, axis=0, keepdims=True)
    mean = s / cnt
    sq = (jnp.sum((ye - mean) ** 2, axis=0, keepdims=True)
          + jnp.sum((yo - mean) ** 2, axis=0, keepdims=True))
    inv = lax.rsqrt(sq / cnt + EPS)
    oe_ref[...] = (ye - mean) * inv
    oo_ref[...] = (yo - mean) * inv


def final_block(x, w, b):
    """x: (N, L1, 32);  w: (1, 32, 5);  b: (1,)  ->  (N, 2*L1) flattened output."""
    N, L1, c_in = x.shape
    wf = w[0]                                           # (32, 5)
    we = jnp.concatenate([wf[:, 0] + wf[:, 1], wf[:, 2] + wf[:, 3], wf[:, 4]],
                         axis=0).reshape(3 * c_in, 1)
    wo = jnp.concatenate([wf[:, 0], wf[:, 1] + wf[:, 2], wf[:, 3] + wf[:, 4]],
                         axis=0).reshape(3 * c_in, 1)
    oe, oo = pl.pallas_call(
        _final_kernel,
        out_shape=(
            jax.ShapeDtypeStruct((N * L1, 1), jnp.float32),
            jax.ShapeDtypeStruct((N * L1, 1), jnp.float32),
        ),
        grid_spec=pltpu.PrefetchScalarGridSpec(
            num_scalar_prefetch=0,
            grid=(1,),
            in_specs=[
                pl.BlockSpec((N, L1, c_in), lambda i: (0, 0, 0)),
                pl.BlockSpec((3 * c_in, 1), lambda i: (0, 0)),
                pl.BlockSpec((3 * c_in, 1), lambda i: (0, 0)),
                pl.BlockSpec((1, 1), lambda i: (0, 0)),
            ],
            out_specs=(
                pl.BlockSpec((N * L1, 1), lambda i: (0, 0)),
                pl.BlockSpec((N * L1, 1), lambda i: (0, 0)),
            ),
        ),
    )(x, we, wo, b.reshape(1, 1))
    out_e = oe.reshape(N, L1)
    out_o = oo.reshape(N, L1)
    return jnp.stack([out_e, out_o], axis=2).reshape(N, 2 * L1)


# -----------------------------------------------------------------------------
# Full generator
# -----------------------------------------------------------------------------
def generator_1024v2(X, params):
    """X: (N, L) f32 with L % 8 == 0.  Returns (N, L) f32."""
    N, L = X.shape
    x = X[:, :, None]                                             # NLC (N, L, 1)
    d1, d2, d3 = down_path(x, params["w_d1"], params["w_d2"], params["w_d3"])
    u1 = unet_up(d3, d2, params["w_u1"])                          # (N, L/4, 64)
    u2 = unet_up(u1, d1, params["w_u2"])                          # (N, L/2, 32)
    return final_block(u2, params["w_f"], params["b_f"])          # (N, L)


# -----------------------------------------------------------------------------
# Pure-JAX reference of the same forward pass (sanity check only).
# -----------------------------------------------------------------------------
def _reference(X, params):
    leaky = lambda v: jnp.where(v > 0, v, LEAKY * v)
    hi = lax.Precision.HIGHEST

    def down(h, w, normalize):
        y = lax.conv_general_dilated(
            h, w, window_strides=(1,), padding=[(3, 3)],
            dimension_numbers=("NCH", "OIH", "NCH"), precision=hi)
        y = leaky(y)
        n, c, l = y.shape
        p = y.reshape(n, c, l // 2, 2).mean(-1)
        if normalize:
            m = p.mean(-1, keepdims=True)
            v = ((p - m) ** 2).mean(-1, keepdims=True)
            p = (p - m) / jnp.sqrt(v + EPS)
        return leaky(p)

    def up(h, w):
        w_flip = jnp.flip(jnp.transpose(w, (1, 0, 2)), axis=2)
        y = lax.conv_general_dilated(
            h, w_flip, window_strides=(1,), padding=[(3, 4)], lhs_dilation=(2,),
            dimension_numbers=("NCH", "OIH", "NCH"), precision=hi)
        return leaky(y)

    x = X[:, None, :]
    d1 = down(x, params["w_d1"], False)
    d2 = down(d1, params["w_d2"], True)
    d3 = down(d2, params["w_d3"], True)
    u1 = jnp.concatenate([up(d3, params["w_u1"]), d2], axis=1)
    u2 = jnp.concatenate([up(u1, params["w_u2"]), d1], axis=1)
    uu = jnp.repeat(u2, 2, axis=2)                       # nearest x2 upsample
    y = lax.conv_general_dilated(
        uu, params["w_f"], window_strides=(1,), padding=[(2, 2)],
        dimension_numbers=("NCH", "OIH", "NCH"), precision=hi)
    y = y + params["b_f"][None, :, None]
    m = y.mean()
    v = ((y - m) ** 2).mean()
    y = (y - m) / jnp.sqrt(v + EPS)
    return y.reshape(X.shape[0], -1)


if __name__ == "__main__":
    key = jax.random.PRNGKey(0)
    ks = jax.random.split(key, 8)

    N, L = 2, 128                                        # small, L % 8 == 0

    def conv_w(k, shape):                                # (C_out, C_in, K)
        bound = 1.0 / jnp.sqrt(jnp.float32(shape[1] * shape[2]))
        return jax.random.uniform(k, shape, jnp.float32, -bound, bound)

    def convT_w(k, shape):                               # (C_in, C_out, K)
        bound = 1.0 / jnp.sqrt(jnp.float32(shape[0] * shape[2]))
        return jax.random.uniform(k, shape, jnp.float32, -bound, bound)

    params = {
        "w_d1": conv_w(ks[0], (16, 1, 7)),
        "w_d2": conv_w(ks[1], (32, 16, 7)),
        "w_d3": conv_w(ks[2], (32, 32, 7)),
        "w_u1": convT_w(ks[3], (32, 32, 7)),
        "w_u2": convT_w(ks[4], (64, 16, 7)),
        "w_f": conv_w(ks[5], (1, 32, 5)),
        "b_f": jax.random.uniform(ks[6], (1,), jnp.float32, -0.1, 0.1),
    }

    X = jax.random.normal(ks[7], (N, L), dtype=jnp.float32)

    out = jax.block_until_ready(jax.jit(generator_1024v2)(X, params))

    ref = _reference(X, params)
    assert out.shape == (N, L), out.shape
    # Loose-ish tolerance only to cover MXU-vs-XLA f32 matmul precision
    # differences; the output is batch-normalized (O(1) values), so any real
    # semantic/indexing bug would blow far past this.
    assert jnp.allclose(out, ref, atol=3e-2, rtol=3e-2), \
        float(jnp.max(jnp.abs(out - ref)))

    print("KERNEL_OK")
</pallas_src>

<mosaic_0001>
module attributes {stable_mosaic.version = 11 : i64} {
  func.func @_down_path_kernel(%arg0: i32, %arg1: memref<1x128x1xf32, #tpu.memory_space<vmem>>, %arg2: memref<7x16xf32, #tpu.memory_space<vmem>>, %arg3: memref<112x32xf32, #tpu.memory_space<vmem>>, %arg4: memref<224x32xf32, #tpu.memory_space<vmem>>, %arg5: memref<1x64x16xf32, #tpu.memory_space<vmem>>, %arg6: memref<1x32x32xf32, #tpu.memory_space<vmem>>, %arg7: memref<1x16x32xf32, #tpu.memory_space<vmem>>, %arg8: memref<128x16xf32, #tpu.memory_space<vmem>>, %arg9: memref<64x32xf32, #tpu.memory_space<vmem>>, %arg10: memref<32x32xf32, #tpu.memory_space<vmem>>) attributes {dimension_semantics = [#tpu.dimension_semantics<parallel>], iteration_bounds = array<i64: 2>, scalar_prefetch = 0 : i64, scratch_operands = 3 : i64, tpu.core_type = #tpu.core_type<tc>, window_params = [{transform_indices = @transform_0, window_bounds = array<i64: 1, 128, 1>}, {pipeline_mode = #tpu.pipeline_mode<synchronous>, transform_indices = @transform_1, window_bounds = array<i64: 7, 16>}, {pipeline_mode = #tpu.pipeline_mode<synchronous>, transform_indices = @transform_2, window_bounds = array<i64: 112, 32>}, {pipeline_mode = #tpu.pipeline_mode<synchronous>, transform_indices = @transform_3, window_bounds = array<i64: 224, 32>}, {transform_indices = @transform_4, window_bounds = array<i64: 1, 64, 16>}, {transform_indices = @transform_5, window_bounds = array<i64: 1, 32, 32>}, {transform_indices = @transform_6, window_bounds = array<i64: 1, 16, 32>}]} {
    %c0 = arith.constant 0 : index
    %c0_0 = arith.constant 0 : index
    %c0_1 = arith.constant 0 : index
    %0 = vector.load %arg1[%c0, %c0_0, %c0_1] : memref<1x128x1xf32, #tpu.memory_space<vmem>>, vector<1x128x1xf32>
    %1 = vector.shape_cast %0 : vector<1x128x1xf32> to vector<128x1xf32>
    %cst = arith.constant 0.000000e+00 : f32
    %2 = vector.broadcast %cst : f32 to vector<3x1xf32>
    %3 = tpu.concatenate %2, %1, %2 in 0 : vector<3x1xf32>, vector<128x1xf32>, vector<3x1xf32> -> vector<134x1xf32>
    %4 = vector.extract_strided_slice %3 {offsets = [0, 0], sizes = [128, 1], strides = [1, 1]} : vector<134x1xf32> to vector<128x1xf32>
    %5 = vector.extract_strided_slice %3 {offsets = [1, 0], sizes = [128, 1], strides = [1, 1]} : vector<134x1xf32> to vector<128x1xf32>
    %6 = vector.extract_strided_slice %3 {offsets = [2, 0], sizes = [128, 1], strides = [1, 1]} : vector<134x1xf32> to vector<128x1xf32>
    %7 = vector.extract_strided_slice %3 {offsets = [3, 0], sizes = [128, 1], strides = [1, 1]} : vector<134x1xf32> to vector<128x1xf32>
    %8 = vector.extract_strided_slice %3 {offsets = [4, 0], sizes = [128, 1], strides = [1, 1]} : vector<134x1xf32> to vector<128x1xf32>
    %9 = vector.extract_strided_slice %3 {offsets = [5, 0], sizes = [128, 1], strides = [1, 1]} : vector<134x1xf32> to vector<128x1xf32>
    %10 = vector.extract_strided_slice %3 {offsets = [6, 0], sizes = [128, 1], strides = [1, 1]} : vector<134x1xf32> to vector<128x1xf32>
    %11 = tpu.concatenate %4, %5, %6, %7, %8, %9, %10 in 1 : vector<128x1xf32>, vector<128x1xf32>, vector<128x1xf32>, vector<128x1xf32>, vector<128x1xf32>, vector<128x1xf32>, vector<128x1xf32> -> vector<128x7xf32>
    %c0_2 = arith.constant 0 : index
    %c0_3 = arith.constant 0 : index
    %12 = vector.load %arg2[%c0_2, %c0_3] : memref<7x16xf32, #tpu.memory_space<vmem>>, vector<7x16xf32>
    %cst_4 = arith.constant dense<0.000000e+00> : vector<128x16xf32>
    %13 = tpu.matmul %11, %12, %cst_4 {dimension_numbers = #tpu.dot_dimension_numbers<[1], [0], [0], [1], [0, 0, 1, 1], [], []>} : vector<128x7xf32>, vector<7x16xf32>, vector<128x16xf32> -> vector<128x16xf32>
    %cst_5 = arith.constant 0.000000e+00 : f32
    %14 = vector.broadcast %cst_5 : f32 to vector<128x16xf32>
    %15 = arith.cmpf ogt, %13, %14 : vector<128x16xf32>
    %cst_6 = arith.constant 2.000000e-01 : f32
    %16 = vector.broadcast %cst_6 : f32 to vector<128x16xf32>
    %17 = arith.mulf %16, %13 : vector<128x16xf32>
    %18 = arith.select %15, %13, %17 : vector<128x16xi1>, vector<128x16xf32>
    %c0_7 = arith.constant 0 : index
    %c0_8 = arith.constant 0 : index
    %19 = vector.load %arg8[%c0_7, %c0_8] : memref<128x16xf32, #tpu.memory_space<vmem>>, vector<128x16xf32>
    tpu.vector_store %arg8[%c0_7, %c0_8], %18 {strides = array<i32>} : memref<128x16xf32, #tpu.memory_space<vmem>>, vector<128x16xf32>,
    %c0_9 = arith.constant 0 : index
    %c0_10 = arith.constant 0 : index
    %20 = tpu.strided_load %arg8[%c0_9, %c0_10] {strides = array<i32: 2, 1>} : memref<128x16xf32, #tpu.memory_space<vmem>>, vector<64x16xf32>
    %c1 = arith.constant 1 : index
    %c0_11 = arith.constant 0 : index
    %21 = tpu.strided_load %arg8[%c1, %c0_11] {strides = array<i32: 2, 1>} : memref<128x16xf32, #tpu.memory_space<vmem>>, vector<64x16xf32>
    %22 = arith.addf %20, %21 : vector<64x16xf32>
    %cst_12 = arith.constant 5.000000e-01 : f32
    %23 = vector.broadcast %cst_12 : f32 to vector<64x16xf32>
    %24 = arith.mulf %23, %22 : vector<64x16xf32>
    %cst_13 = arith.constant 0.000000e+00 : f32
    %25 = vector.broadcast %cst_13 : f32 to vector<64x16xf32>
    %26 = arith.cmpf ogt, %24, %25 : vector<64x16xf32>
    %cst_14 = arith.constant 2.000000e-01 : f32
    %27 = vector.broadcast %cst_14 : f32 to vector<64x16xf32>
    %28 = arith.mulf %27, %24 : vector<64x16xf32>
    %29 = arith.select %26, %24, %28 : vector<64x16xi1>, vector<64x16xf32>
    %c0_15 = arith.constant 0 : index
    %c0_16 = arith.constant 0 : index
    %c0_17 = arith.constant 0 : index
    %30 = vector.load %arg5[%c0_15, %c0_16, %c0_17] : memref<1x64x16xf32, #tpu.memory_space<vmem>>, vector<1x64x16xf32>
    %31 = vector.shape_cast %30 : vector<1x64x16xf32> to vector<64x16xf32>
    %32 = vector.shape_cast %29 : vector<64x16xf32> to vector<1x64x16xf32>
    tpu.vector_store %arg5[%c0_15, %c0_16, %c0_17], %32 {strides = array<i32>} : memref<1x64x16xf32, #tpu.memory_space<vmem>>, vector<1x64x16xf32>,
    %cst_18 = arith.constant 0.000000e+00 : f32
    %33 = vector.broadcast %cst_18 : f32 to vector<3x16xf32>
    %34 = tpu.concatenate %33, %29, %33 in 0 : vector<3x16xf32>, vector<64x16xf32>, vector<3x16xf32> -> vector<70x16xf32>
    %35 = vector.extract_strided_slice %34 {offsets = [0, 0], sizes = [64, 16], strides = [1, 1]} : vector<70x16xf32> to vector<64x16xf32>
    %36 = vector.extract_strided_slice %34 {offsets = [1, 0], sizes = [64, 16], strides = [1, 1]} : vector<70x16xf32> to vector<64x16xf32>
    %37 = vector.extract_strided_slice %34 {offsets = [2, 0], sizes = [64, 16], strides = [1, 1]} : vector<70x16xf32> to vector<64x16xf32>
    %38 = vector.extract_strided_slice %34 {offsets = [3, 0], sizes = [64, 16], strides = [1, 1]} : vector<70x16xf32> to vector<64x16xf32>
    %39 = vector.extract_strided_slice %34 {offsets = [4, 0], sizes = [64, 16], strides = [1, 1]} : vector<70x16xf32> to vector<64x16xf32>
    %40 = vector.extract_strided_slice %34 {offsets = [5, 0], sizes = [64, 16], strides = [1, 1]} : vector<70x16xf32> to vector<64x16xf32>
    %41 = vector.extract_strided_slice %34 {offsets = [6, 0], sizes = [64, 16], strides = [1, 1]} : vector<70x16xf32> to vector<64x16xf32>
    %42 = tpu.concatenate %35, %36, %37, %38, %39, %40, %41 in 1 : vector<64x16xf32>, vector<64x16xf32>, vector<64x16xf32>, vector<64x16xf32>, vector<64x16xf32>, vector<64x16xf32>, vector<64x16xf32> -> vector<64x112xf32>
    %c0_19 = arith.constant 0 : index
    %c0_20 = arith.constant 0 : index
    %43 = vector.load %arg3[%c0_19, %c0_20] : memref<112x32xf32, #tpu.memory_space<vmem>>, vector<112x32xf32>
    %cst_21 = arith.constant dense<0.000000e+00> : vector<64x32xf32>
    %44 = tpu.matmul %42, %43, %cst_21 {dimension_numbers = #tpu.dot_dimension_numbers<[1], [0], [0], [1], [0, 0, 1, 1], [], []>} : vector<64x112xf32>, vector<112x32xf32>, vector<64x32xf32> -> vector<64x32xf32>
    %cst_22 = arith.constant 0.000000e+00 : f32
    %45 = vector.broadcast %cst_22 : f32 to vector<64x32xf32>
    %46 = arith.cmpf ogt, %44, %45 : vector<64x32xf32>
    %cst_23 = arith.constant 2.000000e-01 : f32
    %47 = vector.broadcast %cst_23 : f32 to vector<64x32xf32>
    %48 = arith.mulf %47, %44 : vector<64x32xf32>
    %49 = arith.select %46, %44, %48 : vector<64x32xi1>, vector<64x32xf32>
    %c0_24 = arith.constant 0 : index
    %c0_25 = arith.constant 0 : index
    %50 = vector.load %arg9[%c0_24, %c0_25] : memref<64x32xf32, #tpu.memory_space<vmem>>, vector<64x32xf32>
    tpu.vector_store %arg9[%c0_24, %c0_25], %49 {strides = array<i32>} : memref<64x32xf32, #tpu.memory_space<vmem>>, vector<64x32xf32>,
    %c0_26 = arith.constant 0 : index
    %c0_27 = arith.constant 0 : index
    %51 = tpu.strided_load %arg9[%c0_26, %c0_27] {strides = array<i32: 2, 1>} : memref<64x32xf32, #tpu.memory_space<vmem>>, vector<32x32xf32>
    %c1_28 = arith.constant 1 : index
    %c0_29 = arith.constant 0 : index
    %52 = tpu.strided_load %arg9[%c1_28, %c0_29] {strides = array<i32: 2, 1>} : memref<64x32xf32, #tpu.memory_space<vmem>>, vector<32x32xf32>
    %53 = arith.addf %51, %52 : vector<32x32xf32>
    %cst_30 = arith.constant 5.000000e-01 : f32
    %54 = vector.broadcast %cst_30 : f32 to vector<32x32xf32>
    %55 = arith.mulf %54, %53 : vector<32x32xf32>
    %cst_31 = arith.constant dense<0.000000e+00> : vector<32xf32>
    %56 = vector.multi_reduction <add>, %55, %cst_31 [0] : vector<32x32xf32> to vector<32xf32>
    %57 = vector.shape_cast %56 : vector<32xf32> to vector<1x32xf32>
    %cst_32 = arith.constant 3.200000e+01 : f32
    %58 = vector.broadcast %cst_32 : f32 to vector<1x32xf32>
    %59 = arith.divf %57, %58 : vector<1x32xf32>
    %60 = vector.broadcast %59 : vector<1x32xf32> to vector<32x32xf32>
    %61 = arith.subf %55, %60 : vector<32x32xf32>
    %62 = arith.mulf %61, %61 : vector<32x32xf32>
    %cst_33 = arith.constant dense<0.000000e+00> : vector<32xf32>
    %63 = vector.multi_reduction <add>, %62, %cst_33 [0] : vector<32x32xf32> to vector<32xf32>
    %64 = vector.shape_cast %63 : vector<32xf32> to vector<1x32xf32>
    %cst_34 = arith.constant 3.200000e+01 : f32
    %65 = vector.broadcast %cst_34 : f32 to vector<1x32xf32>
    %66 = arith.divf %64, %65 : vector<1x32xf32>
    %67 = vector.broadcast %59 : vector<1x32xf32> to vector<32x32xf32>
    %68 = arith.subf %55, %67 : vector<32x32xf32>
    %cst_35 = arith.constant 9.99999974E-6 : f32
    %69 = vector.broadcast %cst_35 : f32 to vector<1x32xf32>
    %70 = arith.addf %66, %69 : vector<1x32xf32>
    %71 = math.rsqrt %70 : vector<1x32xf32>
    %72 = vector.broadcast %71 : vector<1x32xf32> to vector<32x32xf32>
    %73 = arith.mulf %68, %72 : vector<32x32xf32>
    %cst_36 = arith.constant 0.000000e+00 : f32
    %74 = vector.broadcast %cst_36 : f32 to vector<32x32xf32>
    %75 = arith.cmpf ogt, %73, %74 : vector<32x32xf32>
    %cst_37 = arith.constant 2.000000e-01 : f32
    %76 = vector.broadcast %cst_37 : f32 to vector<32x32xf32>
    %77 = arith.mulf %76, %73 : vector<32x32xf32>
    %78 = arith.select %75, %73, %77 : vector<32x32xi1>, vector<32x32xf32>
    %c0_38 = arith.constant 0 : index
    %c0_39 = arith.constant 0 : index
    %c0_40 = arith.constant 0 : index
    %79 = vector.load %arg6[%c0_38, %c0_39, %c0_40] : memref<1x32x32xf32, #tpu.memory_space<vmem>>, vector<1x32x32xf32>
    %80 = vector.shape_cast %79 : vector<1x32x32xf32> to vector<32x32xf32>
    %81 = vector.shape_cast %78 : vector<32x32xf32> to vector<1x32x32xf32>
    tpu.vector_store %arg6[%c0_38, %c0_39, %c0_40], %81 {strides = array<i32>} : memref<1x32x32xf32, #tpu.memory_space<vmem>>, vector<1x32x32xf32>,
    %cst_41 = arith.constant 0.000000e+00 : f32
    %82 = vector.broadcast %cst_41 : f32 to vector<3x32xf32>
    %83 = tpu.concatenate %82, %78, %82 in 0 : vector<3x32xf32>, vector<32x32xf32>, vector<3x32xf32> -> vector<38x32xf32>
    %84 = vector.extract_strided_slice %83 {offsets = [0, 0], sizes = [32, 32], strides = [1, 1]} : vector<38x32xf32> to vector<32x32xf32>
    %85 = vector.extract_strided_slice %83 {offsets = [1, 0], sizes = [32, 32], strides = [1, 1]} : vector<38x32xf32> to vector<32x32xf32>
    %86 = vector.extract_strided_slice %83 {offsets = [2, 0], sizes = [32, 32], strides = [1, 1]} : vector<38x32xf32> to vector<32x32xf32>
    %87 = vector.extract_strided_slice %83 {offsets = [3, 0], sizes = [32, 32], strides = [1, 1]} : vector<38x32xf32> to vector<32x32xf32>
    %88 = vector.extract_strided_slice %83 {offsets = [4, 0], sizes = [32, 32], strides = [1, 1]} : vector<38x32xf32> to vector<32x32xf32>
    %89 = vector.extract_strided_slice %83 {offsets = [5, 0], sizes = [32, 32], strides = [1, 1]} : vector<38x32xf32> to vector<32x32xf32>
    %90 = vector.extract_strided_slice %83 {offsets = [6, 0], sizes = [32, 32], strides = [1, 1]} : vector<38x32xf32> to vector<32x32xf32>
    %91 = tpu.concatenate %84, %85, %86, %87, %88, %89, %90 in 1 : vector<32x32xf32>, vector<32x32xf32>, vector<32x32xf32>, vector<32x32xf32>, vector<32x32xf32>, vector<32x32xf32>, vector<32x32xf32> -> vector<32x224xf32>
    %c0_42 = arith.constant 0 : index
    %c0_43 = arith.constant 0 : index
    %92 = vector.load %arg4[%c0_42, %c0_43] : memref<224x32xf32, #tpu.memory_space<vmem>>, vector<224x32xf32>
    %cst_44 = arith.constant dense<0.000000e+00> : vector<32x32xf32>
    %93 = tpu.matmul %91, %92, %cst_44 {dimension_numbers = #tpu.dot_dimension_numbers<[1], [0], [0], [1], [0, 0, 1, 1], [], []>} : vector<32x224xf32>, vector<224x32xf32>, vector<32x32xf32> -> vector<32x32xf32>
    %cst_45 = arith.constant 0.000000e+00 : f32
    %94 = vector.broadcast %cst_45 : f32 to vector<32x32xf32>
    %95 = arith.cmpf ogt, %93, %94 : vector<32x32xf32>
    %cst_46 = arith.constant 2.000000e-01 : f32
    %96 = vector.broadcast %cst_46 : f32 to vector<32x32xf32>
    %97 = arith.mulf %96, %93 : vector<32x32xf32>
    %98 = arith.select %95, %93, %97 : vector<32x32xi1>, vector<32x32xf32>
    %c0_47 = arith.constant 0 : index
    %c0_48 = arith.constant 0 : index
    %99 = vector.load %arg10[%c0_47, %c0_48] : memref<32x32xf32, #tpu.memory_space<vmem>>, vector<32x32xf32>
    tpu.vector_store %arg10[%c0_47, %c0_48], %98 {strides = array<i32>} : memref<32x32xf32, #tpu.memory_space<vmem>>, vector<32x32xf32>,
    %c0_49 = arith.constant 0 : index
    %c0_50 = arith.constant 0 : index
    %100 = tpu.strided_load %arg10[%c0_49, %c0_50] {strides = array<i32: 2, 1>} : memref<32x32xf32, #tpu.memory_space<vmem>>, vector<16x32xf32>
    %c1_51 = arith.constant 1 : index
    %c0_52 = arith.constant 0 : index
    %101 = tpu.strided_load %arg10[%c1_51, %c0_52] {strides = array<i32: 2, 1>} : memref<32x32xf32, #tpu.memory_space<vmem>>, vector<16x32xf32>
    %102 = arith.addf %100, %101 : vector<16x32xf32>
    %cst_53 = arith.constant 5.000000e-01 : f32
    %103 = vector.broadcast %cst_53 : f32 to vector<16x32xf32>
    %104 = arith.mulf %103, %102 : vector<16x32xf32>
    %cst_54 = arith.constant dense<0.000000e+00> : vector<32xf32>
    %105 = vector.multi_reduction <add>, %104, %cst_54 [0] : vector<16x32xf32> to vector<32xf32>
    %106 = vector.shape_cast %105 : vector<32xf32> to vector<1x32xf32>
    %cst_55 = arith.constant 1.600000e+01 : f32
    %107 = vector.broadcast %cst_55 : f32 to vector<1x32xf32>
    %108 = arith.divf %106, %107 : vector<1x32xf32>
    %109 = vector.broadcast %108 : vector<1x32xf32> to vector<16x32xf32>
    %110 = arith.subf %104, %109 : vector<16x32xf32>
    %111 = arith.mulf %110, %110 : vector<16x32xf32>
    %cst_56 = arith.constant dense<0.000000e+00> : vector<32xf32>
    %112 = vector.multi_reduction <add>, %111, %cst_56 [0] : vector<16x32xf32> to vector<32xf32>
    %113 = vector.shape_cast %112 : vector<32xf32> to vector<1x32xf32>
    %cst_57 = arith.constant 1.600000e+01 : f32
    %114 = vector.broadcast %cst_57 : f32 to vector<1x32xf32>
    %115 = arith.divf %113, %114 : vector<1x32xf32>
    %116 = vector.broadcast %108 : vector<1x32xf32> to vector<16x32xf32>
    %117 = arith.subf %104, %116 : vector<16x32xf32>
    %cst_58 = arith.constant 9.99999974E-6 : f32
    %118 = vector.broadcast %cst_58 : f32 to vector<1x32xf32>
    %119 = arith.addf %115, %118 : vector<1x32xf32>
    %120 = math.rsqrt %119 : vector<1x32xf32>
    %121 = vector.broadcast %120 : vector<1x32xf32> to vector<16x32xf32>
    %122 = arith.mulf %117, %121 : vector<16x32xf32>
    %cst_59 = arith.constant 0.000000e+00 : f32
    %123 = vector.broadcast %cst_59 : f32 to vector<16x32xf32>
    %124 = arith.cmpf ogt, %122, %123 : vector<16x32xf32>
    %cst_60 = arith.constant 2.000000e-01 : f32
    %125 = vector.broadcast %cst_60 : f32 to vector<16x32xf32>
    %126 = arith.mulf %125, %122 : vector<16x32xf32>
    %127 = arith.select %124, %122, %126 : vector<16x32xi1>, vector<16x32xf32>
    %c0_61 = arith.constant 0 : index
    %c0_62 = arith.constant 0 : index
    %c0_63 = arith.constant 0 : index
    %128 = vector.load %arg7[%c0_61, %c0_62, %c0_63] : memref<1x16x32xf32, #tpu.memory_space<vmem>>, vector<1x16x32xf32>
    %129 = vector.shape_cast %128 : vector<1x16x32xf32> to vector<16x32xf32>
    %130 = vector.shape_cast %127 : vector<16x32xf32> to vector<1x16x32xf32>
    tpu.vector_store %arg7[%c0_61, %c0_62, %c0_63], %130 {strides = array<i32>} : memref<1x16x32xf32, #tpu.memory_space<vmem>>, vector<1x16x32xf32>,
    return
  }
  func.func @transform_0(%arg0: i32) -> (i32, i32, i32) {
    %c0_i32 = arith.constant 0 : i32
    %c0_i32_0 = arith.constant 0 : i32
    %c0_i32_1 = arith.constant 0 : i32
    return %arg0, %c0_i32, %c0_i32_0 : i32, i32, i32
  }
  func.func @transform_1(%arg0: i32) -> (i32, i32) {
    %c0_i32 = arith.constant 0 : i32
    %c0_i32_0 = arith.constant 0 : i32
    %c0_i32_1 = arith.constant 0 : i32
    return %c0_i32, %c0_i32_0 : i32, i32
  }
  func.func @transform_2(%arg0: i32) -> (i32, i32) {
    %c0_i32 = arith.constant 0 : i32
    %c0_i32_0 = arith.constant 0 : i32
    %c0_i32_1 = arith.constant 0 : i32
    return %c0_i32, %c0_i32_0 : i32, i32
  }
  func.func @transform_3(%arg0: i32) -> (i32, i32) {
    %c0_i32 = arith.constant 0 : i32
    %c0_i32_0 = arith.constant 0 : i32
    %c0_i32_1 = arith.constant 0 : i32
    return %c0_i32, %c0_i32_0 : i32, i32
  }
  func.func @transform_4(%arg0: i32) -> (i32, i32, i32) {
    %c0_i32 = arith.constant 0 : i32
    %c0_i32_0 = arith.constant 0 : i32
    %c0_i32_1 = arith.constant 0 : i32
    return %arg0, %c0_i32, %c0_i32_0 : i32, i32, i32
  }
  func.func @transform_5(%arg0: i32) -> (i32, i32, i32) {
    %c0_i32 = arith.constant 0 : i32
    %c0_i32_0 = arith.constant 0 : i32
    %c0_i32_1 = arith.constant 0 : i32
    return %arg0, %c0_i32, %c0_i32_0 : i32, i32, i32
  }
  func.func @transform_6(%arg0: i32) -> (i32, i32, i32) {
    %c0_i32 = arith.constant 0 : i32
    %c0_i32_0 = arith.constant 0 : i32
    %c0_i32_1 = arith.constant 0 : i32
    return %arg0, %c0_i32, %c0_i32_0 : i32, i32, i32
  }
}

module attributes {stable_mosaic.version = 11 : i64} {
  func.func @_up_kernel(%arg0: i32, %arg1: memref<1x16x32xf32, #tpu.memory_space<vmem>>, %arg2: memref<1x32x32xf32, #tpu.memory_space<vmem>>, %arg3: memref<128x32xf32, #tpu.memory_space<vmem>>, %arg4: memref<128x32xf32, #tpu.memory_space<vmem>>, %arg5: memref<1x16x64xf32, #tpu.memory_space<vmem>>, %arg6: memref<1x16x64xf32, #tpu.memory_space<vmem>>) attributes {dimension_semantics = [#tpu.dimension_semantics<parallel>], iteration_bounds = array<i64: 2>, scalar_prefetch = 0 : i64, scratch_operands = 0 : i64, tpu.core_type = #tpu.core_type<tc>, window_params = [{transform_indices = @transform_0, window_bounds = array<i64: 1, 16, 32>}, {transform_indices = @transform_1, window_bounds = array<i64: 1, 32, 32>}, {pipeline_mode = #tpu.pipeline_mode<synchronous>, transform_indices = @transform_2, window_bounds = array<i64: 128, 32>}, {pipeline_mode = #tpu.pipeline_mode<synchronous>, transform_indices = @transform_3, window_bounds = array<i64: 128, 32>}, {transform_indices = @transform_4, window_bounds = array<i64: 1, 16, 64>}, {transform_indices = @transform_5, window_bounds = array<i64: 1, 16, 64>}]} {
    %c0 = arith.constant 0 : index
    %c0_0 = arith.constant 0 : index
    %c0_1 = arith.constant 0 : index
    %0 = vector.load %arg1[%c0, %c0_0, %c0_1] : memref<1x16x32xf32, #tpu.memory_space<vmem>>, vector<1x16x32xf32>
    %1 = vector.shape_cast %0 : vector<1x16x32xf32> to vector<16x32xf32>
    %cst = arith.constant 0.000000e+00 : f32
    %2 = vector.broadcast %cst : f32 to vector<1x32xf32>
    %cst_2 = arith.constant 0.000000e+00 : f32
    %3 = vector.broadcast %cst_2 : f32 to vector<2x32xf32>
    %4 = tpu.concatenate %2, %1, %3 in 0 : vector<1x32xf32>, vector<16x32xf32>, vector<2x32xf32> -> vector<19x32xf32>
    %5 = vector.extract_strided_slice %4 {offsets = [0, 0], sizes = [16, 32], strides = [1, 1]} : vector<19x32xf32> to vector<16x32xf32>
    %6 = vector.extract_strided_slice %4 {offsets = [1, 0], sizes = [16, 32], strides = [1, 1]} : vector<19x32xf32> to vector<16x32xf32>
    %7 = vector.extract_strided_slice %4 {offsets = [2, 0], sizes = [16, 32], strides = [1, 1]} : vector<19x32xf32> to vector<16x32xf32>
    %8 = vector.extract_strided_slice %4 {offsets = [3, 0], sizes = [16, 32], strides = [1, 1]} : vector<19x32xf32> to vector<16x32xf32>
    %9 = tpu.concatenate %5, %6, %7, %8 in 1 : vector<16x32xf32>, vector<16x32xf32>, vector<16x32xf32>, vector<16x32xf32> -> vector<16x128xf32>
    %c0_3 = arith.constant 0 : index
    %c0_4 = arith.constant 0 : index
    %10 = vector.load %arg3[%c0_3, %c0_4] : memref<128x32xf32, #tpu.memory_space<vmem>>, vector<128x32xf32>
    %cst_5 = arith.constant dense<0.000000e+00> : vector<16x32xf32>
    %11 = tpu.matmul %9, %10, %cst_5 {dimension_numbers = #tpu.dot_dimension_numbers<[1], [0], [0], [1], [0, 0, 1, 1], [], []>} : vector<16x128xf32>, vector<128x32xf32>, vector<16x32xf32> -> vector<16x32xf32>
    %cst_6 = arith.constant 0.000000e+00 : f32
    %12 = vector.broadcast %cst_6 : f32 to vector<16x32xf32>
    %13 = arith.cmpf ogt, %11, %12 : vector<16x32xf32>
    %cst_7 = arith.constant 2.000000e-01 : f32
    %14 = vector.broadcast %cst_7 : f32 to vector<16x32xf32>
    %15 = arith.mulf %14, %11 : vector<16x32xf32>
    %16 = arith.select %13, %11, %15 : vector<16x32xi1>, vector<16x32xf32>
    %c0_8 = arith.constant 0 : index
    %c0_9 = arith.constant 0 : index
    %17 = vector.load %arg4[%c0_8, %c0_9] : memref<128x32xf32, #tpu.memory_space<vmem>>, vector<128x32xf32>
    %cst_10 = arith.constant dense<0.000000e+00> : vector<16x32xf32>
    %18 = tpu.matmul %9, %17, %cst_10 {dimension_numbers = #tpu.dot_dimension_numbers<[1], [0], [0], [1], [0, 0, 1, 1], [], []>} : vector<16x128xf32>, vector<128x32xf32>, vector<16x32xf32> -> vector<16x32xf32>
    %cst_11 = arith.constant 0.000000e+00 : f32
    %19 = vector.broadcast %cst_11 : f32 to vector<16x32xf32>
    %20 = arith.cmpf ogt, %18, %19 : vector<16x32xf32>
    %cst_12 = arith.constant 2.000000e-01 : f32
    %21 = vector.broadcast %cst_12 : f32 to vector<16x32xf32>
    %22 = arith.mulf %21, %18 : vector<16x32xf32>
    %23 = arith.select %20, %18, %22 : vector<16x32xi1>, vector<16x32xf32>
    %c0_13 = arith.constant 0 : index
    %c0_14 = arith.constant 0 : index
    %c0_15 = arith.constant 0 : index
    %24 = tpu.strided_load %arg2[%c0_13, %c0_14, %c0_15] {strides = array<i32: 1, 2, 1>} : memref<1x32x32xf32, #tpu.memory_space<vmem>>, vector<1x16x32xf32>
    %25 = vector.shape_cast %24 : vector<1x16x32xf32> to vector<16x32xf32>
    %26 = tpu.concatenate %16, %25 in 1 : vector<16x32xf32>, vector<16x32xf32> -> vector<16x64xf32>
    %c0_16 = arith.constant 0 : index
    %c0_17 = arith.constant 0 : index
    %c0_18 = arith.constant 0 : index
    %27 = vector.load %arg5[%c0_16, %c0_17, %c0_18] : memref<1x16x64xf32, #tpu.memory_space<vmem>>, vector<1x16x64xf32>
    %28 = vector.shape_cast %27 : vector<1x16x64xf32> to vector<16x64xf32>
    %29 = vector.shape_cast %26 : vector<16x64xf32> to vector<1x16x64xf32>
    tpu.vector_store %arg5[%c0_16, %c0_17, %c0_18], %29 {strides = array<i32>} : memref<1x16x64xf32, #tpu.memory_space<vmem>>, vector<1x16x64xf32>,
    %c0_19 = arith.constant 0 : index
    %c1 = arith.constant 1 : index
    %c0_20 = arith.constant 0 : index
    %30 = tpu.strided_load %arg2[%c0_19, %c1, %c0_20] {strides = array<i32: 1, 2, 1>} : memref<1x32x32xf32, #tpu.memory_space<vmem>>, vector<1x16x32xf32>
    %31 = vector.shape_cast %30 : vector<1x16x32xf32> to vector<16x32xf32>
    %32 = tpu.concatenate %23, %31 in 1 : vector<16x32xf32>, vector<16x32xf32> -> vector<16x64xf32>
    %c0_21 = arith.constant 0 : index
    %c0_22 = arith.constant 0 : index
    %c0_23 = arith.constant 0 : index
    %33 = vector.load %arg6[%c0_21, %c0_22, %c0_23] : memref<1x16x64xf32, #tpu.memory_space<vmem>>, vector<1x16x64xf32>
    %34 = vector.shape_cast %33 : vector<1x16x64xf32> to vector<16x64xf32>
    %35 = vector.shape_cast %32 : vector<16x64xf32> to vector<1x16x64xf32>
    tpu.vector_store %arg6[%c0_21, %c0_22, %c0_23], %35 {strides = array<i32>} : memref<1x16x64xf32, #tpu.memory_space<vmem>>, vector<1x16x64xf32>,
    return
  }
  func.func @transform_0(%arg0: i32) -> (i32, i32, i32) {
    %c0_i32 = arith.constant 0 : i32
    %c0_i32_0 = arith.constant 0 : i32
    %c0_i32_1 = arith.constant 0 : i32
    return %arg0, %c0_i32, %c0_i32_0 : i32, i32, i32
  }
  func.func @transform_1(%arg0: i32) -> (i32, i32, i32) {
    %c0_i32 = arith.constant 0 : i32
    %c0_i32_0 = arith.constant 0 : i32
    %c0_i32_1 = arith.constant 0 : i32
    return %arg0, %c0_i32, %c0_i32_0 : i32, i32, i32
  }
  func.func @transform_2(%arg0: i32) -> (i32, i32) {
    %c0_i32 = arith.constant 0 : i32
    %c0_i32_0 = arith.constant 0 : i32
    %c0_i32_1 = arith.constant 0 : i32
    return %c0_i32, %c0_i32_0 : i32, i32
  }
  func.func @transform_3(%arg0: i32) -> (i32, i32) {
    %c0_i32 = arith.constant 0 : i32
    %c0_i32_0 = arith.constant 0 : i32
    %c0_i32_1 = arith.constant 0 : i32
    return %c0_i32, %c0_i32_0 : i32, i32
  }
  func.func @transform_4(%arg0: i32) -> (i32, i32, i32) {
    %c0_i32 = arith.constant 0 : i32
    %c0_i32_0 = arith.constant 0 : i32
    %c0_i32_1 = arith.constant 0 : i32
    return %arg0, %c0_i32, %c0_i32_0 : i32, i32, i32
  }
  func.func @transform_5(%arg0: i32) -> (i32, i32, i32) {
    %c0_i32 = arith.constant 0 : i32
    %c0_i32_0 = arith.constant 0 : i32
    %c0_i32_1 = arith.constant 0 : i32
    return %arg0, %c0_i32, %c0_i32_0 : i32, i32, i32
  }
}

module attributes {stable_mosaic.version = 11 : i64} {
  func.func @_up_kernel(%arg0: i32, %arg1: memref<1x32x64xf32, #tpu.memory_space<vmem>>, %arg2: memref<1x64x16xf32, #tpu.memory_space<vmem>>, %arg3: memref<256x16xf32, #tpu.memory_space<vmem>>, %arg4: memref<256x16xf32, #tpu.memory_space<vmem>>, %arg5: memref<1x32x32xf32, #tpu.memory_space<vmem>>, %arg6: memref<1x32x32xf32, #tpu.memory_space<vmem>>) attributes {dimension_semantics = [#tpu.dimension_semantics<parallel>], iteration_bounds = array<i64: 2>, scalar_prefetch = 0 : i64, scratch_operands = 0 : i64, tpu.core_type = #tpu.core_type<tc>, window_params = [{transform_indices = @transform_0, window_bounds = array<i64: 1, 32, 64>}, {transform_indices = @transform_1, window_bounds = array<i64: 1, 64, 16>}, {pipeline_mode = #tpu.pipeline_mode<synchronous>, transform_indices = @transform_2, window_bounds = array<i64: 256, 16>}, {pipeline_mode = #tpu.pipeline_mode<synchronous>, transform_indices = @transform_3, window_bounds = array<i64: 256, 16>}, {transform_indices = @transform_4, window_bounds = array<i64: 1, 32, 32>}, {transform_indices = @transform_5, window_bounds = array<i64: 1, 32, 32>}]} {
    %c0 = arith.constant 0 : index
    %c0_0 = arith.constant 0 : index
    %c0_1 = arith.constant 0 : index
    %0 = vector.load %arg1[%c0, %c0_0, %c0_1] : memref<1x32x64xf32, #tpu.memory_space<vmem>>, vector<1x32x64xf32>
    %1 = vector.shape_cast %0 : vector<1x32x64xf32> to vector<32x64xf32>
    %cst = arith.constant 0.000000e+00 : f32
    %2 = vector.broadcast %cst : f32 to vector<1x64xf32>
    %cst_2 = arith.constant 0.000000e+00 : f32
    %3 = vector.broadcast %cst_2 : f32 to vector<2x64xf32>
    %4 = tpu.concatenate %2, %1, %3 in 0 : vector<1x64xf32>, vector<32x64xf32>, vector<2x64xf32> -> vector<35x64xf32>
    %5 = vector.extract_strided_slice %4 {offsets = [0, 0], sizes = [32, 64], strides = [1, 1]} : vector<35x64xf32> to vector<32x64xf32>
    %6 = vector.extract_strided_slice %4 {offsets = [1, 0], sizes = [32, 64], strides = [1, 1]} : vector<35x64xf32> to vector<32x64xf32>
    %7 = vector.extract_strided_slice %4 {offsets = [2, 0], sizes = [32, 64], strides = [1, 1]} : vector<35x64xf32> to vector<32x64xf32>
    %8 = vector.extract_strided_slice %4 {offsets = [3, 0], sizes = [32, 64], strides = [1, 1]} : vector<35x64xf32> to vector<32x64xf32>
    %9 = tpu.concatenate %5, %6, %7, %8 in 1 : vector<32x64xf32>, vector<32x64xf32>, vector<32x64xf32>, vector<32x64xf32> -> vector<32x256xf32>
    %c0_3 = arith.constant 0 : index
    %c0_4 = arith.constant 0 : index
    %10 = vector.load %arg3[%c0_3, %c0_4] : memref<256x16xf32, #tpu.memory_space<vmem>>, vector<256x16xf32>
    %cst_5 = arith.constant dense<0.000000e+00> : vector<32x16xf32>
    %11 = tpu.matmul %9, %10, %cst_5 {dimension_numbers = #tpu.dot_dimension_numbers<[1], [0], [0], [1], [0, 0, 1, 1], [], []>} : vector<32x256xf32>, vector<256x16xf32>, vector<32x16xf32> -> vector<32x16xf32>
    %cst_6 = arith.constant 0.000000e+00 : f32
    %12 = vector.broadcast %cst_6 : f32 to vector<32x16xf32>
    %13 = arith.cmpf ogt, %11, %12 : vector<32x16xf32>
    %cst_7 = arith.constant 2.000000e-01 : f32
    %14 = vector.broadcast %cst_7 : f32 to vector<32x16xf32>
    %15 = arith.mulf %14, %11 : vector<32x16xf32>
    %16 = arith.select %13, %11, %15 : vector<32x16xi1>, vector<32x16xf32>
    %c0_8 = arith.constant 0 : index
    %c0_9 = arith.constant 0 : index
    %17 = vector.load %arg4[%c0_8, %c0_9] : memref<256x16xf32, #tpu.memory_space<vmem>>, vector<256x16xf32>
    %cst_10 = arith.constant dense<0.000000e+00> : vector<32x16xf32>
    %18 = tpu.matmul %9, %17, %cst_10 {dimension_numbers = #tpu.dot_dimension_numbers<[1], [0], [0], [1], [0, 0, 1, 1], [], []>} : vector<32x256xf32>, vector<256x16xf32>, vector<32x16xf32> -> vector<32x16xf32>
    %cst_11 = arith.constant 0.000000e+00 : f32
    %19 = vector.broadcast %cst_11 : f32 to vector<32x16xf32>
    %20 = arith.cmpf ogt, %18, %19 : vector<32x16xf32>
    %cst_12 = arith.constant 2.000000e-01 : f32
    %21 = vector.broadcast %cst_12 : f32 to vector<32x16xf32>
    %22 = arith.mulf %21, %18 : vector<32x16xf32>
    %23 = arith.select %20, %18, %22 : vector<32x16xi1>, vector<32x16xf32>
    %c0_13 = arith.constant 0 : index
    %c0_14 = arith.constant 0 : index
    %c0_15 = arith.constant 0 : index
    %24 = tpu.strided_load %arg2[%c0_13, %c0_14, %c0_15] {strides = array<i32: 1, 2, 1>} : memref<1x64x16xf32, #tpu.memory_space<vmem>>, vector<1x32x16xf32>
    %25 = vector.shape_cast %24 : vector<1x32x16xf32> to vector<32x16xf32>
    %26 = tpu.concatenate %16, %25 in 1 : vector<32x16xf32>, vector<32x16xf32> -> vector<32x32xf32>
    %c0_16 = arith.constant 0 : index
    %c0_17 = arith.constant 0 : index
    %c0_18 = arith.constant 0 : index
    %27 = vector.load %arg5[%c0_16, %c0_17, %c0_18] : memref<1x32x32xf32, #tpu.memory_space<vmem>>, vector<1x32x32xf32>
    %28 = vector.shape_cast %27 : vector<1x32x32xf32> to vector<32x32xf32>
    %29 = vector.shape_cast %26 : vector<32x32xf32> to vector<1x32x32xf32>
    tpu.vector_store %arg5[%c0_16, %c0_17, %c0_18], %29 {strides = array<i32>} : memref<1x32x32xf32, #tpu.memory_space<vmem>>, vector<1x32x32xf32>,
    %c0_19 = arith.constant 0 : index
    %c1 = arith.constant 1 : index
    %c0_20 = arith.constant 0 : index
    %30 = tpu.strided_load %arg2[%c0_19, %c1, %c0_20] {strides = array<i32: 1, 2, 1>} : memref<1x64x16xf32, #tpu.memory_space<vmem>>, vector<1x32x16xf32>
    %31 = vector.shape_cast %30 : vector<1x32x16xf32> to vector<32x16xf32>
    %32 = tpu.concatenate %23, %31 in 1 : vector<32x16xf32>, vector<32x16xf32> -> vector<32x32xf32>
    %c0_21 = arith.constant 0 : index
    %c0_22 = arith.constant 0 : index
    %c0_23 = arith.constant 0 : index
    %33 = vector.load %arg6[%c0_21, %c0_22, %c0_23] : memref<1x32x32xf32, #tpu.memory_space<vmem>>, vector<1x32x32xf32>
    %34 = vector.shape_cast %33 : vector<1x32x32xf32> to vector<32x32xf32>
    %35 = vector.shape_cast %32 : vector<32x32xf32> to vector<1x32x32xf32>
    tpu.vector_store %arg6[%c0_21, %c0_22, %c0_23], %35 {strides = array<i32>} : memref<1x32x32xf32, #tpu.memory_space<vmem>>, vector<1x32x32xf32>,
    return
  }
  func.func @transform_0(%arg0: i32) -> (i32, i32, i32) {
    %c0_i32 = arith.constant 0 : i32
    %c0_i32_0 = arith.constant 0 : i32
    %c0_i32_1 = arith.constant 0 : i32
    return %arg0, %c0_i32, %c0_i32_0 : i32, i32, i32
  }
  func.func @transform_1(%arg0: i32) -> (i32, i32, i32) {
    %c0_i32 = arith.constant 0 : i32
    %c0_i32_0 = arith.constant 0 : i32
    %c0_i32_1 = arith.constant 0 : i32
    return %arg0, %c0_i32, %c0_i32_0 : i32, i32, i32
  }
  func.func @transform_2(%arg0: i32) -> (i32, i32) {
    %c0_i32 = arith.constant 0 : i32
    %c0_i32_0 = arith.constant 0 : i32
    %c0_i32_1 = arith.constant 0 : i32
    return %c0_i32, %c0_i32_0 : i32, i32
  }
  func.func @transform_3(%arg0: i32) -> (i32, i32) {
    %c0_i32 = arith.constant 0 : i32
    %c0_i32_0 = arith.constant 0 : i32
    %c0_i32_1 = arith.constant 0 : i32
    return %c0_i32, %c0_i32_0 : i32, i32
  }
  func.func @transform_4(%arg0: i32) -> (i32, i32, i32) {
    %c0_i32 = arith.constant 0 : i32
    %c0_i32_0 = arith.constant 0 : i32
    %c0_i32_1 = arith.constant 0 : i32
    return %arg0, %c0_i32, %c0_i32_0 : i32, i32, i32
  }
  func.func @transform_5(%arg0: i32) -> (i32, i32, i32) {
    %c0_i32 = arith.constant 0 : i32
    %c0_i32_0 = arith.constant 0 : i32
    %c0_i32_1 = arith.constant 0 : i32
    return %arg0, %c0_i32, %c0_i32_0 : i32, i32, i32
  }
}

module attributes {stable_mosaic.version = 11 : i64} {
  func.func @_final_kernel(%arg0: i32, %arg1: memref<2x64x32xf32, #tpu.memory_space<vmem>>, %arg2: memref<96x1xf32, #tpu.memory_space<vmem>>, %arg3: memref<96x1xf32, #tpu.memory_space<vmem>>, %arg4: memref<1x1xf32, #tpu.memory_space<vmem>>, %arg5: memref<128x1xf32, #tpu.memory_space<vmem>>, %arg6: memref<128x1xf32, #tpu.memory_space<vmem>>) attributes {dimension_semantics = [#tpu.dimension_semantics<arbitrary>], iteration_bounds = array<i64: 1>, scalar_prefetch = 0 : i64, scratch_operands = 0 : i64, tpu.core_type = #tpu.core_type<tc>, window_params = [{pipeline_mode = #tpu.pipeline_mode<synchronous>, transform_indices = @transform_0, window_bounds = array<i64: 2, 64, 32>}, {pipeline_mode = #tpu.pipeline_mode<synchronous>, transform_indices = @transform_1, window_bounds = array<i64: 96, 1>}, {pipeline_mode = #tpu.pipeline_mode<synchronous>, transform_indices = @transform_2, window_bounds = array<i64: 96, 1>}, {pipeline_mode = #tpu.pipeline_mode<synchronous>, transform_indices = @transform_3, window_bounds = array<i64: 1, 1>}, {pipeline_mode = #tpu.pipeline_mode<synchronous>, transform_indices = @transform_4, window_bounds = array<i64: 128, 1>}, {pipeline_mode = #tpu.pipeline_mode<synchronous>, transform_indices = @transform_5, window_bounds = array<i64: 128, 1>}]} {
    %c0 = arith.constant 0 : index
    %c0_0 = arith.constant 0 : index
    %c0_1 = arith.constant 0 : index
    %0 = vector.load %arg1[%c0, %c0_0, %c0_1] : memref<2x64x32xf32, #tpu.memory_space<vmem>>, vector<1x64x32xf32>
    %1 = vector.shape_cast %0 : vector<1x64x32xf32> to vector<64x32xf32>
    %cst = arith.constant 0.000000e+00 : f32
    %2 = vector.broadcast %cst : f32 to vector<1x32xf32>
    %3 = tpu.concatenate %2, %1, %2 in 0 : vector<1x32xf32>, vector<64x32xf32>, vector<1x32xf32> -> vector<66x32xf32>
    %4 = vector.extract_strided_slice %3 {offsets = [0, 0], sizes = [64, 32], strides = [1, 1]} : vector<66x32xf32> to vector<64x32xf32>
    %5 = vector.extract_strided_slice %3 {offsets = [1, 0], sizes = [64, 32], strides = [1, 1]} : vector<66x32xf32> to vector<64x32xf32>
    %6 = vector.extract_strided_slice %3 {offsets = [2, 0], sizes = [64, 32], strides = [1, 1]} : vector<66x32xf32> to vector<64x32xf32>
    %7 = tpu.concatenate %4, %5, %6 in 1 : vector<64x32xf32>, vector<64x32xf32>, vector<64x32xf32> -> vector<64x96xf32>
    %c1 = arith.constant 1 : index
    %c0_2 = arith.constant 0 : index
    %c0_3 = arith.constant 0 : index
    %8 = vector.load %arg1[%c1, %c0_2, %c0_3] : memref<2x64x32xf32, #tpu.memory_space<vmem>>, vector<1x64x32xf32>
    %9 = vector.shape_cast %8 : vector<1x64x32xf32> to vector<64x32xf32>
    %cst_4 = arith.constant 0.000000e+00 : f32
    %10 = vector.broadcast %cst_4 : f32 to vector<1x32xf32>
    %11 = tpu.concatenate %10, %9, %10 in 0 : vector<1x32xf32>, vector<64x32xf32>, vector<1x32xf32> -> vector<66x32xf32>
    %12 = vector.extract_strided_slice %11 {offsets = [0, 0], sizes = [64, 32], strides = [1, 1]} : vector<66x32xf32> to vector<64x32xf32>
    %13 = vector.extract_strided_slice %11 {offsets = [1, 0], sizes = [64, 32], strides = [1, 1]} : vector<66x32xf32> to vector<64x32xf32>
    %14 = vector.extract_strided_slice %11 {offsets = [2, 0], sizes = [64, 32], strides = [1, 1]} : vector<66x32xf32> to vector<64x32xf32>
    %15 = tpu.concatenate %12, %13, %14 in 1 : vector<64x32xf32>, vector<64x32xf32>, vector<64x32xf32> -> vector<64x96xf32>
    %16 = tpu.concatenate %7, %15 in 0 : vector<64x96xf32>, vector<64x96xf32> -> vector<128x96xf32>
    %c0_5 = arith.constant 0 : index
    %c0_6 = arith.constant 0 : index
    %17 = vector.load %arg4[%c0_5, %c0_6] : memref<1x1xf32, #tpu.memory_space<vmem>>, vector<1x1xf32>
    %c0_7 = arith.constant 0 : index
    %c0_8 = arith.constant 0 : index
    %18 = vector.load %arg2[%c0_7, %c0_8] : memref<96x1xf32, #tpu.memory_space<vmem>>, vector<96x1xf32>
    %cst_9 = arith.constant dense<0.000000e+00> : vector<128x1xf32>
    %19 = tpu.matmul %16, %18, %cst_9 {dimension_numbers = #tpu.dot_dimension_numbers<[1], [0], [0], [1], [0, 0, 1, 1], [], []>} : vector<128x96xf32>, vector<96x1xf32>, vector<128x1xf32> -> vector<128x1xf32>
    %20 = vector.broadcast %17 : vector<1x1xf32> to vector<128x1xf32>
    %21 = arith.addf %19, %20 : vector<128x1xf32>
    %c0_10 = arith.constant 0 : index
    %c0_11 = arith.constant 0 : index
    %22 = vector.load %arg3[%c0_10, %c0_11] : memref<96x1xf32, #tpu.memory_space<vmem>>, vector<96x1xf32>
    %cst_12 = arith.constant dense<0.000000e+00> : vector<128x1xf32>
    %23 = tpu.matmul %16, %22, %cst_12 {dimension_numbers = #tpu.dot_dimension_numbers<[1], [0], [0], [1], [0, 0, 1, 1], [], []>} : vector<128x96xf32>, vector<96x1xf32>, vector<128x1xf32> -> vector<128x1xf32>
    %24 = vector.broadcast %17 : vector<1x1xf32> to vector<128x1xf32>
    %25 = arith.addf %23, %24 : vector<128x1xf32>
    %cst_13 = arith.constant dense<0.000000e+00> : vector<1xf32>
    %26 = vector.multi_reduction <add>, %21, %cst_13 [0] : vector<128x1xf32> to vector<1xf32>
    %27 = vector.shape_cast %26 : vector<1xf32> to vector<1x1xf32>
    %cst_14 = arith.constant dense<0.000000e+00> : vector<1xf32>
    %28 = vector.multi_reduction <add>, %25, %cst_14 [0] : vector<128x1xf32> to vector<1xf32>
    %29 = vector.shape_cast %28 : vector<1xf32> to vector<1x1xf32>
    %30 = arith.addf %27, %29 : vector<1x1xf32>
    %cst_15 = arith.constant 2.560000e+02 : f32
    %31 = vector.broadcast %cst_15 : f32 to vector<1x1xf32>
    %32 = arith.divf %30, %31 : vector<1x1xf32>
    %33 = vector.broadcast %32 : vector<1x1xf32> to vector<128x1xf32>
    %34 = arith.subf %21, %33 : vector<128x1xf32>
    %35 = arith.mulf %34, %34 : vector<128x1xf32>
    %cst_16 = arith.constant dense<0.000000e+00> : vector<1xf32>
    %36 = vector.multi_reduction <add>, %35, %cst_16 [0] : vector<128x1xf32> to vector<1xf32>
    %37 = vector.shape_cast %36 : vector<1xf32> to vector<1x1xf32>
    %38 = vector.broadcast %32 : vector<1x1xf32> to vector<128x1xf32>
    %39 = arith.subf %25, %38 : vector<128x1xf32>
    %40 = arith.mulf %39, %39 : vector<128x1xf32>
    %cst_17 = arith.constant dense<0.000000e+00> : vector<1xf32>
    %41 = vector.multi_reduction <add>, %40, %cst_17 [0] : vector<128x1xf32> to vector<1xf32>
    %42 = vector.shape_cast %41 : vector<1xf32> to vector<1x1xf32>
    %43 = arith.addf %37, %42 : vector<1x1xf32>
    %cst_18 = arith.constant 2.560000e+02 : f32
    %44 = vector.broadcast %cst_18 : f32 to vector<1x1xf32>
    %45 = arith.divf %43, %44 : vector<1x1xf32>
    %cst_19 = arith.constant 9.99999974E-6 : f32
    %46 = vector.broadcast %cst_19 : f32 to vector<1x1xf32>
    %47 = arith.addf %45, %46 : vector<1x1xf32>
    %48 = math.rsqrt %47 : vector<1x1xf32>
    %49 = vector.broadcast %32 : vector<1x1xf32> to vector<128x1xf32>
    %50 = arith.subf %21, %49 : vector<128x1xf32>
    %51 = vector.broadcast %48 : vector<1x1xf32> to vector<128x1xf32>
    %52 = arith.mulf %50, %51 : vector<128x1xf32>
    %c0_20 = arith.constant 0 : index
    %c0_21 = arith.constant 0 : index
    %53 = vector.load %arg5[%c0_20, %c0_21] : memref<128x1xf32, #tpu.memory_space<vmem>>, vector<128x1xf32>
    tpu.vector_store %arg5[%c0_20, %c0_21], %52 {strides = array<i32>} : memref<128x1xf32, #tpu.memory_space<vmem>>, vector<128x1xf32>,
    %54 = vector.broadcast %32 : vector<1x1xf32> to vector<128x1xf32>
    %55 = arith.subf %25, %54 : vector<128x1xf32>
    %56 = vector.broadcast %48 : vector<1x1xf32> to vector<128x1xf32>
    %57 = arith.mulf %55, %56 : vector<128x1xf32>
    %c0_22 = arith.constant 0 : index
    %c0_23 = arith.constant 0 : index
    %58 = vector.load %arg6[%c0_22, %c0_23] : memref<128x1xf32, #tpu.memory_space<vmem>>, vector<128x1xf32>
    tpu.vector_store %arg6[%c0_22, %c0_23], %57 {strides = array<i32>} : memref<128x1xf32, #tpu.memory_space<vmem>>, vector<128x1xf32>,
    return
  }
  func.func @transform_0(%arg0: i32) -> (i32, i32, i32) {
    %c0_i32 = arith.constant 0 : i32
    %c0_i32_0 = arith.constant 0 : i32
    %c0_i32_1 = arith.constant 0 : i32
    %c0_i32_2 = arith.constant 0 : i32
    return %c0_i32, %c0_i32_0, %c0_i32_1 : i32, i32, i32
  }
  func.func @transform_1(%arg0: i32) -> (i32, i32) {
    %c0_i32 = arith.constant 0 : i32
    %c0_i32_0 = arith.constant 0 : i32
    %c0_i32_1 = arith.constant 0 : i32
    return %c0_i32, %c0_i32_0 : i32, i32
  }
  func.func @transform_2(%arg0: i32) -> (i32, i32) {
    %c0_i32 = arith.constant 0 : i32
    %c0_i32_0 = arith.constant 0 : i32
    %c0_i32_1 = arith.constant 0 : i32
    return %c0_i32, %c0_i32_0 : i32, i32
  }
  func.func @transform_3(%arg0: i32) -> (i32, i32) {
    %c0_i32 = arith.constant 0 : i32
    %c0_i32_0 = arith.constant 0 : i32
    %c0_i32_1 = arith.constant 0 : i32
    return %c0_i32, %c0_i32_0 : i32, i32
  }
  func.func @transform_4(%arg0: i32) -> (i32, i32) {
    %c0_i32 = arith.constant 0 : i32
    %c0_i32_0 = arith.constant 0 : i32
    %c0_i32_1 = arith.constant 0 : i32
    return %c0_i32, %c0_i32_0 : i32, i32
  }
  func.func @transform_5(%arg0: i32) -> (i32, i32) {
    %c0_i32 = arith.constant 0 : i32
    %c0_i32_0 = arith.constant 0 : i32
    %c0_i32_1 = arith.constant 0 : i32
    return %c0_i32, %c0_i32_0 : i32, i32
  }
}

</mosaic_0001>

<bundles_post_ra>
// kernel: generator_1024v2.5
= control target key start
LH: loop header
LB: loop body
LE: loop exit
PB: predicated region body
PF: predicated region fallthrough
CT: control target
= control target key end

     0   :  { %s838_s18 = smov 0   ;;  %s1001_s0 = inlined_call_operand.vmem [shape: f32[2,16,32], index: 0, kind: input, shape index: {}]   ;;  %s1002_s1 = inlined_call_operand.vmem [shape: f32[2,32,32], index: 1, kind: input, shape index: {}]   ;;  %s1003_s2 = inlined_call_operand.vmem [shape: f32[128,32], index: 2, kind: input, shape index: {}]   ;;  %s1004_s3 = inlined_call_operand.vmem [shape: f32[128,32], index: 3, kind: input, shape index: {}]   ;;  %s1005_s4 = inlined_call_operand.vmem [shape: f32[2,16,64], index: 4, kind: output, shape index: {0}]   ;;  %s1006_s5 = inlined_call_operand.vmem [shape: f32[2,16,64], index: 5, kind: output, shape index: {1}]  }
   0x1 LB: > { %s643_s19 = sadd.s32 4294967295, %s803_s18   ;;  %p647_p0 = scmp.ge.s32.totalorder %s803_s18, 1  ;;  %s803_s18 = sphi %s838_s18, %s16_s18  }
   0x2   : > { %p200_p1 = scmp.lt.s32.totalorder %s803_s18, 3 }
   0x4   : > { %p201_p2 = pnand %p647_p0, %p200_p1 }
   0x5   : > { %p238_p3 = scmp.lt.s32.totalorder (!%p201_p2), %s643_s19, 1  ;;  %s805_s6 = smov (!%p201_p2), 32  }
   0x6   : > { %204 = sbr.rel (%p201_p2) target bundleno = 350 (0x15e), region = 36  ;;  %s807_s15 = smov (!%p201_p2), 64  }
   0xb   : > { %v333_v0 = vld [vmem:[%s1003_s2 + $0x78] sm:$0xff]  ;;  %v332_v2 = vld [vmem:[%s1003_s2 + $0x70] sm:$0xff]  ;;  %s1008_s19 = smov (!%p238_p3, %s643_s19), 1  ;;  %v331_v4 = vld [vmem:[%s1003_s2 + $0x68] sm:$0xff]  ;;  %vm262_vm0 = vcmask 1040384   ;;  %vm273_vm1 = vcmask 1046528  }
   0xc   : > { %v430_v1 = vld [vmem:[%s1004_s3 + $0x78] sm:$0xff]  ;;  %701 = vmatprep.subr.mxu0 %v333_v0  ;;  %v429_v3 = vld [vmem:[%s1004_s3 + $0x70] sm:$0xff]  ;;  %v428_v5 = vld [vmem:[%s1004_s3 + $0x68] sm:$0xff]  ;;  %s867_s7 = sshll.u32 %s1008_s19, 4  ;;  %vm285_vm2 = vcmask 1045504   ;;  %vm297_vm3 = vcmask 1044480  }
   0xd   : > { %736 = vmatprep.subr.mxu1 %v430_v1  ;;  %702 = vmatpush3.msra.mxu0 %v333_v0  ;;  %s242_s10 = scalar_lea.vmem %s1001_s0, %s867_s7  ;;  %v330_v6 = vld [vmem:[%s1003_s2 + $0x60] sm:$0xff]  ;;  %v329_v12 = vld [vmem:[%s1003_s2 + $0x58] sm:$0xff]  ;;  %v328_v17 = vld [vmem:[%s1003_s2 + $0x50] sm:$0xff]  ;;  %vm309_vm4 = vcmask 261120   ;;  %vm312_vm5 = vcmask 523264   ;;  %vm315_vm6 = vcmask 785408   ;;  %s252_s29 = scalar_lea.vmem %s1005_s4, %s867_s7 }
   0xe   : > { %737 = vmatpush3.msra.mxu1 %v430_v1  ;;  %703 = vmatprep.subr.mxu0 %v332_v2  ;;  %v427_v7 = vld [vmem:[%s1004_s3 + $0x60] sm:$0xff]  ;;  %v259_v9 = vld [vmem:[%s242_s10 + $0x8] sm:$0xff]  ;;  %v426_v13 = vld [vmem:[%s1004_s3 + $0x58] sm:$0xff]  ;;  %s257_s9 = scalar_lea.vmem %s1006_s5, %s867_s7 }
   0xf   : > { %738 = vmatprep.subr.mxu1 %v429_v3  ;;  %704 = vmatpush3.msra.mxu0 %v332_v2  ;;  %v258_v8 = vld [vmem:[%s242_s10] sm:$0xff]  ;;  %v264_v11 = vrot.slane %v259_v9, 7  ;;  %v425_v18 = vld [vmem:[%s1004_s3 + $0x50] sm:$0xff]  ;;  %v327_v27 = vld [vmem:[%s1003_s2 + $0x48] sm:$0xff]  ;;  %s806_s10 = smov 96  }
  0x10   : > { %739 = vmatpush3.msra.mxu1 %v429_v3  ;;  %705 = vmatprep.subr.mxu0 %v331_v4  ;;  %v263_v10 = vrot.slane %v258_v8, 7  ;;  %v424_v31 = vld [vmem:[%s1004_s3 + $0x48] sm:$0xff]  ;;  %v326_v37 = vld [vmem:[%s1003_s2 + $0x40] sm:$0xff]  ;;  %v325_v41 = vld [vmem:[%s1003_s2 + $0x38] sm:$0xff] }
  0x11   : > { %740 = vmatprep.subr.mxu1 %v428_v5  ;;  %706 = vmatpush3.msra.mxu0 %v331_v4  ;;  %v270_v16 = vsel %vm262_vm0, %v264_v11, 0.0  ;;  %v423_v40 = vld [vmem:[%s1004_s3 + $0x40] sm:$0xff]  ;;  %v422_v42 = vld [vmem:[%s1004_s3 + $0x38] sm:$0xff]  ;;  %v324_v43 = vld [vmem:[%s1003_s2 + $0x30] sm:$0xff] }
  0x12   : > { %741 = vmatpush3.msra.mxu1 %v428_v5  ;;  %707 = vmatprep.subr.mxu0 %v330_v6  ;;  %v885_v14 = vsel %vm262_vm0, %v263_v10, %v264_v11  ;;  %v887_v15 = vsel %vm262_vm0, 0.0, %v263_v10  ;;  %v277_v21 = vrot.slane %v270_v16, 1  ;;  %v289_v24 = vrot.slane %v270_v16, 2  ;;  %v421_v44 = vld [vmem:[%s1004_s3 + $0x30] sm:$0xff]  ;;  %v323_v45 = vld [vmem:[%s1003_s2 + $0x28] sm:$0xff]  ;;  %v322_v47 = vld [vmem:[%s1003_s2 + $0x20] sm:$0xff] }
  0x13   : > { %742 = vmatprep.subr.mxu1 %v427_v7  ;;  %708 = vmatpush3.msra.mxu0 %v330_v6  ;;  %v274_v19 = vrot.slane %v887_v15, 1  ;;  %v275_v20 = vrot.slane %v885_v14, 1  ;;  %v286_v22 = vrot.slane %v887_v15, 2  ;;  %v287_v23 = vrot.slane %v885_v14, 2  ;;  %v420_v46 = vld [vmem:[%s1004_s3 + $0x28] sm:$0xff]  ;;  %v419_v48 = vld [vmem:[%s1004_s3 + $0x20] sm:$0xff] }
  0x14   : > { %743 = vmatpush3.msra.mxu1 %v427_v7  ;;  %709 = vmatprep.subr.mxu0 %v329_v12  ;;  %v298_v25 = vrot.slane %v887_v15, 3  ;;  %v299_v26 = vrot.slane %v885_v14, 3  ;;  %v301_v30 = vrot.slane %v270_v16, 3  ;;  %v321_v49 = vld [vmem:[%s1003_s2 + $0x18] sm:$0xff]  ;;  %v320_v51 = vld [vmem:[%s1003_s2 + $0x10] sm:$0xff]  ;;  %v319_v53 = vld [vmem:[%s1003_s2 + $0x8] sm:$0xff] }
  0x15   : > { %744 = vmatprep.subr.mxu1 %v426_v13  ;;  %710 = vmatpush3.msra.mxu0 %v329_v12  ;;  %v276_v28 = vsel %vm273_vm1, %v274_v19, %v275_v20  ;;  %v278_v29 = vsel %vm273_vm1, %v275_v20, %v277_v21  ;;  %v288_v33 = vsel %vm285_vm2, %v286_v22, %v287_v23  ;;  %v418_v50 = vld [vmem:[%s1004_s3 + $0x18] sm:$0xff]  ;;  %v417_v52 = vld [vmem:[%s1004_s3 + $0x10] sm:$0xff]  ;;  %v416_v54 = vld [vmem:[%s1004_s3 + $0x8] sm:$0xff] }
  0x16   : > { %745 = vmatpush3.msra.mxu1 %v426_v13  ;;  %711 = vmatprep.subr.mxu0 %v328_v17  ;;  %v782_v32 = vpack.i.bf16 %v278_v29, %v276_v28  ;;  %v290_v34 = vsel %vm285_vm2, %v287_v23, %v289_v24  ;;  %v300_v35 = vsel %vm297_vm3, %v298_v25, %v299_v26  ;;  %v318_v55 = vld [vmem:[%s1003_s2] sm:$0xff] }
  0x17   : > { %746 = vmatprep.subr.mxu1 %v425_v18  ;;  %712 = vmatpush3.msra.mxu0 %v328_v17  ;;  %v302_v36 = vsel %vm297_vm3, %v299_v26, %v301_v30  ;;  %v787_v38 = vpack.i.bf16 %v290_v34, %v288_v33  ;;  %v415_v56 = vld [vmem:[%s1004_s3] sm:$0xff] }
  0x18   : > { %747 = vmatpush3.msra.mxu1 %v425_v18  ;;  %713 = vmatprep.subr.mxu0 %v327_v27  ;;  %v792_v39 = vpack.i.bf16 %v302_v36, %v300_v35 }
  0x19   : > { %783 = vrot.lane.b32.xlu0 %v782_v32, %s805_s6  ;;  %748 = vmatprep.subr.mxu1 %v424_v31 }
  0x1a   : > { %714 = vmatpush3.msra.mxu0 %v327_v27  ;;  %749 = vmatpush3.msra.mxu1 %v424_v31 }
  0x1b   : > { %793 = vrot.lane.b32.xlu1 %v792_v39, %s806_s10  ;;  %715 = vmatprep.subr.mxu0 %v326_v37 }
  0x1c   : > { %750 = vmatprep.subr.mxu1 %v423_v40  ;;  %716 = vmatpush3.msra.mxu0 %v326_v37 }
  0x1d   : > { %788 = vrot.lane.b32.xlu0 %v787_v38, %s807_s15  ;;  %751 = vmatpush3.msra.mxu1 %v423_v40  ;;  %s662_s15 = sshll.u32 %s1008_s19, 5 }
  0x1e   : > { %717 = vmatprep.subr.mxu0 %v325_v41  ;;  %752 = vmatprep.subr.mxu1 %v422_v42  ;;  %s247_s24 = scalar_lea.vmem %s1002_s1, %s662_s15 }
  0x1f   : > { %718 = vmatpush3.msra.mxu0 %v325_v41  ;;  %753 = vmatpush3.msra.mxu1 %v422_v42  ;;  %v656_v57 = vld [vmem:[%s247_s24 + $0x10] ss:$2 sm:$0xff]  ;;  %v512_v58 = vld [vmem:[%s247_s24] ss:$2 sm:$0xff]  ;;  %v658_v59 = vld [vmem:[%s247_s24 + $0x11] ss:$2 sm:$0xff] }
  0x20   : > { %719 = vmatprep.subr.mxu0 %v324_v43  ;;  %754 = vmatprep.subr.mxu1 %v421_v44  ;;  %v657_v60 = vld [vmem:[%s247_s24 + $0x1] ss:$2 sm:$0xff] }
  0x21   : > { %720 = vmatpush3.msra.mxu0 %v324_v43  ;;  %755 = vmatpush3.msra.mxu1 %v421_v44 }
  0x22   : > { %721 = vmatprep.subr.mxu0 %v323_v45  ;;  %756 = vmatprep.subr.mxu1 %v420_v46 }
  0x23   : > { %722 = vmatpush3.msra.mxu0 %v323_v45  ;;  %757 = vmatpush3.msra.mxu1 %v420_v46 }
  0x24   : > { %723 = vmatprep.subr.mxu0 %v322_v47  ;;  %758 = vmatprep.subr.mxu1 %v419_v48 }
  0x25   : > { %724 = vmatpush3.msra.mxu0 %v322_v47  ;;  %759 = vmatpush3.msra.mxu1 %v419_v48 }
  0x26   : > { %725 = vmatprep.subr.mxu0 %v321_v49  ;;  %760 = vmatprep.subr.mxu1 %v418_v50 }
  0x27   : > { %726 = vmatpush3.msra.mxu0 %v321_v49  ;;  %761 = vmatpush3.msra.mxu1 %v418_v50 }
  0x28   : > { %727 = vmatprep.subr.mxu0 %v320_v51  ;;  %762 = vmatprep.subr.mxu1 %v417_v52 }
  0x29   : > { %728 = vmatpush3.msra.mxu0 %v320_v51  ;;  %763 = vmatpush3.msra.mxu1 %v417_v52 }
  0x2a   : > { %729 = vmatprep.subr.mxu0 %v319_v53  ;;  %764 = vmatprep.subr.mxu1 %v416_v54 }
  0x2b   : > { %730 = vmatpush3.msra.mxu0 %v319_v53  ;;  %765 = vmatpush3.msra.mxu1 %v416_v54 }
  0x2c   : > { %731 = vmatprep.subr.mxu0 %v318_v55  ;;  %766 = vmatprep.subr.mxu1 %v415_v56 }
  0x2d   : > { %732 = vmatpush3.msra.mxu0 %v318_v55  ;;  %767 = vmatpush3.msra.mxu1 %v415_v56 }
  0x2e   : > { %519 = vrot.lane.b32.xlu0 %v656_v57, %s805_s6  ;;  %517 = vrot.lane.b32.xlu1 %v512_v58, %s805_s6 }
  0x32   : > { %535 = vrot.lane.b32.xlu0 %v658_v59, %s805_s6  ;;  %533 = vrot.lane.b32.xlu1 %v657_v60, %s805_s6 }
  0x8b   : > { %v784_v61 = vpop.permute.xlu0 %783 }
  0x8c   : > { %v786_v62 = vunpack.i.h.bf16 %v784_v61  ;;  %v785_v63 = vunpack.i.l.bf16 %v784_v61 }
  0x8d   : > { %v794_v0 = vpop.permute.xlu1 %793 }
  0x8e   : > { %v796_v2 = vunpack.i.h.bf16 %v794_v0  ;;  %v795_v3 = vunpack.i.l.bf16 %v794_v0  ;;  %v310_v6 = vsel %vm309_vm4, %v887_v15, %v785_v63  ;;  %v311_v7 = vsel %vm309_vm4, %v885_v14, %v786_v62 }
  0x8f   : > { %v789_v1 = vpop.permute.xlu0 %788 }
  0x90   : > { %v791_v4 = vunpack.i.h.bf16 %v789_v1  ;;  %v790_v5 = vunpack.i.l.bf16 %v789_v1 }
  0x92   : > { %v313_v8 = vsel %vm312_vm5, %v310_v6, %v790_v5  ;;  %v314_v9 = vsel %vm312_vm5, %v311_v7, %v791_v4 }
  0x93   : > { %v316_v10 = vsel %vm315_vm6, %v313_v8, %v795_v3  ;;  %v317_v11 = vsel %vm315_vm6, %v314_v9, %v796_v2 }
  0x94   : > { %733 = vmatprep.mubr.f32.mxu0 %v316_v10  ;;  %768 = vmatprep.mubr.f32.mxu1 %v316_v10 }
  0x95   : > { %734 = vmatmul.mubr.f32.vlgmr.msra.gmra.mxu0 %v317_v11  ;;  %769 = vmatmul.mubr.f32.vlgmr.msra.gmra.mxu1 %v317_v11 }
  0xa0   : > { %v520_v12 = vpop.permute.xlu0 %519  ;;  %v518_v13 = vpop.permute.xlu1 %517 }
  0xa4   : > { %v536_v18 = vpop.permute.xlu0 %535  ;;  %v534_v27 = vpop.permute.xlu1 %533 }
 0x155   : > { %v735_v16 = vpop.f32.mrf.mxu0  ;;  %v770_v17 = vpop.f32.mrf.mxu1 }
 0x156   : > { %vm410_vm7 = vcmp.gt.f32.partialorder %v735_v16, 0.0  ;;  %v412_v15 = vmul.f32 0.2, %v735_v16  ;;  %vm507_vm8 = vcmp.gt.f32.partialorder %v770_v17, 0.0  ;;  %v509_v14 = vmul.f32 0.2, %v770_v17 }
 0x157   : > { %v400_v19 = vpop.f32.mrf.mxu0  ;;  %v497_v20 = vpop.f32.mrf.mxu1 }
 0x158   : > { %v414_v21 = vsel %vm410_vm7, %v735_v16, %v412_v15  ;;  %v511_v22 = vsel %vm507_vm8, %v770_v17, %v509_v14  ;;  %vm409_vm9 = vcmp.gt.f32.partialorder %v400_v19, 0.0  ;;  %v411_v23 = vmul.f32 0.2, %v400_v19 }
 0x159   : > { %v524_v24 = vsel %vm309_vm4, %v414_v21, %v520_v12  ;;  %vm506_vm10 = vcmp.gt.f32.partialorder %v497_v20, 0.0  ;;  %v508_v25 = vmul.f32 0.2, %v497_v20  ;;  %v540_v26 = vsel %vm309_vm4, %v511_v22, %v536_v18 }
 0x15a   : > { %526 = vst.msk [vmem:[%s252_s29 + $0x8] sm:$0xff] %vm312_vm5, %v524_v24  ;;  %v413_v28 = vsel %vm409_vm9, %v400_v19, %v411_v23  ;;  %542 = vst.msk [vmem:[%s257_s9 + $0x8] sm:$0xff] %vm312_vm5, %v540_v26 }
 0x15b   : > { %v523_v29 = vsel %vm309_vm4, %v413_v28, %v518_v13  ;;  %v510_v30 = vsel %vm506_vm10, %v497_v20, %v508_v25 }
 0x15c   : > { %525 = vst.msk [vmem:[%s252_s29] sm:$0xff] %vm312_vm5, %v523_v29  ;;  %v539_v31 = vsel %vm309_vm4, %v510_v30, %v534_v27 }
 0x15d   : > { %541 = vst.msk [vmem:[%s257_s9] sm:$0xff] %vm312_vm5, %v539_v31 }
 0x15e PF: > { %s16_s18 = sadd.s32 1, %s803_s18  }
 0x15f   : > { %p13_p4 = scmp.ge.s32.totalorder %s16_s18, 4  }
 0x161   :  { %15 = sbr.rel (!%p13_p4) target bundleno = 1 (0x1), region = 84 }

// kernel: generator_1024v2.6
= control target key start
LH: loop header
LB: loop body
LE: loop exit
PB: predicated region body
PF: predicated region fallthrough
CT: control target
= control target key end

     0   :  { %s957_s18 = smov 0   ;;  %s1276_s0 = inlined_call_operand.vmem [shape: f32[2,32,64], index: 0, kind: input, shape index: {}]   ;;  %s1277_s1 = inlined_call_operand.vmem [shape: f32[2,64,16], index: 1, kind: input, shape index: {}]   ;;  %s1278_s2 = inlined_call_operand.vmem [shape: f32[256,16], index: 2, kind: input, shape index: {}]   ;;  %s1279_s3 = inlined_call_operand.vmem [shape: f32[256,16], index: 3, kind: input, shape index: {}]   ;;  %s1280_s4 = inlined_call_operand.vmem [shape: f32[2,32,32], index: 4, kind: output, shape index: {0}]   ;;  %s1281_s5 = inlined_call_operand.vmem [shape: f32[2,32,32], index: 5, kind: output, shape index: {1}]  }
   0x1 LB: > { %s773_s19 = sadd.s32 4294967295, %s923_s18   ;;  %p777_p0 = scmp.ge.s32.totalorder %s923_s18, 1  ;;  %s923_s18 = sphi %s957_s18, %s16_s18  }
   0x2   : > { %p200_p1 = scmp.lt.s32.totalorder %s923_s18, 3 }
   0x4   : > { %p201_p2 = pnand %p777_p0, %p200_p1 }
   0x5   : > { %p238_p3 = scmp.lt.s32.totalorder (!%p201_p2), %s773_s19, 1  ;;  %s925_s17 = smov (!%p201_p2), 64  }
   0x6   : > { %204 = sbr.rel (%p201_p2) target bundleno = 362 (0x16a), region = 36  ;;  %s926_s24 = smov (!%p201_p2), 16  }
   0xb   : > { %v381_v0 = vld [vmem:[%s1278_s2 + $0xf8] sm:$0xff]  ;;  %s1283_s19 = smov (!%p238_p3, %s773_s19), 1  ;;  %v380_v4 = vld [vmem:[%s1278_s2 + $0xf0] sm:$0xff]  ;;  %v379_v8 = vld [vmem:[%s1278_s2 + $0xe8] sm:$0xff]  ;;  %vm266_vm0 = vcmask 1040384   ;;  %vm283_vm1 = vcmask 1046528  }
   0xc   : > { %799 = vmatprep.subr.mxu0 %v381_v0  ;;  %v510_v1 = vld [vmem:[%s1279_s3 + $0xf8] sm:$0xff]  ;;  %v509_v5 = vld [vmem:[%s1279_s3 + $0xf0] sm:$0xff]  ;;  %v508_v9 = vld [vmem:[%s1279_s3 + $0xe8] sm:$0xff]  ;;  %s998_s15 = sshll.u32 %s1283_s19, 5  ;;  %vm319_vm2 = vcmask 1044480   ;;  %s796_s21 = sshll.u32 %s1283_s19, 6 }
   0xd   : > { %v365_v2 = vld [vmem:[%s1278_s2 + $0x78] sm:$0xff]  ;;  %843 = vmatprep.subr.mxu1 %v510_v1  ;;  %v364_v6 = vld [vmem:[%s1278_s2 + $0x70] sm:$0xff]  ;;  %v363_v10 = vld [vmem:[%s1278_s2 + $0x68] sm:$0xff]  ;;  %s242_s26 = scalar_lea.vmem %s1276_s0, %s998_s15  ;;  %s1188_s9 = scalar_lea.vmem %s1277_s1, %s796_s21  ;;  %vm305_vm3 = vcmask 1045504   ;;  %vm341_vm4 = vcmask 523264   ;;  %vm631_vm5 = vcmask 130048  }
   0xe   : > { %v494_v3 = vld [vmem:[%s1279_s3 + $0x78] sm:$0xff]  ;;  %800 = vmatpush3.msra.mxu0 %v365_v2  ;;  %v493_v7 = vld [vmem:[%s1279_s3 + $0x70] sm:$0xff]  ;;  %v492_v11 = vld [vmem:[%s1279_s3 + $0x68] sm:$0xff]  ;;  %vm636_vm8 = vcmask 261120   ;;  %s1246_s19 = scalar_lea.vmem %s1281_s5, %s998_s15 }
   0xf   : > { %844 = vmatpush3.msra.mxu1 %v494_v3  ;;  %801 = vmatprep.subr.mxu0 %v380_v4  ;;  %v378_v12 = vld [vmem:[%s1278_s2 + $0xe0] sm:$0xff]  ;;  %v259_v17 = vld [vmem:[%s242_s26 + $0x8] sm:$0xff]  ;;  %v260_v18 = vld [vmem:[%s242_s26 + $0x10] sm:$0xff] }
  0x10   : > { %845 = vmatprep.subr.mxu1 %v509_v5  ;;  %802 = vmatpush3.msra.mxu0 %v364_v6  ;;  %v507_v13 = vld [vmem:[%s1279_s3 + $0xe0] sm:$0xff]  ;;  %v268_v20 = vrot.slane %v259_v17, 7  ;;  %v270_v21 = vrot.slane %v260_v18, 7  ;;  %v261_v22 = vld [vmem:[%s242_s26 + $0x18] sm:$0xff]  ;;  %v376_v28 = vld [vmem:[%s1278_s2 + $0xd0] sm:$0xff] }
  0x11   : > { %846 = vmatpush3.msra.mxu1 %v493_v7  ;;  %803 = vmatprep.subr.mxu0 %v379_v8  ;;  %v362_v14 = vld [vmem:[%s1278_s2 + $0x60] sm:$0xff]  ;;  %v377_v23 = vld [vmem:[%s1278_s2 + $0xd8] sm:$0xff]  ;;  %v272_v25 = vrot.slane %v261_v22, 7  ;;  %v505_v32 = vld [vmem:[%s1279_s3 + $0xd0] sm:$0xff] }
  0x12   : > { %v491_v15 = vld [vmem:[%s1279_s3 + $0x60] sm:$0xff]  ;;  %847 = vmatprep.subr.mxu1 %v508_v9  ;;  %804 = vmatpush3.msra.mxu0 %v363_v10  ;;  %v506_v24 = vld [vmem:[%s1279_s3 + $0xd8] sm:$0xff]  ;;  %v1044_v31 = vsel %vm266_vm0, %v268_v20, %v270_v21  ;;  %v360_v33 = vld [vmem:[%s1278_s2 + $0x50] sm:$0xff] }
  0x13   : > { %v258_v16 = vld [vmem:[%s242_s26] sm:$0xff]  ;;  %848 = vmatpush3.msra.mxu1 %v492_v11  ;;  %805 = vmatprep.subr.mxu0 %v378_v12  ;;  %v361_v26 = vld [vmem:[%s1278_s2 + $0x58] sm:$0xff]  ;;  %v489_v38 = vld [vmem:[%s1279_s3 + $0x50] sm:$0xff]  ;;  %v287_v40 = vrot.slane %v1044_v31, 1  ;;  %v323_v41 = vrot.slane %v1044_v31, 3  ;;  %v1065_v42 = vsel %vm266_vm0, %v270_v21, %v272_v25  ;;  %v1068_v43 = vsel %vm266_vm0, %v272_v25, 0.0 }
  0x14   : > { %v267_v19 = vrot.slane %v258_v16, 7  ;;  %849 = vmatprep.subr.mxu1 %v507_v13  ;;  %806 = vmatpush3.msra.mxu0 %v362_v14  ;;  %v490_v27 = vld [vmem:[%s1279_s3 + $0x58] sm:$0xff]  ;;  %v375_v39 = vld [vmem:[%s1278_s2 + $0xc8] sm:$0xff]  ;;  %v289_v48 = vrot.slane %v1065_v42, 1  ;;  %v325_v49 = vrot.slane %v1065_v42, 3  ;;  %v291_v54 = vrot.slane %v1068_v43, 1 }
  0x15   : > { %850 = vmatpush3.msra.mxu1 %v491_v15  ;;  %807 = vmatprep.subr.mxu0 %v377_v23  ;;  %v504_v44 = vld [vmem:[%s1279_s3 + $0xc8] sm:$0xff]  ;;  %v374_v55 = vld [vmem:[%s1278_s2 + $0xc0] sm:$0xff]  ;;  %v327_v59 = vrot.slane %v1068_v43, 3  ;;  %v373_v1 = vld [vmem:[%s1278_s2 + $0xb8] sm:$0xff] }
  0x16   : > { %v1038_v29 = vsel %vm266_vm0, %v267_v19, %v268_v20  ;;  %v1041_v30 = vsel %vm266_vm0, 0.0, %v267_v19  ;;  %851 = vmatprep.subr.mxu1 %v506_v24  ;;  %808 = vmatpush3.msra.mxu0 %v361_v26  ;;  %v359_v45 = vld [vmem:[%s1278_s2 + $0x48] sm:$0xff]  ;;  %v503_v56 = vld [vmem:[%s1279_s3 + $0xc0] sm:$0xff]  ;;  %v290_v57 = vsel %vm283_vm1, %v287_v40, %v289_v48  ;;  %v326_v58 = vsel %vm319_vm2, %v323_v41, %v325_v49  ;;  %v502_v3 = vld [vmem:[%s1279_s3 + $0xb8] sm:$0xff] }
  0x17   : > { %v284_v34 = vrot.slane %v1041_v30, 1  ;;  %v285_v35 = vrot.slane %v1038_v29, 1  ;;  %v320_v36 = vrot.slane %v1041_v30, 3  ;;  %v321_v37 = vrot.slane %v1038_v29, 3  ;;  %852 = vmatpush3.msra.mxu1 %v490_v27  ;;  %809 = vmatprep.subr.mxu0 %v376_v28  ;;  %v488_v50 = vld [vmem:[%s1279_s3 + $0x48] sm:$0xff]  ;;  %v358_v60 = vld [vmem:[%s1278_s2 + $0x40] sm:$0xff] }
  0x18   : > { %853 = vmatprep.subr.mxu1 %v505_v32  ;;  %810 = vmatpush3.msra.mxu0 %v360_v33  ;;  %v907_v62 = vpack.i.bf16 %v290_v57, %v326_v58  ;;  %v292_v63 = vsel %vm283_vm1, %v289_v48, %v291_v54  ;;  %v487_v0 = vld [vmem:[%s1279_s3 + $0x40] sm:$0xff]  ;;  %v328_v2 = vsel %vm319_vm2, %v325_v49, %v327_v59  ;;  %v357_v5 = vld [vmem:[%s1278_s2 + $0x38] sm:$0xff]  ;;  %v372_v7 = vld [vmem:[%s1278_s2 + $0xb0] sm:$0xff]  ;;  %v306_v48 = vrot.slane %v1041_v30, 2 }
  0x19   : > { %v286_v46 = vsel %vm283_vm1, %v284_v34, %v285_v35  ;;  %v322_v47 = vsel %vm319_vm2, %v320_v36, %v321_v37  ;;  %v288_v52 = vsel %vm283_vm1, %v285_v35, %v287_v40  ;;  %v324_v53 = vsel %vm319_vm2, %v321_v37, %v323_v41  ;;  %854 = vmatpush3.msra.mxu1 %v489_v38  ;;  %v486_v6 = vld [vmem:[%s1279_s3 + $0x38] sm:$0xff]  ;;  %v501_v8 = vld [vmem:[%s1279_s3 + $0xb0] sm:$0xff]  ;;  %v371_v11 = vld [vmem:[%s1278_s2 + $0xa8] sm:$0xff] }
  0x1a   : > { %v897_v51 = vpack.i.bf16 %v286_v46, %v322_v47  ;;  %811 = vmatprep.subr.mxu0 %v375_v39  ;;  %855 = vmatprep.subr.mxu1 %v504_v44  ;;  %v902_v61 = vpack.i.bf16 %v288_v52, %v324_v53  ;;  %v912_v4 = vpack.i.bf16 %v292_v63, %v328_v2  ;;  %v356_v9 = vld [vmem:[%s1278_s2 + $0x30] sm:$0xff]  ;;  %v500_v12 = vld [vmem:[%s1279_s3 + $0xa8] sm:$0xff]  ;;  %v370_v15 = vld [vmem:[%s1278_s2 + $0xa0] sm:$0xff]  ;;  %v307_v49 = vrot.slane %v1038_v29, 2 }
  0x1b   : > { %812 = vmatpush3.msra.mxu0 %v359_v45  ;;  %856 = vmatpush3.msra.mxu1 %v488_v50  ;;  %v485_v10 = vld [vmem:[%s1279_s3 + $0x30] sm:$0xff]  ;;  %v355_v13 = vld [vmem:[%s1278_s2 + $0x28] sm:$0xff]  ;;  %v499_v16 = vld [vmem:[%s1279_s3 + $0xa0] sm:$0xff]  ;;  %v309_v52 = vrot.slane %v1044_v31, 2  ;;  %v311_v53 = vrot.slane %v1065_v42, 2  ;;  %v313_v63 = vrot.slane %v1068_v43, 2 }
  0x1c   : > { %898 = vrot.lane.b32.xlu0 %v897_v51, %s925_s17  ;;  %813 = vmatprep.subr.mxu0 %v374_v55  ;;  %v484_v14 = vld [vmem:[%s1279_s3 + $0x28] sm:$0xff]  ;;  %v354_v17 = vld [vmem:[%s1278_s2 + $0x20] sm:$0xff]  ;;  %v369_v19 = vld [vmem:[%s1278_s2 + $0x98] sm:$0xff]  ;;  %v308_v51 = vsel %vm305_vm3, %v306_v48, %v307_v49 }
  0x1d   : > { %857 = vmatprep.subr.mxu1 %v503_v56  ;;  %908 = vrot.lane.b32.xlu1 %v907_v62, %s925_s17  ;;  %v483_v18 = vld [vmem:[%s1279_s3 + $0x20] sm:$0xff]  ;;  %v498_v20 = vld [vmem:[%s1279_s3 + $0x98] sm:$0xff]  ;;  %v368_v23 = vld [vmem:[%s1278_s2 + $0x90] sm:$0xff]  ;;  %v312_v62 = vsel %vm305_vm3, %v309_v52, %v311_v53 }
  0x1e   : > { %814 = vmatpush3.msra.mxu0 %v358_v60  ;;  %858 = vmatpush3.msra.mxu1 %v487_v0  ;;  %v353_v21 = vld [vmem:[%s1278_s2 + $0x18] sm:$0xff]  ;;  %v497_v24 = vld [vmem:[%s1279_s3 + $0x90] sm:$0xff]  ;;  %v367_v27 = vld [vmem:[%s1278_s2 + $0x88] sm:$0xff] }
  0x1f   : > { %815 = vmatprep.subr.mxu0 %v373_v1  ;;  %859 = vmatprep.subr.mxu1 %v502_v3  ;;  %v482_v22 = vld [vmem:[%s1279_s3 + $0x18] sm:$0xff]  ;;  %v352_v25 = vld [vmem:[%s1278_s2 + $0x10] sm:$0xff]  ;;  %v496_v28 = vld [vmem:[%s1279_s3 + $0x88] sm:$0xff] }
  0x20   : > { %903 = vrot.lane.b32.xlu0 %v902_v61, %s925_s17  ;;  %816 = vmatpush3.msra.mxu0 %v357_v5  ;;  %v481_v26 = vld [vmem:[%s1279_s3 + $0x10] sm:$0xff]  ;;  %v351_v32 = vld [vmem:[%s1278_s2 + $0x8] sm:$0xff]  ;;  %v366_v34 = vld [vmem:[%s1278_s2 + $0x80] sm:$0xff]  ;;  %v310_v61 = vsel %vm305_vm3, %v307_v49, %v309_v52 }
  0x21   : > { %860 = vmatpush3.msra.mxu1 %v486_v6  ;;  %913 = vrot.lane.b32.xlu1 %v912_v4, %s925_s17  ;;  %v480_v33 = vld [vmem:[%s1279_s3 + $0x8] sm:$0xff]  ;;  %v495_v35 = vld [vmem:[%s1279_s3 + $0x80] sm:$0xff]  ;;  %v786_v39 = vld [vmem:[%s1188_s9 + $0x10] ss:$2 sm:$0xff]  ;;  %s1240_s17 = scalar_lea.vmem %s1280_s4, %s998_s15 }
  0x22   : > { %817 = vmatprep.subr.mxu0 %v372_v7  ;;  %861 = vmatprep.subr.mxu1 %v501_v8  ;;  %v350_v36 = vld [vmem:[%s1278_s2] sm:$0xff]  ;;  %v788_v41 = vld [vmem:[%s1188_s9 + $0x30] ss:$2 sm:$0xff]  ;;  %v790_v45 = vld [vmem:[%s1188_s9 + $0x11] ss:$2 sm:$0xff]  ;;  %v314_v7 = vsel %vm305_vm3, %v311_v53, %v313_v63 }
  0x23   : > { %818 = vmatpush3.msra.mxu0 %v356_v9  ;;  %862 = vmatpush3.msra.mxu1 %v485_v10  ;;  %v479_v37 = vld [vmem:[%s1279_s3] sm:$0xff]  ;;  %v792_v47 = vld [vmem:[%s1188_s9 + $0x31] ss:$2 sm:$0xff] }
  0x24   : > { %819 = vmatprep.subr.mxu0 %v371_v11  ;;  %863 = vmatprep.subr.mxu1 %v500_v12  ;;  %v608_v38 = vld [vmem:[%s1188_s9] ss:$2 sm:$0xff]  ;;  %v789_v44 = vld [vmem:[%s1188_s9 + $0x1] ss:$2 sm:$0xff] }
  0x25   : > { %820 = vmatpush3.msra.mxu0 %v355_v13  ;;  %864 = vmatpush3.msra.mxu1 %v484_v14  ;;  %v787_v40 = vld [vmem:[%s1188_s9 + $0x20] ss:$2 sm:$0xff]  ;;  %v791_v46 = vld [vmem:[%s1188_s9 + $0x21] ss:$2 sm:$0xff] }
  0x26   : > { %821 = vmatprep.subr.mxu0 %v370_v15  ;;  %865 = vmatprep.subr.mxu1 %v499_v16 }
  0x27   : > { %822 = vmatpush3.msra.mxu0 %v354_v17  ;;  %866 = vmatpush3.msra.mxu1 %v483_v18 }
  0x28   : > { %823 = vmatprep.subr.mxu0 %v369_v19  ;;  %867 = vmatprep.subr.mxu1 %v498_v20 }
  0x29   : > { %824 = vmatpush3.msra.mxu0 %v353_v21  ;;  %868 = vmatpush3.msra.mxu1 %v482_v22 }
  0x2a   : > { %825 = vmatprep.subr.mxu0 %v368_v23  ;;  %869 = vmatprep.subr.mxu1 %v497_v24 }
  0x2b   : > { %826 = vmatpush3.msra.mxu0 %v352_v25  ;;  %870 = vmatpush3.msra.mxu1 %v481_v26 }
  0x2c   : > { %827 = vmatprep.subr.mxu0 %v367_v27  ;;  %871 = vmatprep.subr.mxu1 %v496_v28 }
  0x2d   : > { %828 = vmatpush3.msra.mxu0 %v351_v32  ;;  %872 = vmatpush3.msra.mxu1 %v480_v33 }
  0x2e   : > { %829 = vmatprep.subr.mxu0 %v366_v34  ;;  %873 = vmatprep.subr.mxu1 %v495_v35 }
  0x2f   : > { %830 = vmatpush3.msra.mxu0 %v350_v36  ;;  %874 = vmatpush3.msra.mxu1 %v479_v37 }
  0x30   : > { %619 = vrot.lane.b32.xlu0 %v608_v38, %s926_s24  ;;  %621 = vrot.lane.b32.xlu1 %v786_v39, %s926_s24 }
  0x34   : > { %623 = vrot.lane.b32.xlu0 %v787_v40, %s926_s24  ;;  %625 = vrot.lane.b32.xlu1 %v788_v41, %s926_s24 }
  0x38   : > { %653 = vrot.lane.b32.xlu0 %v789_v44, %s926_s24  ;;  %655 = vrot.lane.b32.xlu1 %v790_v45, %s926_s24 }
  0x3c   : > { %657 = vrot.lane.b32.xlu0 %v791_v46, %s926_s24  ;;  %659 = vrot.lane.b32.xlu1 %v792_v47, %s926_s24 }
  0x8e   : > { %v899_v50 = vpop.permute.xlu0 %898 }
  0x8f   : > { %v901_v54 = vunpack.i.h.bf16 %v899_v50  ;;  %v900_v55 = vunpack.i.l.bf16 %v899_v50  ;;  %v909_v56 = vpop.permute.xlu1 %908 }
  0x90   : > { %v910_v59 = vunpack.i.l.bf16 %v909_v56  ;;  %v911_v2 = vunpack.i.h.bf16 %v909_v56 }
  0x91   : > { %v346_v57 = vsel %vm341_vm4, %v308_v51, %v900_v55  ;;  %v342_v58 = vsel %vm341_vm4, %v1041_v30, %v901_v54 }
  0x92   : > { %v904_v60 = vpop.permute.xlu0 %903  ;;  %446 = vmatprep.mubr.f32.mxu0 %v346_v57  ;;  %575 = vmatprep.mubr.f32.mxu1 %v346_v57  ;;  %v348_v6 = vsel %vm341_vm4, %v312_v62, %v910_v59  ;;  %v344_v8 = vsel %vm341_vm4, %v1044_v31, %v911_v2 }
  0x93   : > { %v906_v0 = vunpack.i.h.bf16 %v904_v60  ;;  %v905_v1 = vunpack.i.l.bf16 %v904_v60  ;;  %447 = vmatmul.mubr.f32.vlgmr.msra.gmra.mxu0 %v342_v58  ;;  %576 = vmatmul.mubr.f32.vlgmr.msra.gmra.mxu1 %v342_v58  ;;  %v914_v3 = vpop.permute.xlu1 %913 }
  0x94   : > { %v915_v5 = vunpack.i.l.bf16 %v914_v3  ;;  %v916_v43 = vunpack.i.h.bf16 %v914_v3 }
  0x95   : > { %v347_v4 = vsel %vm341_vm4, %v310_v61, %v905_v1  ;;  %v343_v30 = vsel %vm341_vm4, %v1038_v29, %v906_v0 }
  0x96   : > { %451 = vmatprep.mubr.f32.mxu0 %v347_v4  ;;  %580 = vmatprep.mubr.f32.mxu1 %v347_v4  ;;  %v349_v9 = vsel %vm341_vm4, %v314_v7, %v915_v5  ;;  %v345_v29 = vsel %vm341_vm4, %v1065_v42, %v916_v43 }
  0x97   : > { %452 = vmatmul.mubr.f32.gmra.mxu0 %v343_v30  ;;  %581 = vmatmul.mubr.f32.gmra.mxu1 %v343_v30 }
  0x98   : > { %456 = vmatprep.mubr.f32.mxu0 %v348_v6  ;;  %585 = vmatprep.mubr.f32.mxu1 %v348_v6 }
  0x9b   : > { %457 = vmatmul.mubr.f32.gmra.mxu0 %v344_v8  ;;  %586 = vmatmul.mubr.f32.gmra.mxu1 %v344_v8 }
  0x9c   : > { %461 = vmatprep.mubr.f32.mxu0 %v349_v9  ;;  %590 = vmatprep.mubr.f32.mxu1 %v349_v9 }
  0x9f   : > { %462 = vmatmul.mubr.f32.gmra.mxu0 %v345_v29  ;;  %591 = vmatmul.mubr.f32.gmra.mxu1 %v345_v29 }
  0xa2   : > { %v620_v10 = vpop.permute.xlu0 %619  ;;  %v622_v11 = vpop.permute.xlu1 %621 }
  0xa6   : > { %v624_v12 = vpop.permute.xlu0 %623  ;;  %v1234_v18 = vpop.permute.xlu1 %625 }
  0xaa   : > { %v654_v22 = vpop.permute.xlu0 %653  ;;  %v656_v38 = vpop.permute.xlu1 %655 }
  0xae   : > { %v658_v53 = vpop.permute.xlu0 %657  ;;  %v660_v0 = vpop.permute.xlu1 %659 }
 0x153   : > { %v831_v13 = vpop.f32.mrf.mxu0  ;;  %v875_v14 = vpop.f32.mrf.mxu1 }
 0x155   : > { %v832_v15 = vpop.f32.mrf.mxu0  ;;  %v876_v16 = vpop.f32.mrf.mxu1 }
 0x156   : > { %v833_v31 = vadd.f32 %v832_v15, %v831_v13  ;;  %v877_v17 = vadd.f32 %v876_v16, %v875_v14 }
 0x157   : > { %v834_v19 = vpop.f32.mrf.mxu0  ;;  %v878_v20 = vpop.f32.mrf.mxu1 }
 0x158   : > { %vm467_vm6 = vcmp.gt.f32.partialorder %v833_v31, 0.0  ;;  %v471_v42 = vmul.f32 0.2, %v833_v31  ;;  %vm596_vm7 = vcmp.gt.f32.partialorder %v877_v17, 0.0  ;;  %v600_v21 = vmul.f32 0.2, %v877_v17 }
 0x159   : > { %v835_v23 = vpop.f32.mrf.mxu0  ;;  %v879_v24 = vpop.f32.mrf.mxu1 }
 0x15a   : > { %v475_v25 = vsel %vm467_vm6, %v833_v31, %v471_v42  ;;  %v836_v26 = vadd.f32 %v835_v23, %v834_v19  ;;  %v880_v27 = vadd.f32 %v879_v24, %v878_v20  ;;  %v604_v28 = vsel %vm596_vm7, %v877_v17, %v600_v21 }
 0x15b   : > { %v632_v32 = vsel %vm631_vm5, %v475_v25, %v620_v10  ;;  %v665_v33 = vsel %vm631_vm5, %v604_v28, %v654_v22  ;;  %v837_v34 = vpop.f32.mrf.mxu0  ;;  %v881_v35 = vpop.f32.mrf.mxu1 }
 0x15c   : > { %637 = vst.msk [vmem:[%s1240_s17] sm:$0xff] %vm636_vm8, %v632_v32  ;;  %vm468_vm9 = vcmp.gt.f32.partialorder %v836_v26, 0.0  ;;  %v472_v36 = vmul.f32 0.2, %v836_v26  ;;  %vm597_vm10 = vcmp.gt.f32.partialorder %v880_v27, 0.0  ;;  %669 = vst.msk [vmem:[%s1246_s19] sm:$0xff] %vm636_vm8, %v665_v33 }
 0x15d   : > { %v601_v37 = vmul.f32 0.2, %v880_v27  ;;  %v838_v39 = vpop.f32.mrf.mxu0  ;;  %v882_v40 = vpop.f32.mrf.mxu1 }
 0x15e   : > { %v476_v41 = vsel %vm468_vm9, %v836_v26, %v472_v36  ;;  %v839_v44 = vadd.f32 %v838_v39, %v837_v34  ;;  %v883_v45 = vadd.f32 %v882_v40, %v881_v35 }
 0x15f   : > { %v605_v46 = vsel %vm597_vm10, %v880_v27, %v601_v37  ;;  %v633_v47 = vsel %vm631_vm5, %v476_v41, %v622_v11  ;;  %v840_v49 = vpop.f32.mrf.mxu0  ;;  %v884_v50 = vpop.f32.mrf.mxu1 }
 0x160   : > { %v666_v48 = vsel %vm631_vm5, %v605_v46, %v656_v38  ;;  %638 = vst.msk [vmem:[%s1240_s17 + $0x8] sm:$0xff] %vm636_vm8, %v633_v47  ;;  %vm469_vm11 = vcmp.gt.f32.partialorder %v839_v44, 0.0  ;;  %v473_v51 = vmul.f32 0.2, %v839_v44  ;;  %vm598_vm12 = vcmp.gt.f32.partialorder %v883_v45, 0.0 }
 0x161   : > { %v602_v52 = vmul.f32 0.2, %v883_v45  ;;  %670 = vst.msk [vmem:[%s1246_s19 + $0x8] sm:$0xff] %vm636_vm8, %v666_v48  ;;  %v841_v54 = vpop.f32.mrf.mxu0  ;;  %v885_v55 = vpop.f32.mrf.mxu1 }
 0x162   : > { %v477_v56 = vsel %vm469_vm11, %v839_v44, %v473_v51  ;;  %v842_v57 = vadd.f32 %v841_v54, %v840_v49  ;;  %v886_v58 = vadd.f32 %v885_v55, %v884_v50 }
 0x163   : > { %v606_v59 = vsel %vm598_vm12, %v883_v45, %v602_v52  ;;  %v634_v60 = vsel %vm631_vm5, %v477_v56, %v624_v12 }
 0x164   : > { %v667_v61 = vsel %vm631_vm5, %v606_v59, %v658_v53  ;;  %639 = vst.msk [vmem:[%s1240_s17 + $0x10] sm:$0xff] %vm636_vm8, %v634_v60  ;;  %vm470_vm13 = vcmp.gt.f32.partialorder %v842_v57, 0.0  ;;  %v474_v62 = vmul.f32 0.2, %v842_v57  ;;  %vm599_vm14 = vcmp.gt.f32.partialorder %v886_v58, 0.0 }
 0x165   : > { %v603_v63 = vmul.f32 0.2, %v886_v58  ;;  %671 = vst.msk [vmem:[%s1246_s19 + $0x10] sm:$0xff] %vm636_vm8, %v667_v61 }
 0x166   : > { %v478_v1 = vsel %vm470_vm13, %v842_v57, %v474_v62 }
 0x167   : > { %v607_v2 = vsel %vm599_vm14, %v886_v58, %v603_v63  ;;  %v635_v3 = vsel %vm631_vm5, %v478_v1, %v1234_v18 }
 0x168   : > { %v668_v4 = vsel %vm631_vm5, %v607_v2, %v660_v0  ;;  %640 = vst.msk [vmem:[%s1240_s17 + $0x18] sm:$0xff] %vm636_vm8, %v635_v3 }
 0x169   : > { %672 = vst.msk [vmem:[%s1246_s19 + $0x18] sm:$0xff] %vm636_vm8, %v668_v4 }
 0x16a PF: > { %s16_s18 = sadd.s32 1, %s923_s18  }
 0x16b   : > { %p13_p4 = scmp.ge.s32.totalorder %s16_s18, 4  }
 0x16d   :  { %15 = sbr.rel (!%p13_p4) target bundleno = 1 (0x1), region = 88 }

// kernel: generator_1024v2.4
= control target key start
LH: loop header
LB: loop body
LE: loop exit
PB: predicated region body
PF: predicated region fallthrough
CT: control target
= control target key end

     0   :  { %s2617_s21 = smov 0   ;;  %s3795_s0 = inlined_call_operand.vmem [shape: f32[2,128,1], index: 0, kind: input, shape index: {}]   ;;  %s3796_s1 = inlined_call_operand.vmem [shape: f32[7,16], index: 1, kind: input, shape index: {}]   ;;  %s3797_s2 = inlined_call_operand.vmem [shape: f32[112,32], index: 2, kind: input, shape index: {}]   ;;  %s3798_s3 = inlined_call_operand.vmem [shape: f32[224,32], index: 3, kind: input, shape index: {}]   ;;  %s3799_s4 = inlined_call_operand.vmem [shape: f32[2,64,16], index: 4, kind: output, shape index: {0}]   ;;  %s3800_s5 = inlined_call_operand.vmem [shape: f32[2,32,32], index: 5, kind: output, shape index: {1}]   ;;  %s3801_s6 = inlined_call_operand.vmem [shape: f32[2,16,32], index: 6, kind: output, shape index: {2}]  }
   0x1 LB: > { %s2358_s22 = sadd.s32 4294967295, %s2567_s21   ;;  %p2362_p0 = scmp.ge.s32.totalorder %s2567_s21, 1  ;;  %s2567_s21 = sphi %s2617_s21, %s17_s21  }
   0x2   : > { %p217_p1 = scmp.lt.s32.totalorder %s2567_s21, 3 }
   0x4   : > { %p218_p2 = pnand %p2362_p0, %p217_p1 }
   0x5   : > { %p257_p3 = scmp.lt.s32.totalorder (!%p218_p2), %s2358_s22, 1  ;;  %s2569_s27 = smov (!%p218_p2), 2  }
   0x6   : > { %221 = sbr.rel (%p218_p2) target bundleno = 1379 (0x563), region = 36  ;;  %s2570_s28 = smov (!%p218_p2), 1  }
   0x7   : > { %s2571_s29 = smov (!%p218_p2), 3   ;;  %s2572_s30 = smov (!%p218_p2), 4  }
   0x8   : > { %s2573_s7 = smov (!%p218_p2), 5   ;;  %s2574_s10 = smov (!%p218_p2), 6  }
   0x9   : > { %s2575_s19 = smov (!%p218_p2), 80   ;;  %s2576_s24 = smov (!%p218_p2), 16  }
   0xa   : > { %s2580_s17 = smov (!%p218_p2), 64  }
   0xb   : > { %s3803_s22 = smov (!%p257_p3, %s2358_s22), 1  ;;  %vm309_vm0 = vcmask 1042432   ;;  %vm444_vm1 = vcmask 1045504   ;;  %vm362_vm2 = vcmask 1046528   ;;  %vm526_vm3 = vcmask 1044480  }
   0xc   : > { %s2402_s23 = sshll.u32 %s3803_s22, 7  ;;  %vm608_vm4 = vcmask 1043456   ;;  %v955_v43 = vld [vmem:[%s3796_s1] sm:$0x7f]  ;;  %vm771_vm5 = vcmask 1041408   ;;  %vm853_vm6 = vcmask 7168  }
   0xd   : > { %s2631_s26 = scalar_lea.vmem %s3795_s0, %s2402_s23  ;;  %2445 = vmatprep.subr.msk.mxu1 %vm362_vm2, %v955_v43  ;;  %vm870_vm7 = vcmask 15360   ;;  %vm887_vm8 = vcmask 23552   ;;  %vm904_vm9 = vcmask 31744   ;;  %vm921_vm10 = vcmask 39936   ;;  %s2403_s11 = sshll.u32 %s3803_s22, 6 }
   0xe   : > { %v277_v0 = vld [vmem:[%s2631_s26] sm:$0xff]  ;;  %v278_v1 = vld [vmem:[%s2631_s26 + $0x8] sm:$0xff]  ;;  %v279_v2 = vld [vmem:[%s2631_s26 + $0x10] sm:$0xff]  ;;  %2446 = vmatpush3.msk.msra.mxu1 %vm362_vm2, %v955_v43  ;;  %vm938_vm11 = vcmask 48128   ;;  %vm956_vm12 = vcmask 56320   ;;  %vm1201_vm14 = vcmask 130048   ;;  %s3179_s14 = scalar_lea.vmem %s3799_s4, %s2403_s11 }
   0xf   : > { %v310_v3 = vrot.slane %v277_v0, 5  ;;  %v311_v4 = vrot.slane %v278_v1, 5  ;;  %v313_v5 = vrot.slane %v279_v2, 5  ;;  %v280_v6 = vld [vmem:[%s2631_s26 + $0x18] sm:$0xff]  ;;  %v281_v25 = vld [vmem:[%s2631_s26 + $0x20] sm:$0xff]  ;;  %v282_v48 = vld [vmem:[%s2631_s26 + $0x28] sm:$0xff] }
  0x10   : > { %v315_v16 = vrot.slane %v280_v6, 5  ;;  %v317_v31 = vrot.slane %v281_v25, 5  ;;  %v319_v53 = vrot.slane %v282_v48, 5  ;;  %v283_v59 = vld [vmem:[%s2631_s26 + $0x30] sm:$0xff]  ;;  %s2579_s11 = smov 48   ;;  %s2404_s13 = sshll.u32 %s3803_s22, 5 }
  0x11   : > { %v2638_v7 = vsel %vm309_vm0, %v310_v3, %v311_v4  ;;  %v2641_v8 = vsel %vm309_vm0, 0.0, %v310_v3  ;;  %v2644_v9 = vsel %vm309_vm0, %v311_v4, %v313_v5  ;;  %v321_v0 = vrot.slane %v283_v59, 5 }
  0x12   : > { %v445_v10 = vrot.slane %v2641_v8, 2  ;;  %v446_v11 = vrot.slane %v2638_v7, 2  ;;  %v363_v12 = vrot.slane %v2641_v8, 1  ;;  %v364_v13 = vrot.slane %v2638_v7, 1 }
  0x13   : > { %v448_v14 = vrot.slane %v2644_v9, 2  ;;  %v366_v15 = vrot.slane %v2644_v9, 1  ;;  %v528_v19 = vrot.slane %v2638_v7, 3  ;;  %v530_v20 = vrot.slane %v2644_v9, 3 }
  0x14   : > { %v447_v17 = vsel %vm444_vm1, %v445_v10, %v446_v11  ;;  %v365_v18 = vsel %vm362_vm2, %v363_v12, %v364_v13  ;;  %v527_v23 = vrot.slane %v2641_v8, 3  ;;  %v2662_v24 = vsel %vm309_vm0, %v313_v5, %v315_v16 }
  0x15   : > { %478 = vrot.lane.b32.xlu1 %v447_v17, %s2569_s27  ;;  %396 = vrot.lane.b32.xlu0 %v365_v18, %s2570_s28  ;;  %v449_v21 = vsel %vm444_vm1, %v446_v11, %v448_v14  ;;  %v367_v22 = vsel %vm362_vm2, %v364_v13, %v366_v15  ;;  %v531_v26 = vsel %vm526_vm3, %v528_v19, %v530_v20  ;;  %v368_v28 = vrot.slane %v2662_v24, 1  ;;  %v284_v17 = vld [vmem:[%s2631_s26 + $0x38] sm:$0xff] }
  0x16   : > { %v529_v27 = vsel %vm526_vm3, %v527_v23, %v528_v19  ;;  %v609_v29 = vrot.slane %v2641_v8, 4  ;;  %v610_v30 = vrot.slane %v2638_v7, 4  ;;  %v690_v32 = vrot.slane %v2641_v8, 5 }
  0x17   : > { %v369_v33 = vsel %vm362_vm2, %v366_v15, %v368_v28  ;;  %v691_v35 = vrot.slane %v2638_v7, 5  ;;  %v612_v36 = vrot.slane %v2644_v9, 4  ;;  %v2680_v37 = vsel %vm309_vm0, %v315_v16, %v317_v31 }
  0x18   : > { %v611_v34 = vsel %vm608_vm4, %v609_v29, %v610_v30  ;;  %v450_v40 = vrot.slane %v2662_v24, 2  ;;  %v370_v41 = vrot.slane %v2680_v37, 1  ;;  %v772_v42 = vrot.slane %v2641_v8, 6  ;;  %v285_v29 = vld [vmem:[%s2631_s26 + $0x40] sm:$0xff] }
  0x19   : > { %480 = vrot.lane.b32.xlu1 %v449_v21, %s2569_s27  ;;  %398 = vrot.lane.b32.xlu0 %v367_v22, %s2570_s28  ;;  %v692_v38 = vsel %vm309_vm0, %v690_v32, %v691_v35  ;;  %v613_v39 = vsel %vm608_vm4, %v610_v30, %v612_v36  ;;  %v773_v46 = vrot.slane %v2638_v7, 6  ;;  %v693_v47 = vrot.slane %v2644_v9, 5 }
  0x1a   : > { %v451_v44 = vsel %vm444_vm1, %v448_v14, %v450_v40  ;;  %v371_v45 = vsel %vm362_vm2, %v368_v28, %v370_v41  ;;  %v532_v51 = vrot.slane %v2662_v24, 3  ;;  %v452_v52 = vrot.slane %v2680_v37, 2 }
  0x1b   : > { %v774_v49 = vsel %vm771_vm5, %v772_v42, %v773_v46  ;;  %v694_v50 = vsel %vm309_vm0, %v691_v35, %v693_v47  ;;  %v534_v56 = vrot.slane %v2680_v37, 3  ;;  %v775_v57 = vrot.slane %v2644_v9, 6 }
  0x1c   : > { %v533_v54 = vsel %vm526_vm3, %v530_v20, %v532_v51  ;;  %v453_v55 = vsel %vm444_vm1, %v450_v40, %v452_v52  ;;  %v2714_v58 = vsel %vm309_vm0, %v317_v31, %v319_v53  ;;  %v614_v63 = vrot.slane %v2662_v24, 4 }
  0x1d   : > { %562 = vrot.lane.b32.xlu1 %v531_v26, %s2571_s29  ;;  %560 = vrot.lane.b32.xlu0 %v529_v27, %s2571_s29  ;;  %v535_v60 = vsel %vm526_vm3, %v532_v51, %v534_v56  ;;  %v776_v61 = vsel %vm771_vm5, %v773_v46, %v775_v57  ;;  %v372_v62 = vrot.slane %v2714_v58, 1  ;;  %v695_v3 = vrot.slane %v2662_v24, 5 }
  0x1e   : > { %v615_v2 = vsel %vm608_vm4, %v612_v36, %v614_v63  ;;  %v616_v4 = vrot.slane %v2680_v37, 4  ;;  %v2730_v5 = vsel %vm309_vm0, %v319_v53, %v321_v0  ;;  %v454_v11 = vrot.slane %v2714_v58, 2 }
  0x1f   : > { %v373_v1 = vsel %vm362_vm2, %v370_v41, %v372_v62  ;;  %v696_v6 = vsel %vm309_vm0, %v693_v47, %v695_v3  ;;  %v374_v12 = vrot.slane %v2730_v5, 1  ;;  %v777_v15 = vrot.slane %v2662_v24, 6 }
  0x20   : > { %v617_v10 = vsel %vm608_vm4, %v614_v63, %v616_v4  ;;  %v455_v13 = vsel %vm444_vm1, %v452_v52, %v454_v11  ;;  %v697_v16 = vrot.slane %v2680_v37, 5  ;;  %v536_v20 = vrot.slane %v2714_v58, 3 }
  0x21   : > { %400 = vrot.lane.b32.xlu1 %v369_v33, %s2570_s28  ;;  %642 = vrot.lane.b32.xlu0 %v611_v34, %s2572_s30  ;;  %v375_v14 = vsel %vm362_vm2, %v372_v62, %v374_v12  ;;  %v778_v18 = vsel %vm771_vm5, %v775_v57, %v777_v15  ;;  %v456_v21 = vrot.slane %v2730_v5, 2  ;;  %v323_v22 = vrot.slane %v284_v17, 5 }
  0x22   : > { %v698_v19 = vsel %vm309_vm0, %v695_v3, %v697_v16  ;;  %v537_v23 = vsel %vm526_vm3, %v534_v56, %v536_v20  ;;  %v538_v26 = vrot.slane %v2730_v5, 3  ;;  %v779_v27 = vrot.slane %v2680_v37, 6 }
  0x23   : > { %v457_v25 = vsel %vm444_vm1, %v454_v11, %v456_v21  ;;  %v2758_v28 = vsel %vm309_vm0, %v321_v0, %v323_v22  ;;  %v618_v33 = vrot.slane %v2714_v58, 4  ;;  %v325_v34 = vrot.slane %v285_v29, 5 }
  0x24   : > { %v539_v30 = vsel %vm526_vm3, %v536_v20, %v538_v26  ;;  %v780_v31 = vsel %vm771_vm5, %v777_v15, %v779_v27  ;;  %v376_v32 = vrot.slane %v2758_v28, 1  ;;  %v458_v43 = vrot.slane %v2758_v28, 2  ;;  %v288_v20 = vld [vmem:[%s2631_s26 + $0x58] sm:$0xff] }
  0x25   : > { %723 = vrot.lane.b32.xlu1 %v692_v38, %s2573_s7  ;;  %644 = vrot.lane.b32.xlu0 %v613_v39, %s2572_s30  ;;  %v619_v36 = vsel %vm608_vm4, %v616_v4, %v618_v33  ;;  %v699_v38 = vrot.slane %v2714_v58, 5  ;;  %v620_v39 = vrot.slane %v2730_v5, 4  ;;  %v2774_v40 = vsel %vm309_vm0, %v323_v22, %v325_v34 }
  0x26   : > { %v377_v35 = vsel %vm362_vm2, %v374_v12, %v376_v32  ;;  %v781_v47 = vrot.slane %v2714_v58, 6  ;;  %v701_v48 = vrot.slane %v2730_v5, 5  ;;  %v540_v52 = vrot.slane %v2758_v28, 3 }
  0x27   : > { %v700_v41 = vsel %vm309_vm0, %v697_v16, %v699_v38  ;;  %v621_v42 = vsel %vm608_vm4, %v618_v33, %v620_v39  ;;  %v460_v53 = vrot.slane %v2774_v40, 2  ;;  %v542_v57 = vrot.slane %v2774_v40, 3  ;;  %v289_v33 = vld [vmem:[%s2631_s26 + $0x60] sm:$0xff] }
  0x28   : > { %v702_v51 = vsel %vm309_vm0, %v699_v38, %v701_v48  ;;  %v783_v59 = vrot.slane %v2730_v5, 6 }
  0x29   : > { %482 = vrot.lane.b32.xlu1 %v451_v44, %s2569_s27  ;;  %402 = vrot.lane.b32.xlu0 %v371_v45, %s2570_s28  ;;  %v378_v44 = vrot.slane %v2774_v40, 1  ;;  %v459_v45 = vsel %vm444_vm1, %v456_v21, %v458_v43  ;;  %v461_v56 = vsel %vm444_vm1, %v458_v43, %v460_v53  ;;  %v543_v62 = vsel %vm526_vm3, %v540_v52, %v542_v57 }
  0x2a   : > { %v784_v63 = vsel %vm771_vm5, %v781_v47, %v783_v59 }
  0x2b   : > { %v379_v46 = vsel %vm362_vm2, %v376_v32, %v378_v44 }
  0x2d   : > { %805 = vrot.lane.b32.xlu1 %v774_v49, %s2574_s10  ;;  %725 = vrot.lane.b32.xlu0 %v694_v50, %s2573_s7  ;;  %v286_v49 = vld [vmem:[%s2631_s26 + $0x48] sm:$0xff]  ;;  %v782_v50 = vsel %vm771_vm5, %v779_v27, %v781_v47 }
  0x31   : > { %564 = vrot.lane.b32.xlu1 %v533_v54, %s2571_s29  ;;  %484 = vrot.lane.b32.xlu0 %v453_v55, %s2569_s27  ;;  %v327_v54 = vrot.slane %v286_v49, 5  ;;  %v541_v55 = vsel %vm526_vm3, %v538_v26, %v540_v52  ;;  %v331_v26 = vrot.slane %v288_v20, 5 }
  0x35   : > { %566 = vrot.lane.b32.xlu1 %v535_v60, %s2571_s29  ;;  %807 = vrot.lane.b32.xlu0 %v776_v61, %s2574_s10  ;;  %v2802_v60 = vsel %vm309_vm0, %v325_v34, %v327_v54  ;;  %v287_v61 = vld [vmem:[%s2631_s26 + $0x50] sm:$0xff] }
  0x36   : > { %v380_v0 = vrot.slane %v2802_v60, 1  ;;  %v626_v38 = vrot.slane %v2802_v60, 4  ;;  %v707_v43 = vrot.slane %v2802_v60, 5  ;;  %v789_v52 = vrot.slane %v2802_v60, 6 }
  0x38   : > { %v381_v3 = vsel %vm362_vm2, %v378_v44, %v380_v0 }
  0x39   : > { %404 = vrot.lane.b32.xlu1 %v373_v1, %s2570_s28  ;;  %646 = vrot.lane.b32.xlu0 %v615_v2, %s2572_s30  ;;  %v622_v1 = vrot.slane %v2758_v28, 4  ;;  %v329_v2 = vrot.slane %v287_v61, 5 }
  0x3b   : > { %v623_v4 = vsel %vm608_vm4, %v620_v39, %v622_v1  ;;  %v2818_v11 = vsel %vm309_vm0, %v327_v54, %v329_v2  ;;  %v2846_v32 = vsel %vm309_vm0, %v329_v2, %v331_v26  ;;  %v333_v39 = vrot.slane %v289_v33, 5 }
  0x3c   : > { %v382_v15 = vrot.slane %v2818_v11, 1  ;;  %v628_v44 = vrot.slane %v2818_v11, 4  ;;  %v548_v61 = vrot.slane %v2846_v32, 3 }
  0x3d   : > { %727 = vrot.lane.b32.xlu1 %v696_v6, %s2573_s7  ;;  %648 = vrot.lane.b32.xlu0 %v617_v10, %s2572_s30  ;;  %v703_v6 = vrot.slane %v2758_v28, 5  ;;  %v624_v10 = vrot.slane %v2774_v40, 4 }
  0x3e   : > { %v383_v17 = vsel %vm362_vm2, %v380_v0, %v382_v15  ;;  %v629_v47 = vsel %vm608_vm4, %v626_v38, %v628_v44 }
  0x3f   : > { %v704_v12 = vsel %vm309_vm0, %v701_v48, %v703_v6  ;;  %v466_v48 = vrot.slane %v2846_v32, 2 }
  0x41   : > { %486 = vrot.lane.b32.xlu1 %v455_v13, %s2569_s27  ;;  %406 = vrot.lane.b32.xlu0 %v375_v14, %s2570_s28  ;;  %v625_v13 = vsel %vm608_vm4, %v622_v1, %v624_v10  ;;  %v462_v14 = vrot.slane %v2802_v60, 2 }
  0x43   : > { %v463_v16 = vsel %vm444_vm1, %v460_v53, %v462_v14  ;;  %v709_v53 = vrot.slane %v2818_v11, 5 }
  0x45   : > { %809 = vrot.lane.b32.xlu1 %v778_v18, %s2574_s10  ;;  %729 = vrot.lane.b32.xlu0 %v698_v19, %s2573_s7  ;;  %v785_v18 = vrot.slane %v2758_v28, 6  ;;  %v705_v19 = vrot.slane %v2774_v40, 5 }
  0x47   : > { %v786_v21 = vsel %vm771_vm5, %v783_v59, %v785_v18  ;;  %v706_v22 = vsel %vm309_vm0, %v703_v6, %v705_v19  ;;  %v710_v59 = vsel %vm309_vm0, %v707_v43, %v709_v53  ;;  %v791_v6 = vrot.slane %v2818_v11, 6 }
  0x49   : > { %568 = vrot.lane.b32.xlu1 %v537_v23, %s2571_s29  ;;  %488 = vrot.lane.b32.xlu0 %v457_v25, %s2569_s27  ;;  %v544_v23 = vrot.slane %v2802_v60, 3  ;;  %v464_v25 = vrot.slane %v2818_v11, 2 }
  0x4b   : > { %v545_v27 = vsel %vm526_vm3, %v542_v57, %v544_v23  ;;  %v465_v29 = vsel %vm444_vm1, %v462_v14, %v464_v25  ;;  %v2897_v14 = vld [vmem:[%s2631_s26 + $0x70] sm:$0xff] }
  0x4d   : > { %570 = vrot.lane.b32.xlu1 %v539_v30, %s2571_s29  ;;  %811 = vrot.lane.b32.xlu0 %v780_v31, %s2574_s10  ;;  %v546_v30 = vrot.slane %v2818_v11, 3  ;;  %v787_v31 = vrot.slane %v2774_v40, 6 }
  0x4f   : > { %v547_v34 = vsel %vm526_vm3, %v544_v23, %v546_v30  ;;  %v790_v57 = vsel %vm771_vm5, %v787_v31, %v789_v52  ;;  %v549_v2 = vsel %vm526_vm3, %v546_v30, %v548_v61 }
  0x51   : > { %408 = vrot.lane.b32.xlu1 %v377_v35, %s2570_s28  ;;  %650 = vrot.lane.b32.xlu0 %v619_v36, %s2572_s30  ;;  %v788_v35 = vsel %vm771_vm5, %v785_v18, %v787_v31  ;;  %v384_v36 = vrot.slane %v2846_v32, 1  ;;  %v630_v18 = vrot.slane %v2846_v32, 4 }
  0x53   : > { %v631_v23 = vsel %vm608_vm4, %v628_v44, %v630_v18 }
  0x55   : > { %731 = vrot.lane.b32.xlu1 %v700_v41, %s2573_s7  ;;  %652 = vrot.lane.b32.xlu0 %v621_v42, %s2572_s30  ;;  %v385_v41 = vsel %vm362_vm2, %v382_v15, %v384_v36  ;;  %v627_v42 = vsel %vm608_vm4, %v624_v10, %v626_v38 }
  0x59   : > { %490 = vrot.lane.b32.xlu1 %v459_v45, %s2569_s27  ;;  %410 = vrot.lane.b32.xlu0 %v379_v46, %s2570_s28  ;;  %v2862_v45 = vsel %vm309_vm0, %v331_v26, %v333_v39  ;;  %v708_v46 = vsel %vm309_vm0, %v705_v19, %v707_v43 }
  0x5a   : > { %v386_v49 = vrot.slane %v2862_v45, 1  ;;  %v632_v26 = vrot.slane %v2862_v45, 4 }
  0x5d   : > { %813 = vrot.lane.b32.xlu1 %v782_v50, %s2574_s10  ;;  %733 = vrot.lane.b32.xlu0 %v702_v51, %s2573_s7  ;;  %v467_v50 = vsel %vm444_vm1, %v464_v25, %v466_v48  ;;  %v387_v51 = vsel %vm362_vm2, %v384_v36, %v386_v49  ;;  %v711_v25 = vrot.slane %v2846_v32, 5 }
  0x5f   : > { %v712_v33 = vsel %vm309_vm0, %v709_v53, %v711_v25 }
  0x61   : > { %572 = vrot.lane.b32.xlu1 %v541_v55, %s2571_s29  ;;  %492 = vrot.lane.b32.xlu0 %v461_v56, %s2569_s27  ;;  %v290_v56 = vld [vmem:[%s2631_s26 + $0x68] sm:$0xff] }
  0x62   : > { %v335_v1 = vrot.slane %v290_v56, 5 }
  0x65   : > { %574 = vrot.lane.b32.xlu1 %v543_v62, %s2571_s29  ;;  %815 = vrot.lane.b32.xlu0 %v784_v63, %s2574_s10  ;;  %v468_v62 = vrot.slane %v2862_v45, 2 }
  0x69   : > { %412 = vrot.lane.b32.xlu1 %v381_v3, %s2570_s28  ;;  %654 = vrot.lane.b32.xlu0 %v623_v4, %s2572_s30  ;;  %v469_v3 = vsel %vm444_vm1, %v466_v48, %v468_v62  ;;  %v550_v4 = vrot.slane %v2862_v45, 3 }
  0x6b   : > { %v551_v15 = vsel %vm526_vm3, %v548_v61, %v550_v4 }
  0x6d   : > { %735 = vrot.lane.b32.xlu1 %v704_v12, %s2573_s7  ;;  %656 = vrot.lane.b32.xlu0 %v625_v13, %s2572_s30  ;;  %v2894_v13 = vsel %vm309_vm0, %v333_v39, %v335_v1 }
  0x6e   : > { %v552_v56 = vrot.slane %v2894_v13, 3 }
  0x71   : > { %494 = vrot.lane.b32.xlu1 %v463_v16, %s2569_s27  ;;  %414 = vrot.lane.b32.xlu0 %v383_v17, %s2570_s28  ;;  %v792_v16 = vsel %vm771_vm5, %v789_v52, %v791_v6  ;;  %v388_v17 = vrot.slane %v2894_v13, 1  ;;  %v292_v52 = vld [vmem:[%s2631_s26 + $0x78] sm:$0xff]  ;;  %s271_s26 = scalar_lea.vmem %s3800_s5, %s2404_s13 }
  0x75   : > { %817 = vrot.lane.b32.xlu1 %v786_v21, %s2574_s10  ;;  %737 = vrot.lane.b32.xlu0 %v706_v22, %s2573_s7  ;;  %v337_v21 = vrot.slane %v2897_v14, 5  ;;  %v389_v22 = vsel %vm362_vm2, %v386_v49, %v388_v17  ;;  %v634_v14 = vrot.slane %v2894_v13, 4 }
  0x77   : > { %v2919_v30 = vsel %vm309_vm0, %v335_v1, %v337_v21 }
  0x78   : > { %v390_v36 = vrot.slane %v2919_v30, 1  ;;  %v554_v1 = vrot.slane %v2919_v30, 3 }
  0x79   : > { %576 = vrot.lane.b32.xlu1 %v545_v27, %s2571_s29  ;;  %496 = vrot.lane.b32.xlu0 %v465_v29, %s2569_s27 }
  0x7d   : > { %578 = vrot.lane.b32.xlu1 %v547_v34, %s2571_s29  ;;  %819 = vrot.lane.b32.xlu0 %v788_v35, %s2574_s10  ;;  %v633_v34 = vsel %vm608_vm4, %v630_v18, %v632_v26  ;;  %v470_v35 = vrot.slane %v2894_v13, 2 }
  0x7f   : > { %v471_v44 = vsel %vm444_vm1, %v468_v62, %v470_v35  ;;  %v339_v62 = vrot.slane %v292_v52, 5 }
  0x81   : > { %416 = vrot.lane.b32.xlu1 %v385_v41, %s2570_s28  ;;  %658 = vrot.lane.b32.xlu0 %v627_v42, %s2572_s30  ;;  %v793_v42 = vrot.slane %v2846_v32, 6 }
  0x85   : > { %739 = vrot.lane.b32.xlu1 %v708_v46, %s2573_s7  ;;  %660 = vrot.lane.b32.xlu0 %v629_v47, %s2572_s30  ;;  %v391_v46 = vsel %vm362_vm2, %v388_v17, %v390_v36  ;;  %v713_v47 = vrot.slane %v2862_v45, 5 }
  0x87   : > { %v479_v54 = vpop.permute.xlu1 %478  ;;  %v397_v55 = vpop.permute.xlu0 %396 }
  0x88   : > { %v854_v31 = vsel %vm853_vm6, %v2641_v8, %v397_v55  ;;  %v714_v55 = vsel %vm309_vm0, %v711_v25, %v713_v47  ;;  %v635_v25 = vsel %vm608_vm4, %v632_v26, %v634_v14 }
  0x89   : > { %498 = vrot.lane.b32.xlu1 %v467_v50, %s2569_s27  ;;  %418 = vrot.lane.b32.xlu0 %v387_v51, %s2570_s28  ;;  %v871_v39 = vsel %vm870_vm7, %v854_v31, %v479_v54  ;;  %v794_v54 = vsel %vm771_vm5, %v791_v6, %v793_v42 }
  0x8b   : > { %v2883_v63 = vpop.permute.xlu1 %480  ;;  %v399_v0 = vpop.permute.xlu0 %398 }
  0x8c   : > { %v855_v53 = vsel %vm853_vm6, %v2638_v7, %v399_v0 }
  0x8d   : > { %821 = vrot.lane.b32.xlu1 %v790_v57, %s2574_s10  ;;  %741 = vrot.lane.b32.xlu0 %v710_v59, %s2573_s7  ;;  %v472_v57 = vrot.slane %v2919_v30, 2  ;;  %v872_v7 = vsel %vm870_vm7, %v855_v53, %v2883_v63 }
  0x8f   : > { %v2891_v10 = vpop.permute.xlu1 %562  ;;  %v561_v12 = vpop.permute.xlu0 %560  ;;  %v473_v6 = vsel %vm444_vm1, %v470_v35, %v472_v57 }
  0x90   : > { %v888_v41 = vsel %vm887_vm8, %v871_v39, %v561_v12  ;;  %v889_v0 = vsel %vm887_vm8, %v872_v7, %v2891_v10  ;;  %v795_v12 = vrot.slane %v2862_v45, 6 }
  0x91   : > { %580 = vrot.lane.b32.xlu1 %v549_v2, %s2571_s29  ;;  %500 = vrot.lane.b32.xlu0 %v469_v3, %s2569_s27  ;;  %v553_v3 = vsel %vm526_vm3, %v550_v4, %v552_v56  ;;  %v555_v4 = vsel %vm526_vm3, %v552_v56, %v554_v1 }
  0x92   : > { %v796_v18 = vsel %vm771_vm5, %v793_v42, %v795_v12 }
  0x93   : > { %v2907_v19 = vpop.permute.xlu1 %400  ;;  %v643_v20 = vpop.permute.xlu0 %642 }
  0x94   : > { %v905_v43 = vsel %vm904_vm9, %v888_v41, %v643_v20  ;;  %v856_v41 = vsel %vm853_vm6, %v2644_v9, %v2907_v19  ;;  %v717_v19 = vrot.slane %v2919_v30, 5 }
  0x95   : > { %582 = vrot.lane.b32.xlu1 %v551_v15, %s2571_s29  ;;  %823 = vrot.lane.b32.xlu0 %v792_v16, %s2574_s10  ;;  %v2975_v16 = vsel %vm309_vm0, %v337_v21, %v339_v62 }
  0x96   : > { %v392_v20 = vrot.slane %v2975_v16, 1  ;;  %v474_v39 = vrot.slane %v2975_v16, 2 }
  0x97   : > { %v724_v27 = vpop.permute.xlu1 %723  ;;  %v645_v29 = vpop.permute.xlu0 %644 }
  0x98   : > { %v922_v48 = vsel %vm921_vm10, %v905_v43, %v724_v27  ;;  %v906_v2 = vsel %vm904_vm9, %v889_v0, %v645_v29  ;;  %v715_v27 = vrot.slane %v2894_v13, 5  ;;  %v636_v29 = vrot.slane %v2919_v30, 4 }
  0x99   : > { %420 = vrot.lane.b32.xlu1 %v389_v22, %s2570_s28  ;;  %662 = vrot.lane.b32.xlu0 %v631_v23, %s2572_s30  ;;  %v393_v23 = vsel %vm362_vm2, %v390_v36, %v392_v20 }
  0x9a   : > { %v716_v35 = vsel %vm309_vm0, %v713_v47, %v715_v27  ;;  %v637_v36 = vsel %vm608_vm4, %v634_v14, %v636_v29  ;;  %v797_v47 = vrot.slane %v2894_v13, 6 }
  0x9b   : > { %v2931_v38 = vpop.permute.xlu1 %482  ;;  %v2933_v8 = vpop.permute.xlu0 %402 }
  0x9c   : > { %v798_v53 = vsel %vm771_vm5, %v795_v12, %v797_v47 }
  0x9d   : > { %743 = vrot.lane.b32.xlu1 %v712_v33, %s2573_s7  ;;  %664 = vrot.lane.b32.xlu0 %v633_v34, %s2572_s30  ;;  %v2998_v34 = vsel %vm309_vm0, %v339_v62, 0.0 }
  0x9e   : > { %v394_v26 = vrot.slane %v2998_v34, 1  ;;  %v476_v56 = vrot.slane %v2998_v34, 2 }
  0x9f   : > { %v806_v49 = vpop.permute.xlu1 %805  ;;  %v726_v50 = vpop.permute.xlu0 %725 }
  0xa0   : > { %v939_v51 = vsel %vm938_vm11, %v922_v48, %v806_v49  ;;  %v923_v63 = vsel %vm921_vm10, %v906_v2, %v726_v50  ;;  %v475_v49 = vsel %vm444_vm1, %v472_v57, %v474_v39  ;;  %v395_v9 = vsel %vm362_vm2, %v392_v20, %v394_v26 }
  0xa1   : > { %502 = vrot.lane.b32.xlu1 %v471_v44, %s2569_s27  ;;  %422 = vrot.lane.b32.xlu0 %v391_v46, %s2570_s28  ;;  %v873_v44 = vsel %vm870_vm7, %v856_v41, %v2931_v38  ;;  %v857_v57 = vsel %vm853_vm6, %v2662_v24, %v2933_v8  ;;  %v558_v2 = vrot.slane %v2998_v34, 3  ;;  %v477_v24 = vsel %vm444_vm1, %v474_v39, %v476_v56 }
  0xa2   : > { %2447 = vmatprep.mubr.msk.f32.mxu1 %vm956_vm12, %v939_v51  ;;  %v799_v8 = vrot.slane %v2919_v30, 6  ;;  %v803_v39 = vrot.slane %v2998_v34, 6 }
  0xa3   : > { %v565_v59 = vpop.permute.xlu1 %564  ;;  %v2956_v61 = vpop.permute.xlu0 %484 }
  0xa4   : > { %v890_v46 = vsel %vm887_vm8, %v873_v44, %v565_v59  ;;  %v874_v7 = vsel %vm870_vm7, %v857_v57, %v2956_v61 }
  0xa5   : > { %825 = vrot.lane.b32.xlu1 %v794_v54, %s2574_s10  ;;  %745 = vrot.lane.b32.xlu0 %v714_v55, %s2573_s7  ;;  %v718_v54 = vsel %vm309_vm0, %v715_v27, %v717_v19  ;;  %v556_v55 = vrot.slane %v2975_v16, 3 }
  0xa7   : > { %v567_v15 = vpop.permute.xlu1 %566  ;;  %v808_v10 = vpop.permute.xlu0 %807 }
  0xa8   : > { %v940_v17 = vsel %vm938_vm11, %v923_v63, %v808_v10  ;;  %v891_v0 = vsel %vm887_vm8, %v874_v7, %v567_v15  ;;  %v559_v10 = vsel %vm526_vm3, %v556_v55, %v558_v2 }
  0xa9   : > { %584 = vrot.lane.b32.xlu1 %v553_v3, %s2571_s29  ;;  %504 = vrot.lane.b32.xlu0 %v473_v6, %s2569_s27  ;;  %v557_v6 = vsel %vm526_vm3, %v554_v1, %v556_v55  ;;  %v800_v1 = vsel %vm771_vm5, %v797_v47, %v799_v8 }
  0xaa   : > { %2448 = vmatmul.mubr.msk.f32.vlgmr.msra.gmra.mxu1 %vm956_vm12, %v940_v17  ;;  %v638_v17 = vrot.slane %v2975_v16, 4 }
  0xab   : > { %v2987_v21 = vpop.permute.xlu1 %404  ;;  %v647_v22 = vpop.permute.xlu0 %646 }
  0xac   : > { %v907_v48 = vsel %vm904_vm9, %v890_v46, %v647_v22  ;;  %v639_v22 = vsel %vm608_vm4, %v636_v29, %v638_v17  ;;  %v858_v29 = vsel %vm853_vm6, %v2680_v37, %v2987_v21 }
  0xad   : > { %586 = vrot.lane.b32.xlu1 %v555_v4, %s2571_s29  ;;  %827 = vrot.lane.b32.xlu0 %v796_v18, %s2574_s10  ;;  %v640_v4 = vrot.slane %v2998_v34, 4 }
  0xaf   : > { %v728_v31 = vpop.permute.xlu1 %727  ;;  %v649_v33 = vpop.permute.xlu0 %648  ;;  %v641_v14 = vsel %vm608_vm4, %v638_v17, %v640_v4 }
  0xb0   : > { %v924_v50 = vsel %vm921_vm10, %v907_v48, %v728_v31  ;;  %v908_v3 = vsel %vm904_vm9, %v891_v0, %v649_v33 }
  0xb1   : > { %424 = vrot.lane.b32.xlu1 %v393_v23, %s2570_s28  ;;  %666 = vrot.lane.b32.xlu0 %v635_v25, %s2572_s30  ;;  %v719_v23 = vrot.slane %v2975_v16, 5  ;;  %v721_v25 = vrot.slane %v2998_v34, 5 }
  0xb3   : > { %v3009_v42 = vpop.permute.xlu1 %486  ;;  %v3011_v43 = vpop.permute.xlu0 %406  ;;  %v722_v33 = vsel %vm309_vm0, %v719_v23, %v721_v25 }
  0xb4   : > { %v875_v44 = vsel %vm870_vm7, %v858_v29, %v3009_v42  ;;  %v859_v42 = vsel %vm853_vm6, %v2714_v58, %v3011_v43 }
  0xb5   : > { %747 = vrot.lane.b32.xlu1 %v716_v35, %s2573_s7  ;;  %668 = vrot.lane.b32.xlu0 %v637_v36, %s2572_s30  ;;  %v720_v35 = vsel %vm309_vm0, %v717_v19, %v719_v23  ;;  %v801_v36 = vrot.slane %v2975_v16, 6 }
  0xb7   : > { %v810_v51 = vpop.permute.xlu1 %809  ;;  %v730_v38 = vpop.permute.xlu0 %729  ;;  %v804_v48 = vsel %vm771_vm5, %v801_v36, %v803_v39  ;;  %v802_v34 = vsel %vm771_vm5, %v799_v8, %v801_v36 }
  0xb8   : > { %v941_v52 = vsel %vm938_vm11, %v924_v50, %v810_v51  ;;  %v925_v61 = vsel %vm921_vm10, %v908_v3, %v730_v38 }
  0xb9   : > { %506 = vrot.lane.b32.xlu1 %v475_v49, %s2569_s27  ;;  %426 = vrot.lane.b32.xlu0 %v395_v9, %s2570_s28 }
  0xba   : > { %2450 = vmatprep.mubr.msk.f32.mxu1 %vm956_vm12, %v941_v52 }
  0xbb   : > { %v569_v59 = vpop.permute.xlu1 %568  ;;  %v489_v62 = vpop.permute.xlu0 %488 }
  0xbc   : > { %v892_v46 = vsel %vm887_vm8, %v875_v44, %v569_v59  ;;  %v876_v51 = vsel %vm870_vm7, %v859_v42, %v489_v62 }
  0xbd   : > { %829 = vrot.lane.b32.xlu1 %v798_v53, %s2574_s10  ;;  %749 = vrot.lane.b32.xlu0 %v718_v54, %s2573_s7 }
  0xbf   : > { %v571_v12 = vpop.permute.xlu1 %570  ;;  %v812_v63 = vpop.permute.xlu0 %811 }
  0xc0   : > { %v942_v15 = vsel %vm938_vm11, %v925_v61, %v812_v63  ;;  %v893_v38 = vsel %vm887_vm8, %v876_v51, %v571_v12 }
  0xc1   : > { %588 = vrot.lane.b32.xlu1 %v557_v6, %s2571_s29  ;;  %508 = vrot.lane.b32.xlu0 %v477_v24, %s2569_s27 }
  0xc2   : > { %2451 = vmatmul.mubr.msk.f32.gmra.mxu1 %vm956_vm12, %v942_v15 }
  0xc3   : > { %v409_v18 = vpop.permute.xlu1 %408  ;;  %v651_v20 = vpop.permute.xlu0 %650 }
  0xc4   : > { %v909_v47 = vsel %vm904_vm9, %v892_v46, %v651_v20  ;;  %v860_v43 = vsel %vm853_vm6, %v2730_v5, %v409_v18 }
  0xc5   : > { %590 = vrot.lane.b32.xlu1 %v559_v10, %s2571_s29  ;;  %831 = vrot.lane.b32.xlu0 %v800_v1, %s2574_s10  ;;  %s2577_s29 = smov 96  }
  0xc7   : > { %v732_v27 = vpop.permute.xlu1 %731  ;;  %v653_v31 = vpop.permute.xlu0 %652 }
  0xc8   : > { %v926_v49 = vsel %vm921_vm10, %v909_v47, %v732_v27  ;;  %v910_v52 = vsel %vm904_vm9, %v893_v38, %v653_v31 }
  0xc9   : > { %672 = vrot.lane.b32.xlu1 %v641_v14, %s2572_s30  ;;  %670 = vrot.lane.b32.xlu0 %v639_v22, %s2572_s30  ;;  %s2578_s30 = smov 32  }
  0xcb   : > { %v491_v26 = vpop.permute.xlu1 %490  ;;  %v411_v41 = vpop.permute.xlu0 %410 }
  0xcc   : > { %v877_v2 = vsel %vm870_vm7, %v860_v43, %v491_v26  ;;  %v861_v63 = vsel %vm853_vm6, %v2758_v28, %v411_v41 }
  0xcd   : > { %753 = vrot.lane.b32.xlu1 %v722_v33, %s2573_s7  ;;  %751 = vrot.lane.b32.xlu0 %v720_v35, %s2573_s7 }
  0xcf   : > { %v814_v37 = vpop.permute.xlu1 %813  ;;  %v734_v21 = vpop.permute.xlu0 %733 }
  0xd0   : > { %v943_v9 = vsel %vm938_vm11, %v926_v49, %v814_v37  ;;  %v927_v53 = vsel %vm921_vm10, %v910_v52, %v734_v21 }
  0xd1   : > { %835 = vrot.lane.b32.xlu1 %v804_v48, %s2574_s10  ;;  %833 = vrot.lane.b32.xlu0 %v802_v34, %s2574_s10 }
  0xd2   : > { %2453 = vmatprep.mubr.msk.f32.mxu1 %vm956_vm12, %v943_v9 }
  0xd3   : > { %v573_v19 = vpop.permute.xlu1 %572  ;;  %v493_v50 = vpop.permute.xlu0 %492 }
  0xd4   : > { %v894_v3 = vsel %vm887_vm8, %v877_v2, %v573_v19  ;;  %v878_v10 = vsel %vm870_vm7, %v861_v63, %v493_v50 }
  0xd7   : > { %v575_v54 = vpop.permute.xlu1 %574  ;;  %v816_v55 = vpop.permute.xlu0 %815 }
  0xd8   : > { %v944_v56 = vsel %vm938_vm11, %v927_v53, %v816_v55  ;;  %v895_v1 = vsel %vm887_vm8, %v878_v10, %v575_v54 }
  0xd9   : > { %2454 = vmatmul.mubr.msk.f32.gmra.mxu1 %vm956_vm12, %v944_v56 }
  0xdb   : > { %v413_v57 = vpop.permute.xlu1 %412  ;;  %v655_v59 = vpop.permute.xlu0 %654 }
  0xdc   : > { %v911_v6 = vsel %vm904_vm9, %v894_v3, %v655_v59  ;;  %v862_v27 = vsel %vm853_vm6, %v2774_v40, %v413_v57 }
  0xdf   : > { %v736_v7 = vpop.permute.xlu1 %735  ;;  %v657_v58 = vpop.permute.xlu0 %656 }
  0xe0   : > { %v928_v24 = vsel %vm921_vm10, %v911_v6, %v736_v7  ;;  %v912_v17 = vsel %vm904_vm9, %v895_v1, %v657_v58 }
  0xe3   : > { %v495_v62 = vpop.permute.xlu1 %494  ;;  %v415_v0 = vpop.permute.xlu0 %414 }
  0xe4   : > { %v879_v35 = vsel %vm870_vm7, %v862_v27, %v495_v62  ;;  %v863_v46 = vsel %vm853_vm6, %v2802_v60, %v415_v0 }
  0xe7   : > { %v818_v8 = vpop.permute.xlu1 %817  ;;  %v738_v61 = vpop.permute.xlu0 %737 }
  0xe8   : > { %v945_v12 = vsel %vm938_vm11, %v928_v24, %v818_v8  ;;  %v929_v4 = vsel %vm921_vm10, %v912_v17, %v738_v61 }
  0xe9   : > { %2456 = vmatprep.mubr.msk.f32.mxu1 %vm956_vm12, %v945_v12 }
  0xeb   : > { %v577_v5 = vpop.permute.xlu1 %576  ;;  %v497_v15 = vpop.permute.xlu0 %496 }
  0xec   : > { %v896_v36 = vsel %vm887_vm8, %v879_v35, %v577_v5  ;;  %v880_v48 = vsel %vm870_vm7, %v863_v46, %v497_v15 }
  0xef   : > { %v579_v18 = vpop.permute.xlu1 %578  ;;  %v820_v20 = vpop.permute.xlu0 %819 }
  0xf0   : > { %v946_v14 = vsel %vm938_vm11, %v929_v4, %v820_v20  ;;  %v897_v34 = vsel %vm887_vm8, %v880_v48, %v579_v18 }
  0xf1   : > { %2457 = vmatmul.mubr.msk.f32.gmra.mxu1 %vm956_vm12, %v946_v14 }
  0xf3   : > { %v417_v22 = vpop.permute.xlu1 %416  ;;  %v659_v23 = vpop.permute.xlu0 %658 }
  0xf4   : > { %v913_v39 = vsel %vm904_vm9, %v896_v36, %v659_v23  ;;  %v864_v38 = vsel %vm853_vm6, %v2818_v11, %v417_v22 }
  0xf7   : > { %v740_v25 = vpop.permute.xlu1 %739  ;;  %v661_v28 = vpop.permute.xlu0 %660 }
  0xf8   : > { %v930_v29 = vsel %vm921_vm10, %v913_v39, %v740_v25  ;;  %v914_v49 = vsel %vm904_vm9, %v897_v34, %v661_v28 }
  0xfb   : > { %v499_v31 = vpop.permute.xlu1 %498  ;;  %v419_v33 = vpop.permute.xlu0 %418 }
  0xfc   : > { %v881_v54 = vsel %vm870_vm7, %v864_v38, %v499_v31  ;;  %v865_v43 = vsel %vm853_vm6, %v2846_v32, %v419_v33 }
  0xff   : > { %v822_v26 = vpop.permute.xlu1 %821  ;;  %v742_v41 = vpop.permute.xlu0 %741 }
 0x100   : > { %v947_v44 = vsel %vm938_vm11, %v930_v29, %v822_v26  ;;  %v931_v37 = vsel %vm921_vm10, %v914_v49, %v742_v41 }
 0x101   : > { %2459 = vmatprep.mubr.msk.f32.mxu1 %vm956_vm12, %v947_v44 }
 0x103   : > { %v581_v40 = vpop.permute.xlu1 %580  ;;  %v501_v47 = vpop.permute.xlu0 %500 }
 0x104   : > { %v898_v55 = vsel %vm887_vm8, %v881_v54, %v581_v40  ;;  %v882_v0 = vsel %vm870_vm7, %v865_v43, %v501_v47 }
 0x107   : > { %v583_v21 = vpop.permute.xlu1 %582  ;;  %v824_v9 = vpop.permute.xlu0 %823 }
 0x108   : > { %v948_v42 = vsel %vm938_vm11, %v931_v37, %v824_v9  ;;  %v899_v2 = vsel %vm887_vm8, %v882_v0, %v583_v21 }
 0x109   : > { %2460 = vmatmul.mubr.msk.f32.gmra.mxu1 %vm956_vm12, %v948_v42 }
 0x10b   : > { %v421_v19 = vpop.permute.xlu1 %420  ;;  %v663_v50 = vpop.permute.xlu0 %662 }
 0x10c   : > { %v915_v56 = vsel %vm904_vm9, %v898_v55, %v663_v50  ;;  %v866_v15 = vsel %vm853_vm6, %v2862_v45, %v421_v19 }
 0x10f   : > { %v744_v51 = vpop.permute.xlu1 %743  ;;  %v665_v60 = vpop.permute.xlu0 %664 }
 0x110   : > { %v932_v57 = vsel %vm921_vm10, %v915_v56, %v744_v51  ;;  %v916_v3 = vsel %vm904_vm9, %v899_v2, %v665_v60 }
 0x113   : > { %v503_v52 = vpop.permute.xlu1 %502  ;;  %v423_v53 = vpop.permute.xlu0 %422 }
 0x114   : > { %v883_v17 = vsel %vm870_vm7, %v866_v15, %v503_v52  ;;  %v867_v25 = vsel %vm853_vm6, %v2894_v13, %v423_v53 }
 0x117   : > { %v826_v59 = vpop.permute.xlu1 %825  ;;  %v746_v7 = vpop.permute.xlu0 %745 }
 0x118   : > { %v949_v58 = vsel %vm938_vm11, %v932_v57, %v826_v59  ;;  %v933_v6 = vsel %vm921_vm10, %v916_v3, %v746_v7 }
 0x119   : > { %2462 = vmatprep.mubr.msk.f32.mxu1 %vm956_vm12, %v949_v58 }
 0x11b   : > { %v585_v11 = vpop.permute.xlu1 %584  ;;  %v505_v62 = vpop.permute.xlu0 %504 }
 0x11c   : > { %v900_v4 = vsel %vm887_vm8, %v883_v17, %v585_v11  ;;  %v884_v27 = vsel %vm870_vm7, %v867_v25, %v505_v62 }
 0x11f   : > { %v587_v24 = vpop.permute.xlu1 %586  ;;  %v828_v8 = vpop.permute.xlu0 %827 }
 0x120   : > { %v950_v61 = vsel %vm938_vm11, %v933_v6, %v828_v8  ;;  %v901_v31 = vsel %vm887_vm8, %v884_v27, %v587_v24 }
 0x121   : > { %2463 = vmatmul.mubr.msk.f32.gmra.mxu1 %vm956_vm12, %v950_v61 }
 0x123   : > { %v425_v12 = vpop.permute.xlu1 %424  ;;  %v667_v63 = vpop.permute.xlu0 %666 }
 0x124   : > { %v917_v18 = vsel %vm904_vm9, %v900_v4, %v667_v63  ;;  %v868_v13 = vsel %vm853_vm6, %v2919_v30, %v425_v12  ;;  %v1645_v4 = vld [vmem:[%s3797_s2 + $0x68] sm:$0xff] }
 0x125   : > { %2471 = vmatprep.subr.mxu1 %v1645_v4 }
 0x126   : > { %2472 = vmatpush3.msra.mxu1 %v1645_v4 }
 0x127   : > { %v748_v5 = vpop.permute.xlu1 %747  ;;  %v669_v32 = vpop.permute.xlu0 %668 }
 0x128   : > { %v934_v20 = vsel %vm921_vm10, %v917_v18, %v748_v5  ;;  %v918_v33 = vsel %vm904_vm9, %v901_v31, %v669_v32  ;;  %v1644_v18 = vld [vmem:[%s3797_s2 + $0x60] sm:$0xff] }
 0x129   : > { %2473 = vmatprep.subr.mxu1 %v1644_v18 }
 0x12a   : > { %2474 = vmatpush3.msra.mxu1 %v1644_v18 }
 0x12b   : > { %v507_v10 = vpop.permute.xlu1 %506  ;;  %v427_v1 = vpop.permute.xlu0 %426 }
 0x12c   : > { %v869_v44 = vsel %vm853_vm6, %v2975_v16, %v427_v1  ;;  %v885_v47 = vsel %vm870_vm7, %v868_v13, %v507_v10 }
 0x12f   : > { %v830_v14 = vpop.permute.xlu1 %829  ;;  %v750_v22 = vpop.permute.xlu0 %749 }
 0x130   : > { %v951_v23 = vsel %vm938_vm11, %v934_v20, %v830_v14  ;;  %v935_v35 = vsel %vm921_vm10, %v918_v33, %v750_v22 }
 0x131   : > { %2465 = vmatprep.mubr.msk.f32.mxu1 %vm956_vm12, %v951_v23 }
 0x133   : > { %v589_v45 = vpop.permute.xlu1 %588  ;;  %v509_v28 = vpop.permute.xlu0 %508 }
 0x134   : > { %v886_v48 = vsel %vm870_vm7, %v869_v44, %v509_v28  ;;  %v902_v34 = vsel %vm887_vm8, %v885_v47, %v589_v45  ;;  %v1641_v44 = vld [vmem:[%s3797_s2 + $0x48] sm:$0xff]  ;;  %v1640_v47 = vld [vmem:[%s3797_s2 + $0x40] sm:$0xff] }
 0x137   : > { %v591_v36 = vpop.permute.xlu1 %590  ;;  %v832_v39 = vpop.permute.xlu0 %831 }
 0x138   : > { %v952_v29 = vsel %vm938_vm11, %v935_v35, %v832_v39  ;;  %v903_v49 = vsel %vm887_vm8, %v886_v48, %v591_v36  ;;  %v1643_v36 = vld [vmem:[%s3797_s2 + $0x58] sm:$0xff] }
 0x139   : > { %2466 = vmatmul.mubr.msk.f32.gmra.mxu1 %vm956_vm12, %v952_v29  ;;  %2475 = vmatprep.subr.mxu1 %v1643_v36 }
 0x13a   : > { %2476 = vmatpush3.msra.mxu1 %v1643_v36 }
 0x13b   : > { %v673_v26 = vpop.permute.xlu1 %672  ;;  %v671_v41 = vpop.permute.xlu0 %670 }
 0x13c   : > { %v920_v37 = vsel %vm904_vm9, %v903_v49, %v673_v26  ;;  %v919_v21 = vsel %vm904_vm9, %v902_v34, %v671_v41  ;;  %v1642_v26 = vld [vmem:[%s3797_s2 + $0x50] sm:$0xff]  ;;  %v1639_v34 = vld [vmem:[%s3797_s2 + $0x38] sm:$0xff] }
 0x13d   : > { %2477 = vmatprep.subr.mxu1 %v1642_v26 }
 0x13e   : > { %2478 = vmatpush3.msra.mxu1 %v1642_v26 }
 0x13f   : > { %v754_v46 = vpop.permute.xlu1 %753  ;;  %v752_v40 = vpop.permute.xlu0 %751  ;;  %2479 = vmatprep.subr.mxu1 %v1641_v44 }
 0x140   : > { %v937_v9 = vsel %vm921_vm10, %v920_v37, %v754_v46  ;;  %v936_v30 = vsel %vm921_vm10, %v919_v21, %v752_v40  ;;  %2480 = vmatpush3.msra.mxu1 %v1641_v44 }
 0x141   : > { %2481 = vmatprep.subr.mxu1 %v1640_v47 }
 0x142   : > { %2482 = vmatpush3.msra.mxu1 %v1640_v47 }
 0x143   : > { %v836_v42 = vpop.permute.xlu1 %835  ;;  %v834_v16 = vpop.permute.xlu0 %833  ;;  %2483 = vmatprep.subr.mxu1 %v1639_v34 }
 0x144   : > { %v954_v19 = vsel %vm938_vm11, %v937_v9, %v836_v42  ;;  %v953_v50 = vsel %vm938_vm11, %v936_v30, %v834_v16  ;;  %v1638_v30 = vld [vmem:[%s3797_s2 + $0x30] sm:$0xff]  ;;  %2484 = vmatpush3.msra.mxu1 %v1639_v34 }
 0x145   : > { %2468 = vmatprep.mubr.msk.f32.mxu1 %vm956_vm12, %v953_v50  ;;  %2485 = vmatprep.subr.mxu1 %v1638_v30 }
 0x146   : > { %2469 = vmatmul.mubr.msk.f32.gmra.mxu1 %vm956_vm12, %v954_v19  ;;  %v1637_v19 = vld [vmem:[%s3797_s2 + $0x28] sm:$0xff] }
 0x147   : > { %2486 = vmatpush3.msra.mxu1 %v1638_v30 }
 0x148   : > { %2487 = vmatprep.subr.mxu1 %v1637_v19 }
 0x149   : > { %2488 = vmatpush3.msra.mxu1 %v1637_v19 }
 0x16a   : > { %v2449_v51 = vpop.f32.mrf.mxu1 }
 0x16b   : > { %vm1154_vm13 = vcmp.gt.f32.partialorder %v2449_v51, 0.0  ;;  %v1170_v60 = vmul.f32 0.2, %v2449_v51 }
 0x16c   : > { %v1074_v38 = vpop.f32.mrf.mxu1 }
 0x16d   : > { %v1186_v52 = vsel %vm1154_vm13, %v2449_v51, %v1170_v60  ;;  %vm1153_vm15 = vcmp.gt.f32.partialorder %v1074_v38, 0.0  ;;  %v1169_v53 = vmul.f32 0.2, %v1074_v38  ;;  %v1636_v60 = vld [vmem:[%s3797_s2 + $0x20] sm:$0xff] }
 0x16e   : > { %1203 = vst.msk [vmem:[#allocation2 + $0x8] sm:$0xff] %vm1201_vm14, %v1186_v52  ;;  %v1635_v52 = vld [vmem:[%s3797_s2 + $0x18] sm:$0xff]  ;;  %2489 = vmatprep.subr.mxu1 %v1636_v60 }
 0x16f   : > { %v1185_v54 = vsel %vm1153_vm15, %v1074_v38, %v1169_v53  ;;  %2490 = vmatpush3.msra.mxu1 %v1636_v60 }
 0x170   : > { %1202 = vst.msk [vmem:[#allocation2] sm:$0xff] %vm1201_vm14, %v1185_v54  ;;  %2491 = vmatprep.subr.mxu1 %v1635_v52 }
 0x171   : > { %2492 = vmatpush3.msra.mxu1 %v1635_v52 }
 0x177   : > { %v1218_v55 = vld [vmem:[#allocation2] ss:$2 sm:$0xff]  ;;  %v1234_v56 = vld [vmem:[#allocation2 + $0x1] ss:$2 sm:$0xff] }
 0x178   : > { %v1249_v57 = vadd.f32 %v1234_v56, %v1218_v55  ;;  %v1634_v55 = vld [vmem:[%s3797_s2 + $0x10] sm:$0xff] }
 0x179   : > { %2493 = vmatprep.subr.mxu1 %v1634_v55 }
 0x17a   : > { %v1257_v59 = vmul.f32 0.5, %v1249_v57  ;;  %2494 = vmatpush3.msra.mxu1 %v1634_v55 }
 0x17c   : > { %vm1265_vm6 = vcmp.gt.f32.partialorder %v1257_v59, 0.0  ;;  %v1273_v7 = vmul.f32 0.2, %v1257_v59 }
 0x17e   : > { %v1281_v58 = vsel %vm1265_vm6, %v1257_v59, %v1273_v7 }
 0x17f   : > { %1289 = vst.msk [vmem:[%s3179_s14] sm:$0xff] %vm1201_vm14, %v1281_v58  ;;  %v1305_v12 = vrot.slane %v1281_v58, 5  ;;  %v1633_v58 = vld [vmem:[%s3797_s2 + $0x8] sm:$0xff] }
 0x180   : > { %2495 = vmatprep.subr.mxu1 %v1633_v58 }
 0x181   : > { %v3188_v32 = vsel %vm309_vm0, 0.0, %v1305_v12  ;;  %2496 = vmatpush3.msra.mxu1 %v1633_v58 }
 0x182   : > { %v2452_v43 = vpop.f32.mrf.mxu1  ;;  %v1497_v17 = vrot.slane %v3188_v32, 5  ;;  %v1333_v25 = vrot.slane %v3188_v32, 1  ;;  %v1538_v29 = vrot.slane %v3188_v32, 6  ;;  %v1374_v41 = vrot.slane %v3188_v32, 2 }
 0x183   : > { %vm1156_vm7 = vcmp.gt.f32.partialorder %v2452_v43, 0.0  ;;  %v1172_v11 = vmul.f32 0.2, %v2452_v43  ;;  %v1415_v48 = vrot.slane %v3188_v32, 3  ;;  %v1456_v42 = vrot.slane %v3188_v32, 4 }
 0x184   : > { %v1084_v62 = vpop.f32.mrf.mxu1 }
 0x185   : > { %v1188_v0 = vsel %vm1156_vm7, %v2452_v43, %v1172_v11  ;;  %vm1155_vm8 = vcmp.gt.f32.partialorder %v1084_v62, 0.0  ;;  %v1171_v2 = vmul.f32 0.2, %v1084_v62 }
 0x186   : > { %1205 = vst.msk [vmem:[#allocation2 + $0x18] sm:$0xff] %vm1201_vm14, %v1188_v0 }
 0x187   : > { %v1187_v3 = vsel %vm1155_vm8, %v1084_v62, %v1171_v2 }
 0x188   : > { %1204 = vst.msk [vmem:[#allocation2 + $0x10] sm:$0xff] %vm1201_vm14, %v1187_v3 }
 0x18f   : > { %v1220_v6 = vld [vmem:[#allocation2 + $0x10] ss:$2 sm:$0xff]  ;;  %v1236_v24 = vld [vmem:[#allocation2 + $0x11] ss:$2 sm:$0xff] }
 0x190   : > { %v1250_v8 = vadd.f32 %v1236_v24, %v1220_v6  ;;  %v1632_v6 = vld [vmem:[%s3797_s2] sm:$0xff] }
 0x191   : > { %2497 = vmatprep.subr.mxu1 %v1632_v6 }
 0x192   : > { %v1258_v61 = vmul.f32 0.5, %v1250_v8  ;;  %2498 = vmatpush3.msra.mxu1 %v1632_v6 }
 0x194   : > { %vm1266_vm9 = vcmp.gt.f32.partialorder %v1258_v61, 0.0  ;;  %v1274_v63 = vmul.f32 0.2, %v1258_v61 }
 0x196   : > { %v3185_v5 = vsel %vm1266_vm9, %v1258_v61, %v1274_v63 }
 0x197   : > { %v1306_v15 = vrot.slane %v3185_v5, 5  ;;  %1290 = vst.msk [vmem:[%s3179_s14 + $0x8] sm:$0xff] %vm1201_vm14, %v3185_v5 }
 0x199   : > { %v2455_v10 = vpop.f32.mrf.mxu1  ;;  %v3197_v1 = vsel %vm309_vm0, %v1305_v12, %v1306_v15 }
 0x19a   : > { %vm1158_vm10 = vcmp.gt.f32.partialorder %v2455_v10, 0.0  ;;  %v1174_v20 = vmul.f32 0.2, %v2455_v10  ;;  %v1498_v14 = vrot.slane %v3197_v1, 5  ;;  %v1334_v22 = vrot.slane %v3197_v1, 1 }
 0x19b   : > { %v1094_v23 = vpop.f32.mrf.mxu1  ;;  %v1539_v45 = vrot.slane %v3197_v1, 6  ;;  %v1375_v35 = vrot.slane %v3197_v1, 2  ;;  %v1416_v40 = vrot.slane %v3197_v1, 3  ;;  %v1457_v37 = vrot.slane %v3197_v1, 4 }
 0x19c   : > { %v1190_v28 = vsel %vm1158_vm10, %v2455_v10, %v1174_v20  ;;  %vm1157_vm11 = vcmp.gt.f32.partialorder %v1094_v23, 0.0  ;;  %v1173_v27 = vmul.f32 0.2, %v1094_v23  ;;  %v1499_v31 = vsel %vm309_vm0, %v1497_v17, %v1498_v14 }
 0x19d   : > { %1207 = vst.msk [vmem:[#allocation2 + $0x28] sm:$0xff] %vm1201_vm14, %v1190_v28  ;;  %1514 = vrot.lane.b32.xlu1 %v1499_v31, %s2575_s19  ;;  %v1335_v33 = vsel %vm362_vm2, %v1333_v25, %v1334_v22  ;;  %v1540_v13 = vsel %vm771_vm5, %v1538_v29, %v1539_v45  ;;  %v1376_v46 = vsel %vm444_vm1, %v1374_v41, %v1375_v35 }
 0x19e   : > { %v1189_v39 = vsel %vm1157_vm11, %v1094_v23, %v1173_v27  ;;  %1350 = vrot.lane.b32.xlu0 %v1335_v33, %s2576_s24  ;;  %v1417_v49 = vsel %vm526_vm3, %v1415_v48, %v1416_v40  ;;  %v1458_v50 = vsel %vm608_vm4, %v1456_v42, %v1457_v37 }
 0x19f   : > { %1206 = vst.msk [vmem:[#allocation2 + $0x20] sm:$0xff] %vm1201_vm14, %v1189_v39 }
 0x1a1   : > { %1555 = vrot.lane.b32.xlu1 %v1540_v13, %s2577_s29 }
 0x1a2   : > { %1391 = vrot.lane.b32.xlu0 %v1376_v46, %s2578_s30 }
 0x1a6   : > { %1432 = vrot.lane.b32.xlu0 %v1417_v49, %s2579_s11  ;;  %v1222_v21 = vld [vmem:[#allocation2 + $0x20] ss:$2 sm:$0xff]  ;;  %v1238_v9 = vld [vmem:[#allocation2 + $0x21] ss:$2 sm:$0xff] }
 0x1a7   : > { %v1251_v16 = vadd.f32 %v1238_v9, %v1222_v21 }
 0x1a9   : > { %v1259_v51 = vmul.f32 0.5, %v1251_v16 }
 0x1aa   : > { %1473 = vrot.lane.b32.xlu0 %v1458_v50, %s2580_s17 }
 0x1ab   : > { %vm1267_vm12 = vcmp.gt.f32.partialorder %v1259_v51, 0.0  ;;  %v1275_v38 = vmul.f32 0.2, %v1259_v51 }
 0x1ad   : > { %v1283_v53 = vsel %vm1267_vm12, %v1259_v51, %v1275_v38 }
 0x1ae   : > { %v1308_v54 = vrot.slane %v1283_v53, 5  ;;  %1291 = vst.msk [vmem:[%s3179_s14 + $0x10] sm:$0xff] %vm1201_vm14, %v1283_v53 }
 0x1b0   : > { %v3276_v56 = vsel %vm309_vm0, %v1306_v15, %v1308_v54 }
 0x1b1   : > { %v2458_v57 = vpop.f32.mrf.mxu1  ;;  %v1459_v59 = vrot.slane %v3276_v56, 4  ;;  %v1336_v7 = vrot.slane %v3276_v56, 1  ;;  %v1500_v2 = vrot.slane %v3276_v56, 5  ;;  %v1377_v3 = vrot.slane %v3276_v56, 2 }
 0x1b2   : > { %vm1160_vm13 = vcmp.gt.f32.partialorder %v2458_v57, 0.0  ;;  %v1176_v43 = vmul.f32 0.2, %v2458_v57  ;;  %v1541_v5 = vrot.slane %v3276_v56, 6  ;;  %v1418_v15 = vrot.slane %v3276_v56, 3 }
 0x1b3   : > { %v1104_v11 = vpop.f32.mrf.mxu1  ;;  %v1460_v62 = vsel %vm608_vm4, %v1457_v37, %v1459_v59  ;;  %v1337_v0 = vsel %vm362_vm2, %v1334_v22, %v1336_v7  ;;  %v1501_v12 = vsel %vm309_vm0, %v1498_v14, %v1500_v2  ;;  %v1378_v63 = vsel %vm444_vm1, %v1375_v35, %v1377_v3 }
 0x1b4   : > { %v1192_v24 = vsel %vm1160_vm13, %v2458_v57, %v1176_v43  ;;  %vm1159_vm15 = vcmp.gt.f32.partialorder %v1104_v11, 0.0  ;;  %v1175_v8 = vmul.f32 0.2, %v1104_v11  ;;  %1475 = vrot.lane.b32.xlu0 %v1460_v62, %s2580_s17  ;;  %1352 = vrot.lane.b32.xlu1 %v1337_v0, %s2576_s24  ;;  %v1542_v10 = vsel %vm771_vm5, %v1539_v45, %v1541_v5 }
 0x1b5   : > { %1209 = vst.msk [vmem:[#allocation2 + $0x38] sm:$0xff] %vm1201_vm14, %v1192_v24  ;;  %v1419_v17 = vsel %vm526_vm3, %v1416_v40, %v1418_v15 }
 0x1b6   : > { %v1191_v61 = vsel %vm1159_vm15, %v1104_v11, %v1175_v8 }
 0x1b7   : > { %1208 = vst.msk [vmem:[#allocation2 + $0x30] sm:$0xff] %vm1201_vm14, %v1191_v61 }
 0x1b8   : > { %1516 = vrot.lane.b32.xlu0 %v1501_v12, %s2575_s19  ;;  %1393 = vrot.lane.b32.xlu1 %v1378_v63, %s2578_s30 }
 0x1bc   : > { %1557 = vrot.lane.b32.xlu0 %v1542_v10, %s2577_s29  ;;  %1434 = vrot.lane.b32.xlu1 %v1419_v17, %s2579_s11 }
 0x1be   : > { %v1224_v4 = vld [vmem:[#allocation2 + $0x30] ss:$2 sm:$0xff]  ;;  %v1240_v18 = vld [vmem:[#allocation2 + $0x31] ss:$2 sm:$0xff] }
 0x1bf   : > { %v1252_v20 = vadd.f32 %v1240_v18, %v1224_v4 }
 0x1c1   : > { %v1260_v14 = vmul.f32 0.5, %v1252_v20 }
 0x1c3   : > { %vm1268_vm6 = vcmp.gt.f32.partialorder %v1260_v14, 0.0  ;;  %v1276_v22 = vmul.f32 0.2, %v1260_v14 }
 0x1c5   : > { %v1284_v23 = vsel %vm1268_vm6, %v1260_v14, %v1276_v22 }
 0x1c6   : > { %v1310_v25 = vrot.slane %v1284_v23, 5  ;;  %1292 = vst.msk [vmem:[%s3179_s14 + $0x18] sm:$0xff] %vm1201_vm14, %v1284_v23 }
 0x1c8   : > { %v3317_v45 = vsel %vm309_vm0, %v1308_v54, %v1310_v25 }
 0x1c9   : > { %v2461_v28 = vpop.f32.mrf.mxu1  ;;  %v1461_v27 = vrot.slane %v3317_v45, 4  ;;  %v1338_v31 = vrot.slane %v3317_v45, 1  ;;  %v1379_v29 = vrot.slane %v3317_v45, 2  ;;  %v1420_v46 = vrot.slane %v3317_v45, 3 }
 0x1ca   : > { %vm1162_vm7 = vcmp.gt.f32.partialorder %v2461_v28, 0.0  ;;  %v1178_v33 = vmul.f32 0.2, %v2461_v28  ;;  %v1502_v47 = vrot.slane %v3317_v45, 5  ;;  %v1543_v37 = vrot.slane %v3317_v45, 6 }
 0x1cb   : > { %v1114_v35 = vpop.f32.mrf.mxu1  ;;  %v1462_v36 = vsel %vm608_vm4, %v1459_v59, %v1461_v27  ;;  %v1339_v39 = vsel %vm362_vm2, %v1336_v7, %v1338_v31  ;;  %v1380_v44 = vsel %vm444_vm1, %v1377_v3, %v1379_v29  ;;  %v1421_v40 = vsel %vm526_vm3, %v1418_v15, %v1420_v46 }
 0x1cc   : > { %v1194_v26 = vsel %vm1162_vm7, %v2461_v28, %v1178_v33  ;;  %vm1161_vm8 = vcmp.gt.f32.partialorder %v1114_v35, 0.0  ;;  %v1177_v41 = vmul.f32 0.2, %v1114_v35  ;;  %1477 = vrot.lane.b32.xlu0 %v1462_v36, %s2580_s17  ;;  %1354 = vrot.lane.b32.xlu1 %v1339_v39, %s2576_s24  ;;  %v1503_v49 = vsel %vm309_vm0, %v1500_v2, %v1502_v47 }
 0x1cd   : > { %1211 = vst.msk [vmem:[#allocation2 + $0x48] sm:$0xff] %vm1201_vm14, %v1194_v26  ;;  %v1544_v30 = vsel %vm771_vm5, %v1541_v5, %v1543_v37 }
 0x1ce   : > { %v1193_v13 = vsel %vm1161_vm8, %v1114_v35, %v1177_v41 }
 0x1cf   : > { %1210 = vst.msk [vmem:[#allocation2 + $0x40] sm:$0xff] %vm1201_vm14, %v1193_v13 }
 0x1d0   : > { %1395 = vrot.lane.b32.xlu1 %v1380_v44, %s2578_s30 }
 0x1d4   : > { %1436 = vrot.lane.b32.xlu1 %v1421_v40, %s2579_s11 }
 0x1d6   : > { %v1226_v48 = vld [vmem:[#allocation2 + $0x40] ss:$2 sm:$0xff]  ;;  %v1242_v34 = vld [vmem:[#allocation2 + $0x41] ss:$2 sm:$0xff] }
 0x1d7   : > { %v1253_v21 = vadd.f32 %v1242_v34, %v1226_v48 }
 0x1d8   : > { %1518 = vrot.lane.b32.xlu1 %v1503_v49, %s2575_s19 }
 0x1d9   : > { %v1261_v9 = vmul.f32 0.5, %v1253_v21 }
 0x1db   : > { %vm1269_vm9 = vcmp.gt.f32.partialorder %v1261_v9, 0.0  ;;  %v1277_v42 = vmul.f32 0.2, %v1261_v9 }
 0x1dc   : > { %1559 = vrot.lane.b32.xlu1 %v1544_v30, %s2577_s29 }
 0x1dd   : > { %v1285_v16 = vsel %vm1269_vm9, %v1261_v9, %v1277_v42  ;;  %vm1587_vm9 = vcmask 261120  }
 0x1de   : > { %v1312_v19 = vrot.slane %v1285_v16, 5  ;;  %1293 = vst.msk [vmem:[%s3179_s14 + $0x20] sm:$0xff] %vm1201_vm14, %v1285_v16 }
 0x1e0   : > { %v3342_v50 = vsel %vm309_vm0, %v1310_v25, %v1312_v19 }
 0x1e1   : > { %v2464_v51 = vpop.f32.mrf.mxu1  ;;  %v1422_v60 = vrot.slane %v3342_v50, 3  ;;  %v1340_v38 = vrot.slane %v3342_v50, 1  ;;  %v1381_v57 = vrot.slane %v3342_v50, 2  ;;  %v1463_v11 = vrot.slane %v3342_v50, 4 }
 0x1e2   : > { %vm1164_vm10 = vcmp.gt.f32.partialorder %v2464_v51, 0.0  ;;  %v1180_v52 = vmul.f32 0.2, %v2464_v51  ;;  %v1504_v0 = vrot.slane %v3342_v50, 5  ;;  %v1545_v24 = vrot.slane %v3342_v50, 6 }
 0x1e3   : > { %v1124_v53 = vpop.f32.mrf.mxu1  ;;  %v1423_v54 = vsel %vm526_vm3, %v1420_v46, %v1422_v60  ;;  %v1341_v55 = vsel %vm362_vm2, %v1338_v31, %v1340_v38  ;;  %v1382_v43 = vsel %vm444_vm1, %v1379_v29, %v1381_v57  ;;  %v1464_v62 = vsel %vm608_vm4, %v1461_v27, %v1463_v11 }
 0x1e4   : > { %v1196_v59 = vsel %vm1164_vm10, %v2464_v51, %v1180_v52  ;;  %vm1163_vm11 = vcmp.gt.f32.partialorder %v1124_v53, 0.0  ;;  %v1179_v7 = vmul.f32 0.2, %v1124_v53  ;;  %1438 = vrot.lane.b32.xlu1 %v1423_v54, %s2579_s11  ;;  %1356 = vrot.lane.b32.xlu0 %v1341_v55, %s2576_s24  ;;  %v1505_v6 = vsel %vm309_vm0, %v1502_v47, %v1504_v0 }
 0x1e5   : > { %1213 = vst.msk [vmem:[#allocation2 + $0x58] sm:$0xff] %vm1201_vm14, %v1196_v59  ;;  %v1546_v12 = vsel %vm771_vm5, %v1543_v37, %v1545_v24 }
 0x1e6   : > { %v1195_v58 = vsel %vm1163_vm11, %v1124_v53, %v1179_v7  ;;  %vm1596_vm11 = vcmask 392192  }
 0x1e7   : > { %1212 = vst.msk [vmem:[#allocation2 + $0x50] sm:$0xff] %vm1201_vm14, %v1195_v58 }
 0x1e8   : > { %1397 = vrot.lane.b32.xlu0 %v1382_v43, %s2578_s30 }
 0x1ec   : > { %1479 = vrot.lane.b32.xlu0 %v1464_v62, %s2580_s17 }
 0x1ee   : > { %v1228_v2 = vld [vmem:[#allocation2 + $0x50] ss:$2 sm:$0xff]  ;;  %v1244_v3 = vld [vmem:[#allocation2 + $0x51] ss:$2 sm:$0xff] }
 0x1ef   : > { %v1254_v8 = vadd.f32 %v1244_v3, %v1228_v2 }
 0x1f0   : > { %1520 = vrot.lane.b32.xlu0 %v1505_v6, %s2575_s19 }
 0x1f1   : > { %v1262_v61 = vmul.f32 0.5, %v1254_v8 }
 0x1f3   : > { %vm1270_vm12 = vcmp.gt.f32.partialorder %v1262_v61, 0.0  ;;  %v1278_v63 = vmul.f32 0.2, %v1262_v61 }
 0x1f4   : > { %1561 = vrot.lane.b32.xlu0 %v1546_v12, %s2577_s29 }
 0x1f5   : > { %v1286_v5 = vsel %vm1270_vm12, %v1262_v61, %v1278_v63  ;;  %vm1605_vm12 = vcmask 523264  }
 0x1f6   : > { %v1314_v15 = vrot.slane %v1286_v5, 5  ;;  %1294 = vst.msk [vmem:[%s3179_s14 + $0x28] sm:$0xff] %vm1201_vm14, %v1286_v5 }
 0x1f8   : > { %v3367_v10 = vsel %vm309_vm0, %v1312_v19, %v1314_v15 }
 0x1f9   : > { %v2467_v17 = vpop.f32.mrf.mxu1  ;;  %v1465_v4 = vrot.slane %v3367_v10, 4  ;;  %v1342_v18 = vrot.slane %v3367_v10, 1  ;;  %v1383_v25 = vrot.slane %v3367_v10, 2  ;;  %v1424_v35 = vrot.slane %v3367_v10, 3 }
 0x1fa   : > { %vm1166_vm13 = vcmp.gt.f32.partialorder %v2467_v17, 0.0  ;;  %v1182_v20 = vmul.f32 0.2, %v2467_v17  ;;  %v1506_v39 = vrot.slane %v3367_v10, 5  ;;  %v1547_v26 = vrot.slane %v3367_v10, 6 }
 0x1fb   : > { %v1134_v14 = vpop.f32.mrf.mxu1  ;;  %v1466_v22 = vsel %vm608_vm4, %v1463_v11, %v1465_v4  ;;  %v1343_v23 = vsel %vm362_vm2, %v1340_v38, %v1342_v18  ;;  %v1384_v33 = vsel %vm444_vm1, %v1381_v57, %v1383_v25  ;;  %v1425_v36 = vsel %vm526_vm3, %v1422_v60, %v1424_v35 }
 0x1fc   : > { %v1198_v28 = vsel %vm1166_vm13, %v2467_v17, %v1182_v20  ;;  %vm1165_vm15 = vcmp.gt.f32.partialorder %v1134_v14, 0.0  ;;  %v1181_v27 = vmul.f32 0.2, %v1134_v14  ;;  %1481 = vrot.lane.b32.xlu0 %v1466_v22, %s2580_s17  ;;  %1358 = vrot.lane.b32.xlu1 %v1343_v23, %s2576_s24  ;;  %v1507_v46 = vsel %vm309_vm0, %v1504_v0, %v1506_v39 }
 0x1fd   : > { %1215 = vst.msk [vmem:[#allocation2 + $0x68] sm:$0xff] %vm1201_vm14, %v1198_v28  ;;  %v1548_v21 = vsel %vm771_vm5, %v1545_v24, %v1547_v26  ;;  %vm1614_vm13 = vcmask 654336  }
 0x1fe   : > { %v1197_v31 = vsel %vm1165_vm15, %v1134_v14, %v1181_v27  ;;  %vm1623_vm15 = vcmask 785408  }
 0x1ff   : > { %1214 = vst.msk [vmem:[#allocation2 + $0x60] sm:$0xff] %vm1201_vm14, %v1197_v31 }
 0x200   : > { %1399 = vrot.lane.b32.xlu1 %v1384_v33, %s2578_s30 }
 0x204   : > { %1440 = vrot.lane.b32.xlu1 %v1425_v36, %s2579_s11 }
 0x206   : > { %v2470_v29 = vpop.f32.mrf.mxu1  ;;  %v1230_v41 = vld [vmem:[#allocation2 + $0x60] ss:$2 sm:$0xff]  ;;  %v1246_v13 = vld [vmem:[#allocation2 + $0x61] ss:$2 sm:$0xff] }
 0x207   : > { %vm1168_vm6 = vcmp.gt.f32.partialorder %v2470_v29, 0.0  ;;  %v1184_v44 = vmul.f32 0.2, %v2470_v29  ;;  %v1255_v40 = vadd.f32 %v1246_v13, %v1230_v41 }
 0x208   : > { %1522 = vrot.lane.b32.xlu1 %v1507_v46, %s2575_s19  ;;  %v1144_v47 = vpop.f32.mrf.mxu1 }
 0x209   : > { %v1200_v48 = vsel %vm1168_vm6, %v2470_v29, %v1184_v44  ;;  %vm1167_vm7 = vcmp.gt.f32.partialorder %v1144_v47, 0.0  ;;  %v1183_v34 = vmul.f32 0.2, %v1144_v47  ;;  %v1263_v49 = vmul.f32 0.5, %v1255_v40 }
 0x20a   : > { %1217 = vst.msk [vmem:[#allocation2 + $0x78] sm:$0xff] %vm1201_vm14, %v1200_v48  ;;  %vm1646_vm6 = vcmask 916480  }
 0x20b   : > { %v1199_v37 = vsel %vm1167_vm7, %v1144_v47, %v1183_v34  ;;  %vm1271_vm8 = vcmp.gt.f32.partialorder %v1263_v49, 0.0  ;;  %v1279_v9 = vmul.f32 0.2, %v1263_v49 }
 0x20c   : > { %1216 = vst.msk [vmem:[#allocation2 + $0x70] sm:$0xff] %vm1201_vm14, %v1199_v37  ;;  %1563 = vrot.lane.b32.xlu1 %v1548_v21, %s2577_s29 }
 0x20d   : > { %v1287_v30 = vsel %vm1271_vm8, %v1263_v49, %v1279_v9 }
 0x20e   : > { %v1316_v42 = vrot.slane %v1287_v30, 5  ;;  %1295 = vst.msk [vmem:[%s3179_s14 + $0x30] sm:$0xff] %vm1201_vm14, %v1287_v30 }
 0x20f   : > { %v1515_v11 = vpop.permute.xlu1 %1514 }
 0x210   : > { %v1351_v16 = vpop.permute.xlu0 %1350  ;;  %v3400_v19 = vsel %vm309_vm0, %v1314_v15, %v1316_v42 }
 0x211   : > { %v1426_v51 = vrot.slane %v3400_v19, 3  ;;  %v1344_v60 = vrot.slane %v3400_v19, 1  ;;  %v1385_v53 = vrot.slane %v3400_v19, 2  ;;  %v1467_v43 = vrot.slane %v3400_v19, 4 }
 0x212   : > { %v1579_v2 = vsel %vm1201_vm14, %v3188_v32, %v1351_v16  ;;  %v1508_v8 = vrot.slane %v3400_v19, 5  ;;  %v1549_v14 = vrot.slane %v3400_v19, 6 }
 0x213   : > { %v1427_v38 = vsel %vm526_vm3, %v1424_v35, %v1426_v51  ;;  %v1345_v52 = vsel %vm362_vm2, %v1342_v18, %v1344_v60  ;;  %v1232_v54 = vld [vmem:[#allocation2 + $0x70] ss:$2 sm:$0xff]  ;;  %v1248_v55 = vld [vmem:[#allocation2 + $0x71] ss:$2 sm:$0xff]  ;;  %v1386_v58 = vsel %vm444_vm1, %v1383_v25, %v1385_v53  ;;  %v1468_v24 = vsel %vm608_vm4, %v1465_v4, %v1467_v43  ;;  %v1556_v15 = vpop.permute.xlu1 %1555 }
 0x214   : > { %v1392_v57 = vpop.permute.xlu0 %1391  ;;  %1442 = vrot.lane.b32.xlu1 %v1427_v38, %s2579_s11  ;;  %1360 = vrot.lane.b32.xlu0 %v1345_v52, %s2576_s24  ;;  %v1256_v59 = vadd.f32 %v1248_v55, %v1232_v54  ;;  %v1509_v20 = vsel %vm309_vm0, %v1506_v39, %v1508_v8  ;;  %v1550_v28 = vsel %vm771_vm5, %v1547_v26, %v1549_v14 }
 0x215   : > { %v1588_v6 = vsel %vm1587_vm9, %v1579_v2, %v1392_v57 }
 0x216   : > { %v1264_v7 = vmul.f32 0.5, %v1256_v59 }
 0x218   : > { %v1433_v62 = vpop.permute.xlu0 %1432  ;;  %1401 = vrot.lane.b32.xlu0 %v1386_v58, %s2578_s30  ;;  %vm1272_vm10 = vcmp.gt.f32.partialorder %v1264_v7, 0.0  ;;  %v1280_v0 = vmul.f32 0.2, %v1264_v7 }
 0x219   : > { %v1597_v12 = vsel %vm1596_vm11, %v1588_v6, %v1433_v62 }
 0x21a   : > { %v1288_v3 = vsel %vm1272_vm10, %v1264_v7, %v1280_v0 }
 0x21b   : > { %v1318_v61 = vrot.slane %v1288_v3, 5  ;;  %1296 = vst.msk [vmem:[%s3179_s14 + $0x38] sm:$0xff] %vm1201_vm14, %v1288_v3 }
 0x21c   : > { %v1474_v63 = vpop.permute.xlu0 %1473  ;;  %1483 = vrot.lane.b32.xlu0 %v1468_v24, %s2580_s17 }
 0x21d   : > { %v1606_v32 = vsel %vm1605_vm12, %v1597_v12, %v1474_v63  ;;  %v3427_v5 = vsel %vm309_vm0, %v1316_v42, %v1318_v61  ;;  %v1330_v25 = vsel %vm309_vm0, %v1318_v61, 0.0 }
 0x21e   : > { %v1615_v17 = vsel %vm1614_vm13, %v1606_v32, %v1515_v11  ;;  %v1346_v4 = vrot.slane %v3427_v5, 1  ;;  %v1387_v23 = vrot.slane %v3427_v5, 2  ;;  %v1348_v27 = vrot.slane %v1330_v25, 1 }
 0x21f   : > { %v1624_v18 = vsel %vm1623_vm15, %v1615_v17, %v1556_v15  ;;  %v1428_v33 = vrot.slane %v3427_v5, 3  ;;  %v1389_v29 = vrot.slane %v1330_v25, 2  ;;  %v1430_v13 = vrot.slane %v1330_v25, 3 }
 0x220   : > { %2499 = vmatprep.mubr.msk.f32.mxu1 %vm1646_vm6, %v1624_v18  ;;  %1524 = vrot.lane.b32.xlu0 %v1509_v20, %s2575_s19  ;;  %v1347_v22 = vsel %vm362_vm2, %v1344_v60, %v1346_v4  ;;  %v1388_v31 = vsel %vm444_vm1, %v1385_v53, %v1387_v23  ;;  %v1349_v39 = vsel %vm362_vm2, %v1346_v4, %v1348_v27  ;;  %v1469_v40 = vrot.slane %v3427_v5, 4 }
 0x221   : > { %1362 = vrot.lane.b32.xlu1 %v1347_v22, %s2576_s24  ;;  %v1429_v41 = vsel %vm526_vm3, %v1426_v51, %v1428_v33  ;;  %v1390_v46 = vsel %vm444_vm1, %v1387_v23, %v1389_v29  ;;  %v1431_v47 = vsel %vm526_vm3, %v1428_v33, %v1430_v13  ;;  %v1471_v48 = vrot.slane %v1330_v25, 4 }
 0x222   : > { %v1470_v9 = vsel %vm608_vm4, %v1467_v43, %v1469_v40  ;;  %v1510_v30 = vrot.slane %v3427_v5, 5  ;;  %v1551_v53 = vrot.slane %v3427_v5, 6  ;;  %v1553_v55 = vrot.slane %v1330_v25, 6 }
 0x223   : > { %v1472_v16 = vsel %vm608_vm4, %v1469_v40, %v1471_v48 }
 0x224   : > { %1565 = vrot.lane.b32.xlu0 %v1550_v28, %s2577_s29  ;;  %v1511_v52 = vsel %vm309_vm0, %v1508_v8, %v1510_v30  ;;  %v1552_v57 = vsel %vm771_vm5, %v1549_v14, %v1551_v53  ;;  %v1554_v59 = vsel %vm771_vm5, %v1551_v53, %v1553_v55 }
 0x225   : > { %1403 = vrot.lane.b32.xlu1 %v1388_v31, %s2578_s30 }
 0x226   : > { %v1353_v35 = vpop.permute.xlu1 %1352  ;;  %v1476_v36 = vpop.permute.xlu0 %1475 }
 0x227   : > { %v1580_v34 = vsel %vm1201_vm14, %v3197_v1, %v1353_v35  ;;  %v1512_v1 = vrot.slane %v1330_v25, 5 }
 0x228   : > { %1364 = vrot.lane.b32.xlu0 %v1349_v39, %s2576_s24 }
 0x229   : > { %1444 = vrot.lane.b32.xlu1 %v1429_v41, %s2579_s11  ;;  %v1513_v54 = vsel %vm309_vm0, %v1510_v30, %v1512_v1 }
 0x22a   : > { %v1394_v26 = vpop.permute.xlu1 %1393  ;;  %v1517_v44 = vpop.permute.xlu0 %1516 }
 0x22b   : > { %v1589_v49 = vsel %vm1587_vm9, %v1580_v34, %v1394_v26 }
 0x22c   : > { %1405 = vrot.lane.b32.xlu0 %v1390_v46, %s2578_s30 }
 0x22d   : > { %1446 = vrot.lane.b32.xlu1 %v1431_v47, %s2579_s11 }
 0x22e   : > { %v1435_v37 = vpop.permute.xlu1 %1434  ;;  %v1558_v60 = vpop.permute.xlu0 %1557 }
 0x22f   : > { %v1598_v21 = vsel %vm1596_vm11, %v1589_v49, %v1435_v37 }
 0x230   : > { %v1607_v42 = vsel %vm1605_vm12, %v1598_v21, %v1476_v36  ;;  %1485 = vrot.lane.b32.xlu0 %v1470_v9, %s2580_s17 }
 0x231   : > { %v1616_v51 = vsel %vm1614_vm13, %v1607_v42, %v1517_v44  ;;  %1487 = vrot.lane.b32.xlu1 %v1472_v16, %s2580_s17 }
 0x232   : > { %v1625_v38 = vsel %vm1623_vm15, %v1616_v51, %v1558_v60 }
 0x233   : > { %2500 = vmatmul.mubr.msk.f32.vlgmr.msra.gmra.mxu1 %vm1646_vm6, %v1625_v38 }
 0x234   : > { %1526 = vrot.lane.b32.xlu0 %v1511_v52, %s2575_s19 }
 0x235   : > { %1528 = vrot.lane.b32.xlu1 %v1513_v54, %s2575_s19 }
 0x238   : > { %1567 = vrot.lane.b32.xlu0 %v1552_v57, %s2577_s29 }
 0x239   : > { %1569 = vrot.lane.b32.xlu1 %v1554_v59, %s2577_s29 }
 0x23e   : > { %v1355_v7 = vpop.permute.xlu1 %1354  ;;  %v1478_v3 = vpop.permute.xlu0 %1477 }
 0x23f   : > { %v1581_v11 = vsel %vm1201_vm14, %v3276_v56, %v1355_v7 }
 0x242   : > { %v1396_v58 = vpop.permute.xlu1 %1395 }
 0x243   : > { %v1590_v62 = vsel %vm1587_vm9, %v1581_v11, %v1396_v58 }
 0x246   : > { %v1437_v43 = vpop.permute.xlu1 %1436 }
 0x247   : > { %v1599_v0 = vsel %vm1596_vm11, %v1590_v62, %v1437_v43 }
 0x248   : > { %v1608_v6 = vsel %vm1605_vm12, %v1599_v0, %v1478_v3 }
 0x24a   : > { %v1519_v2 = vpop.permute.xlu1 %1518 }
 0x24b   : > { %v1617_v24 = vsel %vm1614_vm13, %v1608_v6, %v1519_v2 }
 0x24e   : > { %v1560_v8 = vpop.permute.xlu1 %1559 }
 0x24f   : > { %v1626_v61 = vsel %vm1623_vm15, %v1617_v24, %v1560_v8 }
 0x250   : > { %2502 = vmatprep.mubr.msk.f32.mxu1 %vm1646_vm6, %v1626_v61 }
 0x256   : > { %v1357_v12 = vpop.permute.xlu0 %1356  ;;  %v1439_v4 = vpop.permute.xlu1 %1438 }
 0x257   : > { %v1582_v56 = vsel %vm1201_vm14, %v3317_v45, %v1357_v12 }
 0x25a   : > { %v1398_v63 = vpop.permute.xlu0 %1397 }
 0x25b   : > { %v1591_v15 = vsel %vm1587_vm9, %v1582_v56, %v1398_v63 }
 0x25c   : > { %v1600_v18 = vsel %vm1596_vm11, %v1591_v15, %v1439_v4 }
 0x25e   : > { %v1480_v32 = vpop.permute.xlu0 %1479 }
 0x25f   : > { %v1609_v20 = vsel %vm1605_vm12, %v1600_v18, %v1480_v32 }
 0x262   : > { %v1521_v17 = vpop.permute.xlu0 %1520 }
 0x263   : > { %v1618_v14 = vsel %vm1614_vm13, %v1609_v20, %v1521_v17 }
 0x266   : > { %v1562_v22 = vpop.permute.xlu0 %1561 }
 0x267   : > { %v1627_v23 = vsel %vm1623_vm15, %v1618_v14, %v1562_v22 }
 0x268   : > { %2503 = vmatmul.mubr.msk.f32.gmra.mxu1 %vm1646_vm6, %v1627_v23 }
 0x26e   : > { %v1359_v25 = vpop.permute.xlu1 %1358  ;;  %v1482_v36 = vpop.permute.xlu0 %1481 }
 0x26f   : > { %v1583_v45 = vsel %vm1201_vm14, %v3342_v50, %v1359_v25 }
 0x272   : > { %v1400_v28 = vpop.permute.xlu1 %1399 }
 0x273   : > { %v1592_v31 = vsel %vm1587_vm9, %v1583_v45, %v1400_v28  ;;  %v2581_v45 = vmov 0.0  }
 0x274   : > { %2088 = vmatprep.subr.mxu0 %v2581_v45 }
 0x276   : > { %v1441_v27 = vpop.permute.xlu1 %1440 }
 0x277   : > { %v1601_v33 = vsel %vm1596_vm11, %v1592_v31, %v1441_v27  ;;  %v2063_v27 = vld [vmem:[%s3798_s3 + $0x78] sm:$0xff]  ;;  %v2062_v31 = vld [vmem:[%s3798_s3 + $0x70] sm:$0xff] }
 0x278   : > { %v1610_v39 = vsel %vm1605_vm12, %v1601_v33, %v1482_v36  ;;  %2089 = vmatpush1.msra.mxu0 %v2063_v27  ;;  %v2061_v33 = vld [vmem:[%s3798_s3 + $0x68] sm:$0xff]  ;;  %v2059_v36 = vld [vmem:[%s3798_s3 + $0x58] sm:$0xff] }
 0x279   : > { %2090 = vmatprep.subr.mxu0 %v2581_v45 }
 0x27a   : > { %v1523_v35 = vpop.permute.xlu1 %1522  ;;  %2091 = vmatpush1.msra.mxu0 %v2062_v31 }
 0x27b   : > { %v1619_v29 = vsel %vm1614_vm13, %v1610_v39, %v1523_v35  ;;  %2092 = vmatprep.subr.mxu0 %v2581_v45  ;;  %v2060_v35 = vld [vmem:[%s3798_s3 + $0x60] sm:$0xff]  ;;  %v2058_v39 = vld [vmem:[%s3798_s3 + $0x50] sm:$0xff] }
 0x27c   : > { %2093 = vmatpush1.msra.mxu0 %v2061_v33 }
 0x27d   : > { %2094 = vmatprep.subr.mxu0 %v2581_v45 }
 0x27e   : > { %v1564_v41 = vpop.permute.xlu1 %1563  ;;  %2095 = vmatpush1.msra.mxu0 %v2060_v35 }
 0x27f   : > { %v1628_v13 = vsel %vm1623_vm15, %v1619_v29, %v1564_v41  ;;  %2096 = vmatprep.subr.mxu0 %v2581_v45 }
 0x280   : > { %2505 = vmatprep.mubr.msk.f32.mxu1 %vm1646_vm6, %v1628_v13  ;;  %2097 = vmatpush1.msra.mxu0 %v2059_v36 }
 0x281   : > { %2098 = vmatprep.subr.mxu0 %v2581_v45 }
 0x282   : > { %2099 = vmatpush1.msra.mxu0 %v2058_v39 }
 0x283   : > { %2100 = vmatprep.subr.mxu0 %v2581_v45 }
 0x286   : > { %v1361_v26 = vpop.permute.xlu0 %1360  ;;  %v1443_v40 = vpop.permute.xlu1 %1442 }
 0x287   : > { %v1584_v50 = vsel %vm1201_vm14, %v3367_v10, %v1361_v26 }
 0x28a   : > { %v1402_v44 = vpop.permute.xlu0 %1401 }
 0x28b   : > { %v1593_v47 = vsel %vm1587_vm9, %v1584_v50, %v1402_v44  ;;  %v2057_v44 = vld [vmem:[%s3798_s3 + $0x48] sm:$0xff] }
 0x28c   : > { %v1602_v49 = vsel %vm1596_vm11, %v1593_v47, %v1443_v40  ;;  %2101 = vmatpush1.msra.mxu0 %v2057_v44 }
 0x28d   : > { %2102 = vmatprep.subr.mxu0 %v2581_v45 }
 0x28e   : > { %v1484_v46 = vpop.permute.xlu0 %1483 }
 0x28f   : > { %v1611_v37 = vsel %vm1605_vm12, %v1602_v49, %v1484_v46 }
 0x292   : > { %v1525_v48 = vpop.permute.xlu0 %1524 }
 0x293   : > { %v1363_v34 = vpop.permute.xlu1 %1362  ;;  %v1620_v21 = vsel %vm1614_vm13, %v1611_v37, %v1525_v48  ;;  %v2056_v37 = vld [vmem:[%s3798_s3 + $0x40] sm:$0xff] }
 0x294   : > { %v1585_v53 = vsel %vm1201_vm14, %v3400_v19, %v1363_v34  ;;  %2103 = vmatpush1.msra.mxu0 %v2056_v37 }
 0x295   : > { %2104 = vmatprep.subr.mxu0 %v2581_v45 }
 0x296   : > { %v1566_v9 = vpop.permute.xlu0 %1565 }
 0x297   : > { %v1629_v30 = vsel %vm1623_vm15, %v1620_v21, %v1566_v9  ;;  %v1404_v42 = vpop.permute.xlu1 %1403 }
 0x298   : > { %2506 = vmatmul.mubr.msk.f32.gmra.mxu1 %vm1646_vm6, %v1629_v30  ;;  %v1594_v57 = vsel %vm1587_vm9, %v1585_v53, %v1404_v42  ;;  %v2055_v30 = vld [vmem:[%s3798_s3 + $0x38] sm:$0xff] }
 0x299   : > { %2105 = vmatpush1.msra.mxu0 %v2055_v30 }
 0x29a   : > { %v1365_v16 = vpop.permute.xlu0 %1364  ;;  %2106 = vmatprep.subr.mxu0 %v2581_v45 }
 0x29b   : > { %v1445_v1 = vpop.permute.xlu1 %1444  ;;  %v1586_v52 = vsel %vm1201_vm14, %v3427_v5, %v1365_v16 }
 0x29c   : > { %v1603_v7 = vsel %vm1596_vm11, %v1594_v57, %v1445_v1  ;;  %v2054_v1 = vld [vmem:[%s3798_s3 + $0x30] sm:$0xff]  ;;  %v2051_v57 = vld [vmem:[%s3798_s3 + $0x18] sm:$0xff] }
 0x29d   : > { %2107 = vmatpush1.msra.mxu0 %v2054_v1  ;;  %v2068_v1 = vld [vmem:[%s3798_s3 + $0xa0] sm:$0xff] }
 0x29e   : > { %v1406_v51 = vpop.permute.xlu0 %1405  ;;  %2108 = vmatprep.subr.mxu0 %v2581_v45 }
 0x29f   : > { %v1447_v10 = vpop.permute.xlu1 %1446  ;;  %v1595_v54 = vsel %vm1587_vm9, %v1586_v52, %v1406_v51  ;;  %v2052_v52 = vld [vmem:[%s3798_s3 + $0x20] sm:$0xff] }
 0x2a0   : > { %v1604_v58 = vsel %vm1596_vm11, %v1595_v54, %v1447_v10  ;;  %v2053_v10 = vld [vmem:[%s3798_s3 + $0x28] sm:$0xff] }
 0x2a1   : > { %2109 = vmatpush1.msra.mxu0 %v2053_v10 }
 0x2a2   : > { %v1486_v60 = vpop.permute.xlu0 %1485  ;;  %2110 = vmatprep.subr.mxu0 %v2581_v45 }
 0x2a3   : > { %v1488_v38 = vpop.permute.xlu1 %1487  ;;  %v1612_v43 = vsel %vm1605_vm12, %v1603_v7, %v1486_v60  ;;  %2111 = vmatpush1.msra.mxu0 %v2052_v52 }
 0x2a4   : > { %v1613_v11 = vsel %vm1605_vm12, %v1604_v58, %v1488_v38  ;;  %2112 = vmatprep.subr.mxu0 %v2581_v45 }
 0x2a5   : > { %2113 = vmatpush1.msra.mxu0 %v2051_v57 }
 0x2a6   : > { %v1527_v55 = vpop.permute.xlu0 %1526  ;;  %2114 = vmatprep.subr.mxu0 %v2581_v45 }
 0x2a7   : > { %v1529_v59 = vpop.permute.xlu1 %1528  ;;  %v1621_v62 = vsel %vm1614_vm13, %v1612_v43, %v1527_v55 }
 0x2a8   : > { %v1622_v0 = vsel %vm1614_vm13, %v1613_v11, %v1529_v59  ;;  %v2050_v11 = vld [vmem:[%s3798_s3 + $0x10] sm:$0xff] }
 0x2a9   : > { %2115 = vmatpush1.msra.mxu0 %v2050_v11 }
 0x2aa   : > { %v1568_v5 = vpop.permute.xlu0 %1567  ;;  %2116 = vmatprep.subr.mxu0 %v2581_v45 }
 0x2ab   : > { %v1630_v19 = vsel %vm1623_vm15, %v1621_v62, %v1568_v5  ;;  %v1570_v2 = vpop.permute.xlu1 %1569 }
 0x2ac   : > { %v1631_v3 = vsel %vm1623_vm15, %v1622_v0, %v1570_v2  ;;  %2508 = vmatprep.mubr.msk.f32.mxu1 %vm1646_vm6, %v1630_v19  ;;  %v2049_v0 = vld [vmem:[%s3798_s3 + $0x8] sm:$0xff] }
 0x2ad   : > { %2509 = vmatmul.mubr.msk.f32.gmra.mxu1 %vm1646_vm6, %v1631_v3  ;;  %v2048_v3 = vld [vmem:[%s3798_s3] sm:$0xff]  ;;  %2117 = vmatpush1.msra.mxu0 %v2049_v0 }
 0x2ae   : > { %2118 = vmatprep.subr.mxu0 %v2581_v45 }
 0x2af   : > { %2119 = vmatpush1.msra.mxu0 %v2048_v3 }
 0x2b0   : > { %2128 = vmatprep.subr.mxu0 %v2581_v45 }
 0x2f3   : > { %v2501_v6 = vpop.f32.mrf.mxu1 }
 0x2f4   : > { %vm1777_vm14 = vcmp.gt.f32.partialorder %v2501_v6, 0.0  ;;  %v1785_v24 = vmul.f32 0.2, %v2501_v6 }
 0x2f5   : > { %v1737_v8 = vpop.f32.mrf.mxu1 }
 0x2f6   : > { %v1793_v61 = vsel %vm1777_vm14, %v2501_v6, %v1785_v24  ;;  %vm1776_vm7 = vcmp.gt.f32.partialorder %v1737_v8, 0.0  ;;  %v1784_v12 = vmul.f32 0.2, %v1737_v8  ;;  %v2075_v24 = vld [vmem:[%s3798_s3 + $0xd8] sm:$0xff] }
 0x2f7   : > { %1801 = vst.msk [vmem:[#allocation3 + $0x8] sm:$0xff] %vm1587_vm9, %v1793_v61  ;;  %v2074_v61 = vld [vmem:[%s3798_s3 + $0xd0] sm:$0xff]  ;;  %2129 = vmatpush2.msra.mxu0 %v2075_v24 }
 0x2f8   : > { %v1792_v63 = vsel %vm1776_vm7, %v1737_v8, %v1784_v12  ;;  %2130 = vmatprep.subr.mxu0 %v2581_v45 }
 0x2f9   : > { %1800 = vst.msk [vmem:[#allocation3] sm:$0xff] %vm1587_vm9, %v1792_v63  ;;  %v2073_v63 = vld [vmem:[%s3798_s3 + $0xc8] sm:$0xff]  ;;  %2131 = vmatpush2.msra.mxu0 %v2074_v61 }
 0x2fa   : > { %2132 = vmatprep.subr.mxu0 %v2581_v45 }
 0x2fb   : > { %2133 = vmatpush2.msra.mxu0 %v2073_v63 }
 0x2fc   : > { %2134 = vmatprep.subr.mxu0 %v2581_v45 }
 0x300   : > { %v1808_v50 = vld [vmem:[#allocation3] ss:$2 sm:$0xff]  ;;  %v1816_v47 = vld [vmem:[#allocation3 + $0x1] ss:$2 sm:$0xff] }
 0x301   : > { %v1823_v16 = vadd.f32 %v1816_v47, %v1808_v50 }
 0x303   : > { %v1827_v38 = vmul.f32 0.5, %v1823_v16  ;;  %v2069_v16 = vld [vmem:[%s3798_s3 + $0xa8] sm:$0xff] }
 0x305   : > { %v1831_v7 = vsel %vm1587_vm9, %v1827_v38, 0.0 }
 0x328   : > { %v2504_v32 = vpop.f32.mrf.mxu1 }
 0x329   : > { %vm1779_vm8 = vcmp.gt.f32.partialorder %v2504_v32, 0.0  ;;  %v1787_v56 = vmul.f32 0.2, %v2504_v32 }
 0x32a   : > { %v1747_v15 = vpop.f32.mrf.mxu1 }
 0x32b   : > { %v1795_v17 = vsel %vm1779_vm8, %v2504_v32, %v1787_v56  ;;  %vm1778_vm10 = vcmp.gt.f32.partialorder %v1747_v15, 0.0  ;;  %v1786_v4 = vmul.f32 0.2, %v1747_v15  ;;  %v2072_v56 = vld [vmem:[%s3798_s3 + $0xc0] sm:$0xff] }
 0x32c   : > { %1803 = vst.msk [vmem:[#allocation3 + $0x18] sm:$0xff] %vm1587_vm9, %v1795_v17  ;;  %v2071_v17 = vld [vmem:[%s3798_s3 + $0xb8] sm:$0xff]  ;;  %2135 = vmatpush2.msra.mxu0 %v2072_v56 }
 0x32d   : > { %v1794_v18 = vsel %vm1778_vm10, %v1747_v15, %v1786_v4  ;;  %2136 = vmatprep.subr.mxu0 %v2581_v45 }
 0x32e   : > { %1802 = vst.msk [vmem:[#allocation3 + $0x10] sm:$0xff] %vm1587_vm9, %v1794_v18  ;;  %2137 = vmatpush2.msra.mxu0 %v2071_v17  ;;  %v2064_v17 = vld [vmem:[%s3798_s3 + $0x80] sm:$0xff] }
 0x32f   : > { %2138 = vmatprep.subr.mxu0 %v2581_v45 }
 0x335   : > { %v1810_v41 = vld [vmem:[#allocation3 + $0x10] ss:$2 sm:$0xff]  ;;  %v1818_v26 = vld [vmem:[#allocation3 + $0x11] ss:$2 sm:$0xff] }
 0x336   : > { %v1824_v21 = vadd.f32 %v1818_v26, %v1810_v41 }
 0x338   : > { %v1828_v51 = vmul.f32 0.5, %v1824_v21 }
 0x33a   : > { %v1832_v53 = vsel %vm1587_vm9, %v1828_v51, 0.0 }
 0x33b   : > { %v1833_v43 = vadd.f32 %v1832_v53, %v1831_v7  ;;  %v2067_v7 = vld [vmem:[%s3798_s3 + $0x98] sm:$0xff] }
 0x358   : > { %v2507_v20 = vpop.f32.mrf.mxu1 }
 0x359   : > { %vm1781_vm11 = vcmp.gt.f32.partialorder %v2507_v20, 0.0  ;;  %v1789_v14 = vmul.f32 0.2, %v2507_v20 }
 0x35a   : > { %v1757_v22 = vpop.f32.mrf.mxu1 }
 0x35b   : > { %v1797_v23 = vsel %vm1781_vm11, %v2507_v20, %v1789_v14  ;;  %vm1780_vm13 = vcmp.gt.f32.partialorder %v1757_v22, 0.0  ;;  %v1788_v25 = vmul.f32 0.2, %v1757_v22 }
 0x35c   : > { %1805 = vst.msk [vmem:[#allocation3 + $0x28] sm:$0xff] %vm1587_vm9, %v1797_v23 }
 0x35d   : > { %v1796_v28 = vsel %vm1780_vm13, %v1757_v22, %v1788_v25 }
 0x35e   : > { %1804 = vst.msk [vmem:[#allocation3 + $0x20] sm:$0xff] %vm1587_vm9, %v1796_v28 }
 0x365   : > { %v1812_v46 = vld [vmem:[#allocation3 + $0x20] ss:$2 sm:$0xff]  ;;  %v1820_v48 = vld [vmem:[#allocation3 + $0x21] ss:$2 sm:$0xff] }
 0x366   : > { %v1825_v42 = vadd.f32 %v1820_v48, %v1812_v46 }
 0x368   : > { %v1829_v60 = vmul.f32 0.5, %v1825_v42 }
 0x36a   : > { %v1834_v58 = vsel %vm1587_vm9, %v1829_v60, 0.0 }
 0x36b   : > { %v1835_v5 = vadd.f32 %v1834_v58, %v1833_v43  ;;  %v2066_v43 = vld [vmem:[%s3798_s3 + $0x90] sm:$0xff] }
 0x36d   : > { %v2510_v29 = vpop.f32.mrf.mxu1 }
 0x36e   : > { %vm1783_vm6 = vcmp.gt.f32.partialorder %v2510_v29, 0.0  ;;  %v1791_v13 = vmul.f32 0.2, %v2510_v29 }
 0x36f   : > { %v1767_v40 = vpop.f32.mrf.mxu1 }
 0x370   : > { %v1799_v34 = vsel %vm1783_vm6, %v2510_v29, %v1791_v13  ;;  %vm1782_vm14 = vcmp.gt.f32.partialorder %v1767_v40, 0.0  ;;  %v1790_v49 = vmul.f32 0.2, %v1767_v40 }
 0x371   : > { %1807 = vst.msk [vmem:[#allocation3 + $0x38] sm:$0xff] %vm1587_vm9, %v1799_v34 }
 0x372   : > { %v1798_v9 = vsel %vm1782_vm14, %v1767_v40, %v1790_v49  ;;  %v2070_v49 = vld [vmem:[%s3798_s3 + $0xb0] sm:$0xff] }
 0x373   : > { %1806 = vst.msk [vmem:[#allocation3 + $0x30] sm:$0xff] %vm1587_vm9, %v1798_v9  ;;  %2139 = vmatpush2.msra.mxu0 %v2070_v49 }
 0x374   : > { %2140 = vmatprep.subr.mxu0 %v2581_v45 }
 0x375   : > { %2141 = vmatpush2.msra.mxu0 %v2069_v16 }
 0x376   : > { %2142 = vmatprep.subr.mxu0 %v2581_v45 }
 0x377   : > { %2143 = vmatpush2.msra.mxu0 %v2068_v1 }
 0x378   : > { %2144 = vmatprep.subr.mxu0 %v2581_v45 }
 0x379   : > { %2145 = vmatpush2.msra.mxu0 %v2067_v7 }
 0x37a   : > { %v1814_v54 = vld [vmem:[#allocation3 + $0x30] ss:$2 sm:$0xff]  ;;  %v1822_v55 = vld [vmem:[#allocation3 + $0x31] ss:$2 sm:$0xff]  ;;  %2146 = vmatprep.subr.mxu0 %v2581_v45 }
 0x37b   : > { %v1826_v59 = vadd.f32 %v1822_v55, %v1814_v54  ;;  %2147 = vmatpush2.msra.mxu0 %v2066_v43 }
 0x37c   : > { %2148 = vmatprep.subr.mxu0 %v2581_v45 }
 0x37d   : > { %v1830_v62 = vmul.f32 0.5, %v1826_v59 }
 0x37f   : > { %v1836_v19 = vsel %vm1587_vm9, %v1830_v62, 0.0 }
 0x380   : > { %v1837_v2 = vadd.f32 %v1836_v19, %v1835_v5 }
 0x382   : > { %v1838_v6 = vrot.slane %v1837_v2, 4 }
 0x384   : > { %v1839_v8 = vadd.f32 %v1838_v6, %v1837_v2 }
 0x386   : > { %v1840_v12 = vrot.slane %v1839_v8, 2 }
 0x388   : > { %v1841_v32 = vadd.f32 %v1840_v12, %v1839_v8  ;;  %v2065_v12 = vld [vmem:[%s3798_s3 + $0x88] sm:$0xff] }
 0x389   : > { %2149 = vmatpush2.msra.mxu0 %v2065_v12 }
 0x38a   : > { %v1842_v15 = vrot.slane %v1841_v32, 1  ;;  %2150 = vmatprep.subr.mxu0 %v2581_v45 }
 0x38b   : > { %2151 = vmatpush2.msra.mxu0 %v2064_v17 }
 0x38c   : > { %v1843_v4 = vadd.f32 %v1842_v15, %v1841_v32 }
 0x38e   : > { %v1845_v18 = vmul.f32 0.03125, %v1843_v4 }
 0x390   : > { %v1846_v20 = vsub.f32 %v1827_v38, %v1845_v18  ;;  %v1847_v14 = vsub.f32 %v1828_v51, %v1845_v18  ;;  %v1848_v22 = vsub.f32 %v1829_v60, %v1845_v18  ;;  %v1849_v23 = vsub.f32 %v1830_v62, %v1845_v18 }
 0x392   : > { %v1850_v25 = vmul.f32 %v1846_v20, %v1846_v20  ;;  %v1851_v28 = vmul.f32 %v1847_v14, %v1847_v14  ;;  %v1852_v27 = vmul.f32 %v1848_v22, %v1848_v22  ;;  %v1853_v31 = vmul.f32 %v1849_v23, %v1849_v23 }
 0x394   : > { %v1854_v33 = vsel %vm1587_vm9, %v1850_v25, 0.0  ;;  %v1855_v35 = vsel %vm1587_vm9, %v1851_v28, 0.0  ;;  %v1857_v39 = vsel %vm1587_vm9, %v1852_v27, 0.0  ;;  %v1859_v41 = vsel %vm1587_vm9, %v1853_v31, 0.0 }
 0x395   : > { %v1856_v36 = vadd.f32 %v1855_v35, %v1854_v33 }
 0x397   : > { %v1858_v29 = vadd.f32 %v1857_v39, %v1856_v36 }
 0x399   : > { %v1860_v13 = vadd.f32 %v1859_v41, %v1858_v29 }
 0x39b   : > { %v1861_v26 = vrot.slane %v1860_v13, 4 }
 0x39d   : > { %v1862_v44 = vadd.f32 %v1861_v26, %v1860_v13 }
 0x39f   : > { %v1863_v46 = vrot.slane %v1862_v44, 2 }
 0x3a1   : > { %v1864_v40 = vadd.f32 %v1863_v46, %v1862_v44 }
 0x3a3   : > { %v1865_v50 = vrot.slane %v1864_v40, 1 }
 0x3a5   : > { %v1866_v47 = vadd.f32 %v1865_v50, %v1864_v40 }
 0x3a7   : > { %v1867_v48 = vmul.f32 0.03125, %v1866_v47 }
 0x3a9   : > { %v1868_v34 = vadd.f32 1e-05, %v1867_v48 }
 0x3ab   : > { %2557 = vrsqrt.f32 %v1868_v34 }
 0x3b8   : > { %v2558_v37 = vpop.eup %2557 }
 0x3b9   : > { %v1870_v21 = vmul.f32 %v2558_v37, %v1846_v20  ;;  %v1871_v9 = vmul.f32 %v2558_v37, %v1847_v14  ;;  %v1872_v30 = vmul.f32 %v2558_v37, %v1848_v22  ;;  %v1873_v42 = vmul.f32 %v2558_v37, %v1849_v23 }
 0x3bb   : > { %vm1874_vm7 = vcmp.gt.f32.partialorder %v1870_v21, 0.0  ;;  %vm1875_vm8 = vcmp.gt.f32.partialorder %v1871_v9, 0.0  ;;  %v1878_v51 = vmul.f32 0.2, %v1870_v21  ;;  %v1879_v10 = vmul.f32 0.2, %v1871_v9 }
 0x3bc   : > { %vm1876_vm10 = vcmp.gt.f32.partialorder %v1872_v30, 0.0  ;;  %v1880_v60 = vmul.f32 0.2, %v1872_v30  ;;  %vm1877_vm11 = vcmp.gt.f32.partialorder %v1873_v42, 0.0  ;;  %v1881_v38 = vmul.f32 0.2, %v1873_v42 }
 0x3bd   : > { %v1882_v52 = vsel %vm1874_vm7, %v1870_v21, %v1878_v51  ;;  %v1883_v53 = vsel %vm1875_vm8, %v1871_v9, %v1879_v10 }
 0x3be   : > { %1887 = vst.msk [vmem:[%s271_s26 + $0x8] sm:$0xff] %vm1587_vm9, %v1883_v53  ;;  %v1894_v54 = vrot.slane %v1882_v52, 5  ;;  %v1895_v55 = vrot.slane %v1883_v53, 5  ;;  %1886 = vst.msk [vmem:[%s271_s26] sm:$0xff] %vm1587_vm9, %v1882_v52  ;;  %v1884_v57 = vsel %vm1876_vm10, %v1872_v30, %v1880_v60  ;;  %v1885_v59 = vsel %vm1877_vm11, %v1873_v42, %v1881_v38 }
 0x3bf   : > { %1888 = vst.msk [vmem:[%s271_s26 + $0x10] sm:$0xff] %vm1587_vm9, %v1884_v57  ;;  %v1897_v58 = vrot.slane %v1884_v57, 5  ;;  %1889 = vst.msk [vmem:[%s271_s26 + $0x18] sm:$0xff] %vm1587_vm9, %v1885_v59  ;;  %v1899_v5 = vrot.slane %v1885_v59, 5 }
 0x3c0   : > { %v3658_v11 = vsel %vm309_vm0, %v1894_v54, %v1895_v55  ;;  %v3661_v62 = vsel %vm309_vm0, 0.0, %v1894_v54 }
 0x3c1   : > { %v1986_v0 = vrot.slane %v3661_v62, 5  ;;  %v1987_v19 = vrot.slane %v3658_v11, 5  ;;  %v3667_v2 = vsel %vm309_vm0, %v1895_v55, %v1897_v58  ;;  %v1910_v3 = vrot.slane %v3661_v62, 1 }
 0x3c2   : > { %v1911_v6 = vrot.slane %v3658_v11, 1  ;;  %v1913_v24 = vrot.slane %v3667_v2, 1  ;;  %v2007_v8 = vrot.slane %v3661_v62, 6  ;;  %v2008_v61 = vrot.slane %v3658_v11, 6 }
 0x3c3   : > { %v1988_v63 = vsel %vm309_vm0, %v1986_v0, %v1987_v19  ;;  %v1931_v32 = vrot.slane %v3661_v62, 2  ;;  %v1932_v56 = vrot.slane %v3658_v11, 2  ;;  %v1934_v15 = vrot.slane %v3667_v2, 2 }
 0x3c4   : > { %1995 = vrot.lane.b32.xlu1 %v1988_v63, %s2578_s30  ;;  %v1912_v4 = vsel %vm362_vm2, %v1910_v3, %v1911_v6  ;;  %v1914_v18 = vsel %vm362_vm2, %v1911_v6, %v1913_v24  ;;  %v1989_v22 = vrot.slane %v3667_v2, 5  ;;  %v1952_v25 = vrot.slane %v3661_v62, 3 }
 0x3c5   : > { %v2532_v20 = vpack.i.bf16 %v1914_v18, %v1912_v4  ;;  %v1933_v14 = vsel %vm444_vm1, %v1931_v32, %v1932_v56  ;;  %v1935_v23 = vsel %vm444_vm1, %v1932_v56, %v1934_v15  ;;  %v1953_v28 = vrot.slane %v3658_v11, 3 }
 0x3c6   : > { %v1955_v27 = vrot.slane %v3667_v2, 3  ;;  %v2009_v31 = vsel %vm771_vm5, %v2007_v8, %v2008_v61  ;;  %v3698_v45 = vsel %vm309_vm0, %v1897_v58, %v1899_v5  ;;  %v3701_v33 = vsel %vm309_vm0, %v1899_v5, 0.0 }
 0x3c7   : > { %2533 = vrot.lane.b32.xlu0 %v2532_v20, %s2578_s30  ;;  %v1915_v35 = vrot.slane %v3698_v45, 1  ;;  %v1917_v36 = vrot.slane %v3701_v33, 1  ;;  %v2537_v39 = vpack.i.bf16 %v1935_v23, %v1933_v14  ;;  %v1990_v29 = vsel %vm309_vm0, %v1987_v19, %v1989_v22 }
 0x3c8   : > { %2016 = vrot.lane.b32.xlu1 %v2009_v31, %s2580_s17  ;;  %v1954_v41 = vsel %vm526_vm3, %v1952_v25, %v1953_v28  ;;  %v1956_v13 = vsel %vm526_vm3, %v1953_v28, %v1955_v27  ;;  %v1936_v46 = vrot.slane %v3698_v45, 2  ;;  %v1938_v40 = vrot.slane %v3701_v33, 2 }
 0x3c9   : > { %v1916_v26 = vsel %vm362_vm2, %v1913_v24, %v1915_v35  ;;  %v1918_v44 = vsel %vm362_vm2, %v1915_v35, %v1917_v36  ;;  %v2542_v50 = vpack.i.bf16 %v1956_v13, %v1954_v41  ;;  %v2010_v48 = vrot.slane %v3667_v2, 6 }
 0x3ca   : > { %v2547_v47 = vpack.i.bf16 %v1918_v44, %v1916_v26  ;;  %v1937_v34 = vsel %vm444_vm1, %v1934_v15, %v1936_v46  ;;  %v1939_v49 = vsel %vm444_vm1, %v1936_v46, %v1938_v40  ;;  %v1991_v9 = vrot.slane %v3698_v45, 5 }
 0x3cb   : > { %2538 = vrot.lane.b32.xlu0 %v2537_v39, %s2580_s17  ;;  %v2011_v37 = vsel %vm771_vm5, %v2008_v61, %v2010_v48  ;;  %v2552_v21 = vpack.i.bf16 %v1939_v49, %v1937_v34  ;;  %v1957_v30 = vrot.slane %v3698_v45, 3  ;;  %v2012_v16 = vrot.slane %v3698_v45, 6 }
 0x3cc   : > { %1997 = vrot.lane.b32.xlu1 %v1990_v29, %s2578_s30  ;;  %v1992_v42 = vsel %vm309_vm0, %v1989_v22, %v1991_v9  ;;  %v2014_v51 = vrot.slane %v3701_v33, 6  ;;  %v1993_v60 = vrot.slane %v3701_v33, 5  ;;  %v1959_v53 = vrot.slane %v3701_v33, 3 }
 0x3cd   : > { %v1958_v1 = vsel %vm526_vm3, %v1955_v27, %v1957_v30  ;;  %v2013_v10 = vsel %vm771_vm5, %v2010_v48, %v2012_v16  ;;  %v1973_v55 = vrot.slane %v3661_v62, 4  ;;  %v1974_v57 = vrot.slane %v3658_v11, 4 }
 0x3ce   : > { %v2015_v38 = vsel %vm771_vm5, %v2012_v16, %v2014_v51  ;;  %v1994_v52 = vsel %vm309_vm0, %v1991_v9, %v1993_v60  ;;  %v1960_v54 = vsel %vm526_vm3, %v1957_v30, %v1959_v53  ;;  %v1976_v8 = vrot.slane %v3667_v2, 4 }
 0x3cf   : > { %2543 = vrot.lane.b32.xlu0 %v2542_v50, %s2577_s29  ;;  %v1975_v7 = vsel %vm608_vm4, %v1973_v55, %v1974_v57  ;;  %v1978_v35 = vrot.slane %v3698_v45, 4  ;;  %v1980_v46 = vrot.slane %v3701_v33, 4 }
 0x3d0   : > { %2548 = vrot.lane.b32.xlu1 %v2547_v47, %s2578_s30  ;;  %v1977_v4 = vsel %vm608_vm4, %v1974_v57, %v1976_v8 }
 0x3d1   : > { %v1979_v41 = vsel %vm608_vm4, %v1976_v8, %v1978_v35 }
 0x3d3   : > { %2018 = vrot.lane.b32.xlu0 %v2011_v37, %s2580_s17 }
 0x3d4   : > { %2553 = vrot.lane.b32.xlu1 %v2552_v21, %s2580_s17 }
 0x3d7   : > { %1999 = vrot.lane.b32.xlu0 %v1992_v42, %s2578_s30 }
 0x3d8   : > { %1965 = vrot.lane.b32.xlu1 %v1958_v1, %s2577_s29 }
 0x3db   : > { %2020 = vrot.lane.b32.xlu0 %v2013_v10, %s2580_s17 }
 0x3dc   : > { %2022 = vrot.lane.b32.xlu1 %v2015_v38, %s2580_s17 }
 0x3df   : > { %2001 = vrot.lane.b32.xlu0 %v1994_v52, %s2578_s30 }
 0x3e3   : > { %1967 = vrot.lane.b32.xlu0 %v1960_v54, %s2577_s29  ;;  %s2405_s29 = sshll.u32 %s3803_s22, 4 }
 0x3e4   : > { %s276_s10 = scalar_lea.vmem %s3801_s6, %s2405_s29 }
 0x436   : > { %v1996_v59 = vpop.permute.xlu1 %1995 }
 0x437   : > { %v2040_v43 = vsel %vm1587_vm9, %v1975_v7, %v1996_v59 }
 0x439   : > { %v2534_v58 = vpop.permute.xlu0 %2533 }
 0x43a   : > { %v2017_v5 = vpop.permute.xlu1 %2016  ;;  %v2535_v3 = vunpack.i.l.bf16 %v2534_v58  ;;  %v2536_v12 = vunpack.i.h.bf16 %v2534_v58 }
 0x43b   : > { %v2044_v0 = vsel %vm1605_vm12, %v2040_v43, %v2017_v5 }
 0x43c   : > { %2396 = vmatprep.mubr.msk.f32.mxu0 %vm1623_vm15, %v2044_v0  ;;  %v2028_v56 = vsel %vm1587_vm9, %v3661_v62, %v2535_v3  ;;  %v2029_v28 = vsel %vm1587_vm9, %v3658_v11, %v2536_v12 }
 0x43d   : > { %v2539_v19 = vpop.permute.xlu0 %2538 }
 0x43e   : > { %v1998_v6 = vpop.permute.xlu1 %1997  ;;  %v2540_v24 = vunpack.i.l.bf16 %v2539_v19  ;;  %v2541_v15 = vunpack.i.h.bf16 %v2539_v19 }
 0x43f   : > { %v2041_v14 = vsel %vm1587_vm9, %v1977_v4, %v1998_v6 }
 0x440   : > { %v2032_v17 = vsel %vm1605_vm12, %v2028_v56, %v2540_v24  ;;  %v2033_v62 = vsel %vm1605_vm12, %v2029_v28, %v2541_v15 }
 0x441   : > { %v2544_v61 = vpop.permute.xlu0 %2543 }
 0x442   : > { %v2545_v63 = vunpack.i.l.bf16 %v2544_v61  ;;  %v2549_v32 = vpop.permute.xlu1 %2548  ;;  %v2546_v18 = vunpack.i.h.bf16 %v2544_v61 }
 0x443   : > { %v2550_v27 = vunpack.i.l.bf16 %v2549_v32  ;;  %v2551_v47 = vunpack.i.h.bf16 %v2549_v32 }
 0x444   : > { %v2036_v20 = vsel %vm1623_vm15, %v2032_v17, %v2545_v63  ;;  %v2037_v36 = vsel %vm1623_vm15, %v2033_v62, %v2546_v18 }
 0x445   : > { %v2019_v22 = vpop.permute.xlu0 %2018  ;;  %2153 = vmatmul.mubr.f32.vlgmr.msra.gmra.mxu0 %v2036_v20  ;;  %v2030_v29 = vsel %vm1587_vm9, %v3667_v2, %v2550_v27  ;;  %v1981_v2 = vsel %vm608_vm4, %v1978_v35, %v1980_v46  ;;  %v2031_v33 = vsel %vm1587_vm9, %v3698_v45, %v2551_v47 }
 0x446   : > { %v2045_v23 = vsel %vm1605_vm12, %v2041_v14, %v2019_v22  ;;  %v2554_v25 = vpop.permute.xlu1 %2553 }
 0x447   : > { %2397 = vmatprep.mubr.msk.f32.mxu0 %vm1623_vm15, %v2045_v23  ;;  %v2555_v31 = vunpack.i.l.bf16 %v2554_v25  ;;  %v2556_v48 = vunpack.i.h.bf16 %v2554_v25 }
 0x449   : > { %v2000_v39 = vpop.permute.xlu0 %1999  ;;  %2158 = vmatmul.mubr.f32.gmra.mxu0 %v2037_v36  ;;  %v2034_v11 = vsel %vm1605_vm12, %v2030_v29, %v2555_v31  ;;  %v2035_v30 = vsel %vm1605_vm12, %v2031_v33, %v2556_v48 }
 0x44a   : > { %v1966_v13 = vpop.permute.xlu1 %1965  ;;  %v2042_v26 = vsel %vm1587_vm9, %v1979_v41, %v2000_v39 }
 0x44b   : > { %v2038_v50 = vsel %vm1623_vm15, %v2034_v11, %v1966_v13 }
 0x44d   : > { %v2021_v44 = vpop.permute.xlu0 %2020 }
 0x44e   : > { %v2046_v40 = vsel %vm1605_vm12, %v2042_v26, %v2021_v44  ;;  %v2023_v49 = vpop.permute.xlu1 %2022 }
 0x44f   : > { %2398 = vmatprep.mubr.msk.f32.mxu0 %vm1623_vm15, %v2046_v40 }
 0x450   : > { %2163 = vmatmul.mubr.f32.gmra.mxu0 %v2038_v50 }
 0x451   : > { %v2002_v34 = vpop.permute.xlu0 %2001 }
 0x452   : > { %v2043_v37 = vsel %vm1587_vm9, %v1981_v2, %v2002_v34 }
 0x453   : > { %v2047_v21 = vsel %vm1605_vm12, %v2043_v37, %v2023_v49 }
 0x454   : > { %2399 = vmatprep.mubr.msk.f32.mxu0 %vm1623_vm15, %v2047_v21 }
 0x455   : > { %v1968_v9 = vpop.permute.xlu0 %1967 }
 0x456   : > { %v2039_v42 = vsel %vm1623_vm15, %v2035_v30, %v1968_v9 }
 0x457   : > { %2168 = vmatmul.mubr.f32.gmra.mxu0 %v2039_v42 }
 0x505   : > { %v2154_v16 = vpop.f32.mrf.mxu0 }
 0x506   : > { %vm2173_vm0 = vcmp.gt.f32.partialorder %v2154_v16, 0.0  ;;  %v2177_v1 = vmul.f32 0.2, %v2154_v16 }
 0x507   : > { %v2156_v51 = vpop.f32.mrf.mxu0 }
 0x508   : > { %v2181_v10 = vsel %vm2173_vm0, %v2154_v16, %v2177_v1 }
 0x509   : > { %2185 = vst.msk [vmem:[#allocation4] sm:$0xff] %vm1587_vm9, %v2181_v10  ;;  %v2159_v60 = vpop.f32.mrf.mxu0 }
 0x50a   : > { %vm2174_vm1 = vcmp.gt.f32.partialorder %v2159_v60, 0.0  ;;  %v2178_v38 = vmul.f32 0.2, %v2159_v60 }
 0x50b   : > { %v2161_v52 = vpop.f32.mrf.mxu0 }
 0x50c   : > { %v2182_v53 = vsel %vm2174_vm1, %v2159_v60, %v2178_v38 }
 0x50d   : > { %2186 = vst.msk [vmem:[#allocation4 + $0x8] sm:$0xff] %vm1587_vm9, %v2182_v53 }
 0x510   : > { %v2164_v45 = vpop.f32.mrf.mxu0 }
 0x511   : > { %vm2175_vm2 = vcmp.gt.f32.partialorder %v2164_v45, 0.0  ;;  %v2179_v54 = vmul.f32 0.2, %v2164_v45 }
 0x512   : > { %v2166_v55 = vpop.f32.mrf.mxu0 }
 0x513   : > { %v2183_v57 = vsel %vm2175_vm2, %v2164_v45, %v2179_v54 }
 0x514   : > { %2187 = vst.msk [vmem:[#allocation4 + $0x10] sm:$0xff] %vm1587_vm9, %v2183_v57  ;;  %v2189_v5 = vld [vmem:[#allocation4] ss:$2 sm:$0xff]  ;;  %v2193_v0 = vld [vmem:[#allocation4 + $0x1] ss:$2 sm:$0xff] }
 0x515   : > { %v2196_v19 = vadd.f32 %v2193_v0, %v2189_v5 }
 0x517   : > { %v2169_v59 = vpop.f32.mrf.mxu0  ;;  %v2198_v24 = vmul.f32 0.5, %v2196_v19 }
 0x518   : > { %vm2176_vm3 = vcmp.gt.f32.partialorder %v2169_v59, 0.0  ;;  %v2180_v7 = vmul.f32 0.2, %v2169_v59 }
 0x519   : > { %v2171_v58 = vpop.f32.mrf.mxu0  ;;  %v2200_v12 = vsel %vm1587_vm9, %v2198_v24, 0.0 }
 0x51a   : > { %v2184_v43 = vsel %vm2176_vm3, %v2169_v59, %v2180_v7 }
 0x51b   : > { %2188 = vst.msk [vmem:[#allocation4 + $0x18] sm:$0xff] %vm1587_vm9, %v2184_v43 }
 0x522   : > { %v2191_v3 = vld [vmem:[#allocation4 + $0x10] ss:$2 sm:$0xff]  ;;  %v2195_v6 = vld [vmem:[#allocation4 + $0x11] ss:$2 sm:$0xff] }
 0x523   : > { %v2197_v8 = vadd.f32 %v2195_v6, %v2191_v3 }
 0x525   : > { %v2199_v61 = vmul.f32 0.5, %v2197_v8 }
 0x527   : > { %v2201_v63 = vsel %vm1587_vm9, %v2199_v61, 0.0 }
 0x528   : > { %v2202_v32 = vadd.f32 %v2201_v63, %v2200_v12 }
 0x52a   : > { %v2203_v56 = vrot.slane %v2202_v32, 4 }
 0x52c   : > { %v2204_v15 = vadd.f32 %v2203_v56, %v2202_v32 }
 0x52e   : > { %v2205_v17 = vrot.slane %v2204_v15, 2 }
 0x530   : > { %v2206_v4 = vadd.f32 %v2205_v17, %v2204_v15 }
 0x532   : > { %v2207_v18 = vrot.slane %v2206_v4, 1 }
 0x534   : > { %v2208_v20 = vadd.f32 %v2207_v18, %v2206_v4 }
 0x536   : > { %v2210_v14 = vmul.f32 0.0625, %v2208_v20 }
 0x538   : > { %v2211_v22 = vsub.f32 %v2198_v24, %v2210_v14  ;;  %v2212_v23 = vsub.f32 %v2199_v61, %v2210_v14 }
 0x53a   : > { %v2213_v25 = vmul.f32 %v2211_v22, %v2211_v22  ;;  %v2214_v28 = vmul.f32 %v2212_v23, %v2212_v23 }
 0x53c   : > { %v2215_v27 = vsel %vm1587_vm9, %v2213_v25, 0.0  ;;  %v2216_v62 = vsel %vm1587_vm9, %v2214_v28, 0.0 }
 0x53d   : > { %v2217_v31 = vadd.f32 %v2216_v62, %v2215_v27 }
 0x53f   : > { %v2218_v35 = vrot.slane %v2217_v31, 4 }
 0x541   : > { %v2219_v36 = vadd.f32 %v2218_v35, %v2217_v31 }
 0x543   : > { %v2220_v39 = vrot.slane %v2219_v36, 2 }
 0x545   : > { %v2221_v29 = vadd.f32 %v2220_v39, %v2219_v36 }
 0x547   : > { %v2222_v41 = vrot.slane %v2221_v29, 1 }
 0x549   : > { %v2223_v13 = vadd.f32 %v2222_v41, %v2221_v29 }
 0x54b   : > { %v2224_v11 = vmul.f32 0.0625, %v2223_v13 }
 0x54d   : > { %v2225_v26 = vadd.f32 1e-05, %v2224_v11 }
 0x54f   : > { %2559 = vrsqrt.f32 %v2225_v26 }
 0x55c   : > { %v2560_v44 = vpop.eup %2559 }
 0x55d   : > { %v2227_v46 = vmul.f32 %v2560_v44, %v2211_v22  ;;  %v2228_v40 = vmul.f32 %v2560_v44, %v2212_v23 }
 0x55f   : > { %vm2229_vm4 = vcmp.gt.f32.partialorder %v2227_v46, 0.0  ;;  %vm2230_vm5 = vcmp.gt.f32.partialorder %v2228_v40, 0.0  ;;  %v2231_v50 = vmul.f32 0.2, %v2227_v46  ;;  %v2232_v47 = vmul.f32 0.2, %v2228_v40 }
 0x561   : > { %v2233_v48 = vsel %vm2229_vm4, %v2227_v46, %v2231_v50  ;;  %v2234_v2 = vsel %vm2230_vm5, %v2228_v40, %v2232_v47 }
 0x562   : > { %2235 = vst.msk [vmem:[%s276_s10] sm:$0xff] %vm1587_vm9, %v2233_v48  ;;  %2236 = vst.msk [vmem:[%s276_s10 + $0x8] sm:$0xff] %vm1587_vm9, %v2234_v2 }
 0x563 PF: > { %s17_s21 = sadd.s32 1, %s2567_s21  }
 0x564   : > { %p14_p4 = scmp.ge.s32.totalorder %s17_s21, 4  }
 0x566   :  { %16 = sbr.rel (!%p14_p4) target bundleno = 1 (0x1), region = 115 }

// kernel: generator_1024v2.7
= control target key start
LH: loop header
LB: loop body
LE: loop exit
PB: predicated region body
PF: predicated region fallthrough
CT: control target
= control target key end

     0   :  { %vm37_vm0 = vcmask 1040384   ;;  %vm108_vm1 = vcmask 1045504   ;;  %vm66_vm2 = vcmask 1046528   ;;  %s1170_s11 = smov 64   ;;  %s1171_s12 = smov 32   ;;  %vm150_vm3 = vcmask 261120   ;;  %s2105_s0 = inlined_call_operand.vmem [shape: f32[2,64,32], index: 0, kind: input, shape index: {}]   ;;  %s2106_s1 = inlined_call_operand.vmem [shape: f32[96,1], index: 1, kind: input, shape index: {}]   ;;  %s2107_s2 = inlined_call_operand.vmem [shape: f32[96,1], index: 2, kind: input, shape index: {}]   ;;  %s2108_s3 = inlined_call_operand.<no memory space> [shape: f32[1,1], index: 3, kind: input, shape index: {}]   ;;  %s2109_s4 = inlined_call_operand.vmem [shape: f32[128,1], index: 4, kind: output, shape index: {0}]   ;;  %s2110_s5 = inlined_call_operand.vmem [shape: f32[128,1], index: 5, kind: output, shape index: {1}]  }
   0x1   :  { %v21_v0 = vld [vmem:[%s2105_s0] sm:$0xff]  ;;  %v22_v1 = vld [vmem:[%s2105_s0 + $0x8] sm:$0xff]  ;;  %v23_v2 = vld [vmem:[%s2105_s0 + $0x10] sm:$0xff]  ;;  %vm159_vm4 = vcmask 523264   ;;  %vm330_vm5 = vcmask 785408   ;;  %vm681_vm6 = vcmask 7168  }
   0x2   :  { %v38_v3 = vrot.slane %v21_v0, 7  ;;  %v39_v4 = vrot.slane %v22_v1, 7  ;;  %v41_v5 = vrot.slane %v23_v2, 7  ;;  %v24_v6 = vld [vmem:[%s2105_s0 + $0x18] sm:$0xff]  ;;  %v25_v7 = vld [vmem:[%s2105_s0 + $0x20] sm:$0xff]  ;;  %v26_v24 = vld [vmem:[%s2105_s0 + $0x28] sm:$0xff] }
   0x3   :  { %v43_v8 = vrot.slane %v24_v6, 7  ;;  %v45_v9 = vrot.slane %v25_v7, 7  ;;  %v323_v21 = vld [vmem:[%s2106_s1 + $0x58] sm:$0xff]  ;;  %v1249_v25 = vld [vmem:[%s2105_s0 + $0x30] sm:$0xff]  ;;  %v47_v33 = vrot.slane %v26_v24, 7  ;;  %v321_v35 = vld [vmem:[%s2106_s1 + $0x48] sm:$0xff] }
   0x4   :  { %v1218_v10 = vsel %vm37_vm0, %v38_v3, %v39_v4  ;;  %v1221_v11 = vsel %vm37_vm0, 0.0, %v38_v3  ;;  %v1224_v12 = vsel %vm37_vm0, %v39_v4, %v41_v5  ;;  %1070 = vmatprep.subr.mxu0 %v323_v21  ;;  %v535_v26 = vld [vmem:[%s2107_s2 + $0x58] sm:$0xff]  ;;  %v322_v27 = vld [vmem:[%s2106_s1 + $0x50] sm:$0xff]  ;;  %v49_v34 = vrot.slane %v1249_v25, 7  ;;  %v533_v36 = vld [vmem:[%s2107_s2 + $0x48] sm:$0xff] }
   0x5   :  { %v109_v13 = vrot.slane %v1221_v11, 2  ;;  %v110_v14 = vrot.slane %v1218_v10, 2  ;;  %v67_v15 = vrot.slane %v1221_v11, 1  ;;  %v68_v16 = vrot.slane %v1218_v10, 1  ;;  %v534_v28 = vld [vmem:[%s2107_s2 + $0x50] sm:$0xff]  ;;  %1118 = vmatprep.subr.mxu1 %v535_v26  ;;  %1071 = vmatpush3.msra.mxu0 %v323_v21  ;;  %v320_v43 = vld [vmem:[%s2106_s1 + $0x40] sm:$0xff] }
   0x6   :  { %v112_v17 = vrot.slane %v1224_v12, 2  ;;  %v70_v18 = vrot.slane %v1224_v12, 1  ;;  %v1233_v19 = vsel %vm37_vm0, %v41_v5, %v43_v8  ;;  %v1236_v20 = vsel %vm37_vm0, %v43_v8, %v45_v9  ;;  %1119 = vmatpush3.msra.mxu1 %v535_v26  ;;  %1072 = vmatprep.subr.mxu0 %v322_v27  ;;  %v532_v44 = vld [vmem:[%s2107_s2 + $0x40] sm:$0xff]  ;;  %v28_v45 = vld [vmem:[%s2105_s0 + $0x38] sm:$0xff]  ;;  %v318_v53 = vld [vmem:[%s2106_s1 + $0x30] sm:$0xff] }
   0x7   :  { %v111_v22 = vsel %vm108_vm1, %v109_v13, %v110_v14  ;;  %v69_v23 = vsel %vm66_vm2, %v67_v15, %v68_v16  ;;  %v72_v31 = vrot.slane %v1233_v19, 1  ;;  %v74_v32 = vrot.slane %v1236_v20, 1  ;;  %1120 = vmatprep.subr.mxu1 %v534_v28  ;;  %1073 = vmatpush3.msra.mxu0 %v322_v27  ;;  %v319_v46 = vld [vmem:[%s2106_s1 + $0x38] sm:$0xff]  ;;  %v530_v54 = vld [vmem:[%s2107_s2 + $0x30] sm:$0xff]  ;;  %v317_v61 = vld [vmem:[%s2106_s1 + $0x28] sm:$0xff] }
   0x8   :  { %126 = vrot.lane.b32.xlu1 %v111_v22, %s1170_s11  ;;  %84 = vrot.lane.b32.xlu0 %v69_v23, %s1171_s12  ;;  %v113_v29 = vsel %vm108_vm1, %v110_v14, %v112_v17  ;;  %v71_v30 = vsel %vm66_vm2, %v68_v16, %v70_v18  ;;  %v114_v39 = vrot.slane %v1233_v19, 2  ;;  %v116_v40 = vrot.slane %v1236_v20, 2  ;;  %v531_v47 = vld [vmem:[%s2107_s2 + $0x38] sm:$0xff]  ;;  %v529_v62 = vld [vmem:[%s2107_s2 + $0x28] sm:$0xff] }
   0x9   :  { %v75_v37 = vsel %vm66_vm2, %v72_v31, %v74_v32  ;;  %v73_v38 = vsel %vm66_vm2, %v70_v18, %v72_v31  ;;  %1121 = vmatpush3.msra.mxu1 %v534_v28  ;;  %v1280_v41 = vsel %vm37_vm0, %v45_v9, %v47_v33  ;;  %v1283_v42 = vsel %vm37_vm0, %v47_v33, %v49_v34  ;;  %v973_v63 = vld [vmem:[%s2105_s0 + $0x40] sm:$0xff]  ;;  %v974_v0 = vld [vmem:[%s2105_s0 + $0x48] sm:$0xff]  ;;  %v1337_v1 = vld [vmem:[%s2105_s0 + $0x50] sm:$0xff] }
   0xa   :  { %1074 = vmatprep.subr.mxu0 %v321_v35  ;;  %1122 = vmatprep.subr.mxu1 %v533_v36  ;;  %v117_v48 = vsel %vm108_vm1, %v114_v39, %v116_v40  ;;  %v115_v49 = vsel %vm108_vm1, %v112_v17, %v114_v39  ;;  %v76_v50 = vrot.slane %v1280_v41, 1  ;;  %v78_v51 = vrot.slane %v1283_v42, 1  ;;  %v316_v2 = vld [vmem:[%s2106_s1 + $0x20] sm:$0xff]  ;;  %v315_v14 = vld [vmem:[%s2106_s1 + $0x18] sm:$0xff]  ;;  %v314_v25 = vld [vmem:[%s2106_s1 + $0x10] sm:$0xff] }
   0xb   :  { %1075 = vmatpush3.msra.mxu0 %v321_v35  ;;  %1123 = vmatpush3.msra.mxu1 %v533_v36  ;;  %v51_v52 = vrot.slane %v28_v45, 7  ;;  %v118_v57 = vrot.slane %v1280_v41, 2  ;;  %v120_v58 = vrot.slane %v1283_v42, 2  ;;  %v528_v3 = vld [vmem:[%s2107_s2 + $0x20] sm:$0xff]  ;;  %v185_v8 = vrot.slane %v973_v63, 7  ;;  %v527_v15 = vld [vmem:[%s2107_s2 + $0x18] sm:$0xff] }
   0xc   :  { %128 = vrot.lane.b32.xlu1 %v113_v29, %s1170_s11  ;;  %86 = vrot.lane.b32.xlu0 %v71_v30, %s1171_s12  ;;  %v79_v55 = vsel %vm66_vm2, %v76_v50, %v78_v51  ;;  %v77_v56 = vsel %vm66_vm2, %v74_v32, %v76_v50  ;;  %v186_v9 = vrot.slane %v974_v0, 7  ;;  %v188_v13 = vrot.slane %v1337_v1, 7  ;;  %v526_v26 = vld [vmem:[%s2107_s2 + $0x10] sm:$0xff]  ;;  %v976_v27 = vld [vmem:[%s2105_s0 + $0x58] sm:$0xff] }
   0xd   :  { %1076 = vmatprep.subr.mxu0 %v320_v43  ;;  %1124 = vmatprep.subr.mxu1 %v532_v44  ;;  %v1319_v59 = vsel %vm37_vm0, %v49_v34, %v51_v52  ;;  %v63_v60 = vsel %vm37_vm0, %v51_v52, 0.0  ;;  %v121_v4 = vsel %vm108_vm1, %v118_v57, %v120_v58  ;;  %v119_v5 = vsel %vm108_vm1, %v116_v40, %v118_v57  ;;  %v977_v28 = vld [vmem:[%s2105_s0 + $0x60] sm:$0xff]  ;;  %v313_v30 = vld [vmem:[%s2106_s1 + $0x8] sm:$0xff]  ;;  %v979_v50 = vld [vmem:[%s2105_s0 + $0x70] sm:$0xff] }
   0xe   :  { %1077 = vmatpush3.msra.mxu0 %v320_v43  ;;  %1125 = vmatpush3.msra.mxu1 %v532_v44  ;;  %v80_v6 = vrot.slane %v1319_v59, 1  ;;  %v82_v7 = vrot.slane %v63_v60, 1  ;;  %v122_v16 = vrot.slane %v1319_v59, 2  ;;  %v124_v17 = vrot.slane %v63_v60, 2  ;;  %v525_v31 = vld [vmem:[%s2107_s2 + $0x8] sm:$0xff]  ;;  %v524_v39 = vld [vmem:[%s2107_s2] sm:$0xff] }
   0xf   :  { %1078 = vmatprep.subr.mxu0 %v319_v46  ;;  %1126 = vmatprep.subr.mxu1 %v531_v47  ;;  %v1363_v22 = vsel %vm37_vm0, %v185_v8, %v186_v9  ;;  %v1366_v23 = vsel %vm37_vm0, %v186_v9, %v188_v13  ;;  %v1369_v24 = vsel %vm37_vm0, 0.0, %v185_v8  ;;  %v190_v36 = vrot.slane %v976_v27, 7  ;;  %v980_v0 = vld [vmem:[%s2105_s0 + $0x78] sm:$0xff] }
  0x10   :  { %90 = vrot.lane.b32.xlu1 %v75_v37, %s1171_s12  ;;  %88 = vrot.lane.b32.xlu0 %v73_v38, %s1171_s12  ;;  %v83_v18 = vsel %vm66_vm2, %v80_v6, %v82_v7  ;;  %v81_v21 = vsel %vm66_vm2, %v78_v51, %v80_v6  ;;  %v125_v29 = vsel %vm108_vm1, %v122_v16, %v124_v17  ;;  %v214_v33 = vrot.slane %v1363_v22, 1  ;;  %v312_v38 = vld [vmem:[%s2106_s1] sm:$0xff] }
  0x11   :  { %1079 = vmatpush3.msra.mxu0 %v319_v46  ;;  %1127 = vmatpush3.msra.mxu1 %v531_v47  ;;  %v123_v32 = vsel %vm108_vm1, %v120_v58, %v122_v16  ;;  %v216_v34 = vrot.slane %v1366_v23, 1  ;;  %v213_v35 = vrot.slane %v1369_v24, 1  ;;  %v192_v37 = vrot.slane %v977_v28, 7 }
  0x12   :  { %1080 = vmatprep.subr.mxu0 %v318_v53  ;;  %1128 = vmatprep.subr.mxu1 %v530_v54  ;;  %v255_v40 = vrot.slane %v1363_v22, 2  ;;  %v257_v45 = vrot.slane %v1366_v23, 2  ;;  %v254_v46 = vrot.slane %v1369_v24, 2  ;;  %v1410_v47 = vsel %vm37_vm0, %v188_v13, %v190_v36 }
  0x13   :  { %1081 = vmatpush3.msra.mxu0 %v318_v53  ;;  %1129 = vmatpush3.msra.mxu1 %v530_v54  ;;  %v217_v43 = vsel %vm66_vm2, %v214_v33, %v216_v34  ;;  %v215_v44 = vsel %vm66_vm2, %v213_v35, %v214_v33  ;;  %v218_v53 = vrot.slane %v1410_v47, 1  ;;  %v259_v60 = vrot.slane %v1410_v47, 2 }
  0x14   :  { %132 = vrot.lane.b32.xlu1 %v117_v48, %s1170_s11  ;;  %130 = vrot.lane.b32.xlu0 %v115_v49, %s1170_s11  ;;  %v1413_v48 = vsel %vm37_vm0, %v190_v36, %v192_v37  ;;  %v978_v49 = vld [vmem:[%s2105_s0 + $0x68] sm:$0xff]  ;;  %v258_v51 = vsel %vm108_vm1, %v255_v40, %v257_v45  ;;  %v256_v52 = vsel %vm108_vm1, %v254_v46, %v255_v40 }
  0x15   :  { %1082 = vmatprep.subr.mxu0 %v317_v61  ;;  %1130 = vmatprep.subr.mxu1 %v529_v62  ;;  %v220_v54 = vrot.slane %v1413_v48, 1  ;;  %v219_v58 = vsel %vm66_vm2, %v216_v34, %v218_v53 }
  0x16   :  { %1083 = vmatpush3.msra.mxu0 %v317_v61  ;;  %1131 = vmatpush3.msra.mxu1 %v529_v62  ;;  %v261_v61 = vrot.slane %v1413_v48, 2 }
  0x17   :  { %1084 = vmatprep.subr.mxu0 %v316_v2  ;;  %1132 = vmatprep.subr.mxu1 %v528_v3  ;;  %v221_v57 = vsel %vm66_vm2, %v218_v53, %v220_v54 }
  0x18   :  { %94 = vrot.lane.b32.xlu1 %v79_v55, %s1171_s12  ;;  %92 = vrot.lane.b32.xlu0 %v77_v56, %s1171_s12  ;;  %v194_v55 = vrot.slane %v978_v49, 7  ;;  %v196_v56 = vrot.slane %v979_v50, 7  ;;  %v262_v1 = vsel %vm108_vm1, %v259_v60, %v261_v61 }
  0x19   :  { %1085 = vmatpush3.msra.mxu0 %v316_v2  ;;  %1133 = vmatpush3.msra.mxu1 %v528_v3  ;;  %v260_v2 = vsel %vm108_vm1, %v257_v45, %v259_v60 }
  0x1a   :  { %1086 = vmatprep.subr.mxu0 %v315_v14  ;;  %1134 = vmatprep.subr.mxu1 %v527_v15  ;;  %v1434_v62 = vsel %vm37_vm0, %v192_v37, %v194_v55  ;;  %v1437_v63 = vsel %vm37_vm0, %v194_v55, %v196_v56 }
  0x1b   :  { %1087 = vmatpush3.msra.mxu0 %v315_v14  ;;  %1135 = vmatpush3.msra.mxu1 %v527_v15  ;;  %v222_v3 = vrot.slane %v1434_v62, 1  ;;  %v263_v8 = vrot.slane %v1434_v62, 2  ;;  %v265_v9 = vrot.slane %v1437_v63, 2 }
  0x1c   :  { %136 = vrot.lane.b32.xlu1 %v121_v4, %s1170_s11  ;;  %134 = vrot.lane.b32.xlu0 %v119_v5, %s1170_s11  ;;  %v224_v4 = vrot.slane %v1437_v63, 1  ;;  %v198_v5 = vrot.slane %v980_v0, 7 }
  0x1d   :  { %1088 = vmatprep.subr.mxu0 %v314_v25  ;;  %1136 = vmatprep.subr.mxu1 %v526_v26  ;;  %v223_v7 = vsel %vm66_vm2, %v220_v54, %v222_v3  ;;  %v266_v15 = vsel %vm108_vm1, %v263_v8, %v265_v9  ;;  %v264_v16 = vsel %vm108_vm1, %v261_v61, %v263_v8 }
  0x1e   :  { %1089 = vmatpush3.msra.mxu0 %v314_v25  ;;  %1137 = vmatpush3.msra.mxu1 %v526_v26  ;;  %v225_v6 = vsel %vm66_vm2, %v222_v3, %v224_v4  ;;  %v1455_v13 = vsel %vm37_vm0, %v196_v56, %v198_v5  ;;  %v210_v14 = vsel %vm37_vm0, %v198_v5, 0.0 }
  0x1f   :  { %1090 = vmatprep.subr.mxu0 %v313_v30  ;;  %1138 = vmatprep.subr.mxu1 %v525_v31  ;;  %v226_v17 = vrot.slane %v1455_v13, 1  ;;  %v267_v27 = vrot.slane %v1455_v13, 2  ;;  %v269_v28 = vrot.slane %v210_v14, 2 }
  0x20   :  { %98 = vrot.lane.b32.xlu1 %v83_v18, %s1171_s12  ;;  %96 = vrot.lane.b32.xlu0 %v81_v21, %s1171_s12  ;;  %v228_v18 = vrot.slane %v210_v14, 1  ;;  %v11_v21 = vstv %s2108_s3 }
  0x21   :  { %1091 = vmatpush3.msra.mxu0 %v313_v30  ;;  %1139 = vmatpush3.msra.mxu1 %v525_v31  ;;  %12 = vst [vmem:[#allocation2] sm:$0x1] %v11_v21  ;;  %v227_v26 = vsel %vm66_vm2, %v224_v4, %v226_v17  ;;  %v268_v30 = vsel %vm108_vm1, %v265_v9, %v267_v27 }
  0x22   :  { %1092 = vmatprep.subr.mxu0 %v312_v38  ;;  %1140 = vmatprep.subr.mxu1 %v524_v39  ;;  %v229_v25 = vsel %vm66_vm2, %v226_v17, %v228_v18 }
  0x23   :  { %1093 = vmatpush3.msra.mxu0 %v312_v38  ;;  %1141 = vmatpush3.msra.mxu1 %v524_v39 }
  0x24   :  { %140 = vrot.lane.b32.xlu1 %v125_v29, %s1170_s11  ;;  %138 = vrot.lane.b32.xlu0 %v123_v32, %s1170_s11  ;;  %v270_v29 = vsel %vm108_vm1, %v267_v27, %v269_v28 }
  0x28   :  { %232 = vrot.lane.b32.xlu1 %v217_v43, %s1171_s12  ;;  %230 = vrot.lane.b32.xlu0 %v215_v44, %s1171_s12 }
  0x2c   :  { %273 = vrot.lane.b32.xlu1 %v258_v51, %s1170_s11  ;;  %271 = vrot.lane.b32.xlu0 %v256_v52, %s1170_s11 }
  0x30   :  { %236 = vrot.lane.b32.xlu1 %v221_v57, %s1171_s12  ;;  %234 = vrot.lane.b32.xlu0 %v219_v58, %s1171_s12 }
  0x34   :  { %277 = vrot.lane.b32.xlu1 %v262_v1, %s1170_s11  ;;  %275 = vrot.lane.b32.xlu0 %v260_v2, %s1170_s11 }
  0x38   :  { %240 = vrot.lane.b32.xlu1 %v225_v6, %s1171_s12  ;;  %238 = vrot.lane.b32.xlu0 %v223_v7, %s1171_s12 }
  0x3c   :  { %281 = vrot.lane.b32.xlu1 %v266_v15, %s1170_s11  ;;  %279 = vrot.lane.b32.xlu0 %v264_v16, %s1170_s11 }
  0x40   :  { %244 = vrot.lane.b32.xlu1 %v229_v25, %s1171_s12  ;;  %242 = vrot.lane.b32.xlu0 %v227_v26, %s1171_s12 }
  0x44   :  { %285 = vrot.lane.b32.xlu1 %v270_v29, %s1170_s11  ;;  %283 = vrot.lane.b32.xlu0 %v268_v30, %s1170_s11 }
  0x7a   :  { %v127_v31 = vpop.permute.xlu1 %126  ;;  %v85_v32 = vpop.permute.xlu0 %84 }
  0x7b   :  { %v151_v33 = vsel %vm150_vm3, %v1221_v11, %v85_v32 }
  0x7c   :  { %v160_v34 = vsel %vm159_vm4, %v151_v33, %v127_v31 }
  0x7d   :  { %1094 = vmatprep.mubr.msk.f32.mxu0 %vm330_vm5, %v160_v34  ;;  %1142 = vmatprep.mubr.msk.f32.mxu1 %vm330_vm5, %v160_v34 }
  0x7e   :  { %v129_v35 = vpop.permute.xlu1 %128  ;;  %v87_v36 = vpop.permute.xlu0 %86 }
  0x7f   :  { %v152_v37 = vsel %vm150_vm3, %v1218_v10, %v87_v36 }
  0x80   :  { %v161_v38 = vsel %vm159_vm4, %v152_v37, %v129_v35  ;;  %v1557_v37 = vld [vmem:[#allocation2] ss:$0 sm:$0xff] }
  0x81   :  { %1095 = vmatmul.mubr.msk.f32.vlgmr.msra.gmra.mxu0 %vm330_vm5, %v161_v38  ;;  %1143 = vmatmul.mubr.msk.f32.vlgmr.msra.gmra.mxu1 %vm330_vm5, %v161_v38 }
  0x82   :  { %v91_v39 = vpop.permute.xlu1 %90  ;;  %v89_v40 = vpop.permute.xlu0 %88 }
  0x83   :  { %v154_v11 = vsel %vm150_vm3, %v1233_v19, %v91_v39  ;;  %v153_v43 = vsel %vm150_vm3, %v1224_v12, %v89_v40 }
  0x86   :  { %v133_v44 = vpop.permute.xlu1 %132  ;;  %v131_v45 = vpop.permute.xlu0 %130 }
  0x87   :  { %v163_v46 = vsel %vm159_vm4, %v154_v11, %v133_v44  ;;  %v162_v10 = vsel %vm159_vm4, %v153_v43, %v131_v45 }
  0x88   :  { %1097 = vmatprep.mubr.msk.f32.mxu0 %vm330_vm5, %v162_v10  ;;  %1145 = vmatprep.mubr.msk.f32.mxu1 %vm330_vm5, %v162_v10 }
  0x89   :  { %1098 = vmatmul.mubr.msk.f32.gmra.mxu0 %vm330_vm5, %v163_v46  ;;  %1146 = vmatmul.mubr.msk.f32.gmra.mxu1 %vm330_vm5, %v163_v46 }
  0x8a   :  { %v95_v49 = vpop.permute.xlu1 %94  ;;  %v93_v50 = vpop.permute.xlu0 %92 }
  0x8b   :  { %v156_v19 = vsel %vm150_vm3, %v1280_v41, %v95_v49  ;;  %v155_v12 = vsel %vm150_vm3, %v1236_v20, %v93_v50 }
  0x8e   :  { %v137_v51 = vpop.permute.xlu1 %136  ;;  %v135_v52 = vpop.permute.xlu0 %134 }
  0x8f   :  { %v165_v53 = vsel %vm159_vm4, %v156_v19, %v137_v51  ;;  %v164_v54 = vsel %vm159_vm4, %v155_v12, %v135_v52 }
  0x90   :  { %1100 = vmatprep.mubr.msk.f32.mxu0 %vm330_vm5, %v164_v54  ;;  %1148 = vmatprep.mubr.msk.f32.mxu1 %vm330_vm5, %v164_v54 }
  0x91   :  { %1101 = vmatmul.mubr.msk.f32.gmra.mxu0 %vm330_vm5, %v165_v53  ;;  %1149 = vmatmul.mubr.msk.f32.gmra.mxu1 %vm330_vm5, %v165_v53 }
  0x92   :  { %v99_v55 = vpop.permute.xlu1 %98  ;;  %v97_v56 = vpop.permute.xlu0 %96 }
  0x93   :  { %v158_v41 = vsel %vm150_vm3, %v1319_v59, %v99_v55  ;;  %v157_v20 = vsel %vm150_vm3, %v1283_v42, %v97_v56 }
  0x96   :  { %v141_v57 = vpop.permute.xlu1 %140  ;;  %v139_v58 = vpop.permute.xlu0 %138 }
  0x97   :  { %v167_v60 = vsel %vm159_vm4, %v158_v41, %v141_v57  ;;  %v166_v61 = vsel %vm159_vm4, %v157_v20, %v139_v58 }
  0x98   :  { %1103 = vmatprep.mubr.msk.f32.mxu0 %vm330_vm5, %v166_v61  ;;  %1151 = vmatprep.mubr.msk.f32.mxu1 %vm330_vm5, %v166_v61 }
  0x99   :  { %1104 = vmatmul.mubr.msk.f32.gmra.mxu0 %vm330_vm5, %v167_v60  ;;  %1152 = vmatmul.mubr.msk.f32.gmra.mxu1 %vm330_vm5, %v167_v60 }
  0x9a   :  { %v233_v0 = vpop.permute.xlu1 %232  ;;  %v231_v1 = vpop.permute.xlu0 %230 }
  0x9b   :  { %v296_v59 = vsel %vm150_vm3, %v1363_v22, %v233_v0  ;;  %v295_v42 = vsel %vm150_vm3, %v1369_v24, %v231_v1 }
  0x9e   :  { %v274_v2 = vpop.permute.xlu1 %273  ;;  %v272_v3 = vpop.permute.xlu0 %271 }
  0x9f   :  { %v304_v4 = vsel %vm159_vm4, %v296_v59, %v274_v2  ;;  %v303_v5 = vsel %vm159_vm4, %v295_v42, %v272_v3 }
  0xa0   :  { %1106 = vmatprep.mubr.msk.f32.mxu0 %vm330_vm5, %v303_v5  ;;  %1154 = vmatprep.mubr.msk.f32.mxu1 %vm330_vm5, %v303_v5 }
  0xa1   :  { %1107 = vmatmul.mubr.msk.f32.gmra.mxu0 %vm330_vm5, %v304_v4  ;;  %1155 = vmatmul.mubr.msk.f32.gmra.mxu1 %vm330_vm5, %v304_v4 }
  0xa2   :  { %v237_v6 = vpop.permute.xlu1 %236  ;;  %v235_v7 = vpop.permute.xlu0 %234 }
  0xa3   :  { %v298_v22 = vsel %vm150_vm3, %v1410_v47, %v237_v6  ;;  %v297_v24 = vsel %vm150_vm3, %v1366_v23, %v235_v7 }
  0xa6   :  { %v278_v8 = vpop.permute.xlu1 %277  ;;  %v276_v9 = vpop.permute.xlu0 %275 }
  0xa7   :  { %v306_v14 = vsel %vm159_vm4, %v298_v22, %v278_v8  ;;  %v305_v15 = vsel %vm159_vm4, %v297_v24, %v276_v9 }
  0xa8   :  { %1109 = vmatprep.mubr.msk.f32.mxu0 %vm330_vm5, %v305_v15  ;;  %1157 = vmatprep.mubr.msk.f32.mxu1 %vm330_vm5, %v305_v15 }
  0xa9   :  { %1110 = vmatmul.mubr.msk.f32.gmra.mxu0 %vm330_vm5, %v306_v14  ;;  %1158 = vmatmul.mubr.msk.f32.gmra.mxu1 %vm330_vm5, %v306_v14 }
  0xaa   :  { %v241_v16 = vpop.permute.xlu1 %240  ;;  %v239_v17 = vpop.permute.xlu0 %238 }
  0xab   :  { %v300_v47 = vsel %vm150_vm3, %v1434_v62, %v241_v16  ;;  %v299_v23 = vsel %vm150_vm3, %v1413_v48, %v239_v17 }
  0xae   :  { %v282_v18 = vpop.permute.xlu1 %281  ;;  %v280_v21 = vpop.permute.xlu0 %279 }
  0xaf   :  { %v308_v25 = vsel %vm159_vm4, %v300_v47, %v282_v18  ;;  %v307_v26 = vsel %vm159_vm4, %v299_v23, %v280_v21 }
  0xb0   :  { %1112 = vmatprep.mubr.msk.f32.mxu0 %vm330_vm5, %v307_v26  ;;  %1160 = vmatprep.mubr.msk.f32.mxu1 %vm330_vm5, %v307_v26 }
  0xb1   :  { %1113 = vmatmul.mubr.msk.f32.gmra.mxu0 %vm330_vm5, %v308_v25  ;;  %1161 = vmatmul.mubr.msk.f32.gmra.mxu1 %vm330_vm5, %v308_v25 }
  0xb2   :  { %v245_v27 = vpop.permute.xlu1 %244  ;;  %v243_v28 = vpop.permute.xlu0 %242 }
  0xb3   :  { %v302_v62 = vsel %vm150_vm3, %v1455_v13, %v245_v27  ;;  %v301_v48 = vsel %vm150_vm3, %v1437_v63, %v243_v28 }
  0xb6   :  { %v286_v29 = vpop.permute.xlu1 %285  ;;  %v284_v30 = vpop.permute.xlu0 %283 }
  0xb7   :  { %v310_v31 = vsel %vm159_vm4, %v302_v62, %v286_v29  ;;  %v309_v32 = vsel %vm159_vm4, %v301_v48, %v284_v30 }
  0xb8   :  { %1115 = vmatprep.mubr.msk.f32.mxu0 %vm330_vm5, %v309_v32  ;;  %1163 = vmatprep.mubr.msk.f32.mxu1 %vm330_vm5, %v309_v32 }
  0xb9   :  { %1116 = vmatmul.mubr.msk.f32.gmra.mxu0 %vm330_vm5, %v310_v31  ;;  %1164 = vmatmul.mubr.msk.f32.gmra.mxu1 %vm330_vm5, %v310_v31 }
 0x141   :  { %v1096_v33 = vpop.f32.mrf.mxu0  ;;  %v1144_v34 = vpop.f32.mrf.mxu1 }
 0x142   :  { %v1566_v45 = vadd.f32 %v1096_v33, %v1557_v37  ;;  %v1569_v46 = vadd.f32 %v1144_v34, %v1557_v37 }
 0x143   :  { %v445_v13 = vpop.f32.mrf.mxu0  ;;  %v602_v35 = vpop.f32.mrf.mxu1 }
 0x144   :  { %v1560_v40 = vadd.f32 %v1557_v37, %v445_v13  ;;  %v1563_v11 = vadd.f32 %v1557_v37, %v602_v35  ;;  %v683_v52 = vsel %vm681_vm6, %v1566_v45, 0.0  ;;  %v720_v53 = vsel %vm681_vm6, %v1569_v46, 0.0 }
 0x146   :  { %v682_v50 = vsel %vm681_vm6, %v1560_v40, 0.0  ;;  %v719_v19 = vsel %vm681_vm6, %v1563_v11, 0.0 }
 0x147   :  { %v684_v56 = vadd.f32 %v683_v52, %v682_v50  ;;  %v721_v41 = vadd.f32 %v720_v53, %v719_v19 }
 0x149   :  { %v1099_v36 = vpop.f32.mrf.mxu0  ;;  %v1147_v63 = vpop.f32.mrf.mxu1 }
 0x14a   :  { %v1590_v58 = vadd.f32 %v1099_v36, %v1557_v37  ;;  %v1593_v60 = vadd.f32 %v1147_v63, %v1557_v37 }
 0x14b   :  { %v455_v38 = vpop.f32.mrf.mxu0  ;;  %v612_v39 = vpop.f32.mrf.mxu1 }
 0x14c   :  { %v1572_v10 = vadd.f32 %v1557_v37, %v455_v38  ;;  %v1575_v49 = vadd.f32 %v1557_v37, %v612_v39  ;;  %v687_v3 = vsel %vm681_vm6, %v1590_v58, 0.0  ;;  %v724_v4 = vsel %vm681_vm6, %v1593_v60, 0.0 }
 0x14e   :  { %v685_v54 = vsel %vm681_vm6, %v1572_v10, 0.0  ;;  %v722_v55 = vsel %vm681_vm6, %v1575_v49, 0.0 }
 0x14f   :  { %v686_v1 = vadd.f32 %v685_v54, %v684_v56  ;;  %v723_v59 = vadd.f32 %v722_v55, %v721_v41 }
 0x151   :  { %v1102_v43 = vpop.f32.mrf.mxu0  ;;  %v1150_v44 = vpop.f32.mrf.mxu1  ;;  %v688_v7 = vadd.f32 %v687_v3, %v686_v1  ;;  %v725_v22 = vadd.f32 %v724_v4, %v723_v59 }
 0x152   :  { %v1610_v24 = vadd.f32 %v1102_v43, %v1557_v37  ;;  %v1613_v8 = vadd.f32 %v1150_v44, %v1557_v37 }
 0x153   :  { %v465_v12 = vpop.f32.mrf.mxu0  ;;  %v622_v51 = vpop.f32.mrf.mxu1 }
 0x154   :  { %v1596_v61 = vadd.f32 %v1557_v37, %v465_v12  ;;  %v1599_v0 = vadd.f32 %v1557_v37, %v622_v51  ;;  %v691_v21 = vsel %vm681_vm6, %v1610_v24, 0.0  ;;  %v728_v25 = vsel %vm681_vm6, %v1613_v8, 0.0 }
 0x156   :  { %v689_v5 = vsel %vm681_vm6, %v1596_v61, 0.0  ;;  %v726_v6 = vsel %vm681_vm6, %v1599_v0, 0.0 }
 0x157   :  { %v690_v15 = vadd.f32 %v689_v5, %v688_v7  ;;  %v727_v16 = vadd.f32 %v726_v6, %v725_v22 }
 0x159   :  { %v1105_v20 = vpop.f32.mrf.mxu0  ;;  %v1153_v57 = vpop.f32.mrf.mxu1  ;;  %v692_v28 = vadd.f32 %v691_v21, %v690_v15  ;;  %v729_v62 = vadd.f32 %v728_v25, %v727_v16 }
 0x15a   :  { %v1630_v48 = vadd.f32 %v1105_v20, %v1557_v37  ;;  %v1633_v29 = vadd.f32 %v1153_v57, %v1557_v37 }
 0x15b   :  { %v475_v42 = vpop.f32.mrf.mxu0  ;;  %v632_v2 = vpop.f32.mrf.mxu1 }
 0x15c   :  { %v1616_v9 = vadd.f32 %v1557_v37, %v475_v42  ;;  %v1619_v14 = vadd.f32 %v1557_v37, %v632_v2  ;;  %v695_v35 = vsel %vm681_vm6, %v1630_v48, 0.0  ;;  %v732_v36 = vsel %vm681_vm6, %v1633_v29, 0.0 }
 0x15e   :  { %v693_v26 = vsel %vm681_vm6, %v1616_v9, 0.0  ;;  %v730_v27 = vsel %vm681_vm6, %v1619_v14, 0.0 }
 0x15f   :  { %v694_v32 = vadd.f32 %v693_v26, %v692_v28  ;;  %v731_v33 = vadd.f32 %v730_v27, %v729_v62 }
 0x161   :  { %v1108_v17 = vpop.f32.mrf.mxu0  ;;  %v1156_v47 = vpop.f32.mrf.mxu1  ;;  %v696_v39 = vadd.f32 %v695_v35, %v694_v32  ;;  %v733_v43 = vadd.f32 %v732_v36, %v731_v33 }
 0x162   :  { %v1650_v19 = vadd.f32 %v1108_v17, %v1557_v37  ;;  %v1653_v12 = vadd.f32 %v1156_v47, %v1557_v37 }
 0x163   :  { %v485_v23 = vpop.f32.mrf.mxu0  ;;  %v642_v18 = vpop.f32.mrf.mxu1 }
 0x164   :  { %v1636_v30 = vadd.f32 %v1557_v37, %v485_v23  ;;  %v1639_v31 = vadd.f32 %v1557_v37, %v642_v18  ;;  %v699_v55 = vsel %vm681_vm6, %v1650_v19, 0.0  ;;  %v736_v56 = vsel %vm681_vm6, %v1653_v12, 0.0 }
 0x166   :  { %v697_v63 = vsel %vm681_vm6, %v1636_v30, 0.0  ;;  %v734_v38 = vsel %vm681_vm6, %v1639_v31, 0.0 }
 0x167   :  { %v698_v53 = vadd.f32 %v697_v63, %v696_v39  ;;  %v735_v54 = vadd.f32 %v734_v38, %v733_v43 }
 0x169   :  { %v1111_v34 = vpop.f32.mrf.mxu0  ;;  %v1159_v13 = vpop.f32.mrf.mxu1  ;;  %v700_v57 = vadd.f32 %v699_v55, %v698_v53  ;;  %v737_v1 = vadd.f32 %v736_v56, %v735_v54 }
 0x16a   :  { %v1670_v2 = vadd.f32 %v1111_v34, %v1557_v37  ;;  %v1673_v3 = vadd.f32 %v1159_v13, %v1557_v37 }
 0x16b   :  { %v495_v44 = vpop.f32.mrf.mxu0  ;;  %v652_v50 = vpop.f32.mrf.mxu1 }
 0x16c   :  { %v1656_v51 = vadd.f32 %v1557_v37, %v495_v44  ;;  %v1659_v52 = vadd.f32 %v1557_v37, %v652_v50  ;;  %v703_v16 = vsel %vm681_vm6, %v1670_v2, 0.0  ;;  %v740_v17 = vsel %vm681_vm6, %v1673_v3, 0.0 }
 0x16e   :  { %v701_v41 = vsel %vm681_vm6, %v1656_v51, 0.0  ;;  %v738_v20 = vsel %vm681_vm6, %v1659_v52, 0.0 }
 0x16f   :  { %v702_v4 = vadd.f32 %v701_v41, %v700_v57  ;;  %v739_v5 = vadd.f32 %v738_v20, %v737_v1 }
 0x171   :  { %v1114_v59 = vpop.f32.mrf.mxu0  ;;  %v1162_v42 = vpop.f32.mrf.mxu1  ;;  %v704_v25 = vadd.f32 %v703_v16, %v702_v4  ;;  %v741_v26 = vadd.f32 %v740_v17, %v739_v5 }
 0x172   :  { %v1690_v18 = vadd.f32 %v1114_v59, %v1557_v37  ;;  %v1693_v21 = vadd.f32 %v1162_v42, %v1557_v37 }
 0x173   :  { %v505_v6 = vpop.f32.mrf.mxu0  ;;  %v662_v7 = vpop.f32.mrf.mxu1 }
 0x174   :  { %v1676_v22 = vadd.f32 %v1557_v37, %v505_v6  ;;  %v1679_v15 = vadd.f32 %v1557_v37, %v662_v7  ;;  %v707_v33 = vsel %vm681_vm6, %v1690_v18, 0.0  ;;  %v744_v34 = vsel %vm681_vm6, %v1693_v21, 0.0 }
 0x176   :  { %v705_v47 = vsel %vm681_vm6, %v1676_v22, 0.0  ;;  %v742_v23 = vsel %vm681_vm6, %v1679_v15, 0.0 }
 0x177   :  { %v706_v27 = vadd.f32 %v705_v47, %v704_v25  ;;  %v743_v28 = vadd.f32 %v742_v23, %v741_v26 }
 0x179   :  { %v1117_v62 = vpop.f32.mrf.mxu0  ;;  %v1165_v32 = vpop.f32.mrf.mxu1  ;;  %v708_v43 = vadd.f32 %v707_v33, %v706_v27  ;;  %v745_v44 = vadd.f32 %v744_v34, %v743_v28 }
 0x17a   :  { %v1700_v36 = vadd.f32 %v1117_v62, %v1557_v37  ;;  %v1703_v63 = vadd.f32 %v1165_v32, %v1557_v37 }
 0x17b   :  { %v515_v13 = vpop.f32.mrf.mxu0  ;;  %v672_v35 = vpop.f32.mrf.mxu1 }
 0x17c   :  { %v1706_v38 = vadd.f32 %v1557_v37, %v515_v13  ;;  %v1709_v39 = vadd.f32 %v1557_v37, %v672_v35  ;;  %v711_v56 = vsel %vm681_vm6, %v1700_v36, 0.0  ;;  %v748_v41 = vsel %vm681_vm6, %v1703_v63, 0.0 }
 0x17e   :  { %v709_v50 = vsel %vm681_vm6, %v1706_v38, 0.0  ;;  %v746_v53 = vsel %vm681_vm6, %v1709_v39, 0.0 }
 0x17f   :  { %v710_v54 = vadd.f32 %v709_v50, %v708_v43  ;;  %v747_v55 = vadd.f32 %v746_v53, %v745_v44 }
 0x181   :  { %v712_v20 = vadd.f32 %v711_v56, %v710_v54  ;;  %v749_v57 = vadd.f32 %v748_v41, %v747_v55 }
 0x183   :  { %v713_v37 = vrot.slane %v712_v20, 4  ;;  %v750_v1 = vrot.slane %v749_v57, 4 }
 0x185   :  { %v714_v59 = vadd.f32 %v713_v37, %v712_v20  ;;  %v751_v42 = vadd.f32 %v750_v1, %v749_v57 }
 0x187   :  { %v715_v4 = vrot.slane %v714_v59, 2  ;;  %v752_v5 = vrot.slane %v751_v42, 2 }
 0x189   :  { %v716_v6 = vadd.f32 %v715_v4, %v714_v59  ;;  %v753_v7 = vadd.f32 %v752_v5, %v751_v42 }
 0x18b   :  { %v717_v16 = vrot.slane %v716_v6, 1  ;;  %v754_v17 = vrot.slane %v753_v7, 1 }
 0x18d   :  { %v718_v47 = vadd.f32 %v717_v16, %v716_v6  ;;  %v755_v23 = vadd.f32 %v754_v17, %v753_v7 }
 0x18f   :  { %v756_v25 = vadd.f32 %v755_v23, %v718_v47 }
 0x191   :  { %v1719_v26 = vmul.f32 0.00390625, %v756_v25 }
 0x193   :  { %v1723_v27 = vsub.f32 %v1560_v40, %v1719_v26  ;;  %v1727_v28 = vsub.f32 %v1566_v45, %v1719_v26  ;;  %v1731_v62 = vsub.f32 %v1572_v10, %v1719_v26  ;;  %v1735_v32 = vsub.f32 %v1590_v58, %v1719_v26 }
 0x194   :  { %v1743_v40 = vsub.f32 %v1596_v61, %v1719_v26  ;;  %v1749_v10 = vsub.f32 %v1610_v24, %v1719_v26  ;;  %v1757_v44 = vsub.f32 %v1616_v9, %v1719_v26  ;;  %v1764_v24 = vsub.f32 %v1630_v48, %v1719_v26 }
 0x195   :  { %v775_v33 = vmul.f32 %v1723_v27, %v1723_v27  ;;  %v776_v34 = vmul.f32 %v1727_v28, %v1727_v28  ;;  %v777_v45 = vmul.f32 %v1731_v62, %v1731_v62  ;;  %v778_v58 = vmul.f32 %v1735_v32, %v1735_v32 }
 0x196   :  { %v779_v61 = vmul.f32 %v1743_v40, %v1743_v40  ;;  %v780_v54 = vmul.f32 %v1749_v10, %v1749_v10  ;;  %v1771_v9 = vsub.f32 %v1563_v11, %v1719_v26  ;;  %v1775_v41 = vsub.f32 %v1636_v30, %v1719_v26 }
 0x197   :  { %v791_v13 = vsel %vm681_vm6, %v775_v33, 0.0  ;;  %v792_v35 = vsel %vm681_vm6, %v776_v34, 0.0  ;;  %v794_v50 = vsel %vm681_vm6, %v777_v45, 0.0  ;;  %v796_v55 = vsel %vm681_vm6, %v778_v58, 0.0 }
 0x198   :  { %v793_v43 = vadd.f32 %v792_v35, %v791_v13  ;;  %v781_v20 = vmul.f32 %v1757_v44, %v1757_v44  ;;  %v798_v48 = vsel %vm681_vm6, %v779_v61, 0.0  ;;  %v1782_v57 = vsub.f32 %v1569_v46, %v1719_v26 }
 0x199   :  { %v1786_v1 = vsub.f32 %v1650_v19, %v1719_v26  ;;  %v782_v11 = vmul.f32 %v1764_v24, %v1764_v24  ;;  %v800_v30 = vsel %vm681_vm6, %v780_v54, 0.0  ;;  %v1793_v59 = vsub.f32 %v1575_v49, %v1719_v26 }
 0x19a   :  { %v795_v53 = vadd.f32 %v794_v50, %v793_v43  ;;  %v1797_v42 = vsub.f32 %v1656_v51, %v1719_v26  ;;  %v844_v4 = vmul.f32 %v1771_v9, %v1771_v9  ;;  %v783_v19 = vmul.f32 %v1775_v41, %v1775_v41 }
 0x19b   :  { %v802_v5 = vsel %vm681_vm6, %v781_v20, 0.0  ;;  %v1806_v6 = vsub.f32 %v1593_v60, %v1719_v26  ;;  %v845_v49 = vmul.f32 %v1782_v57, %v1782_v57  ;;  %v1812_v51 = vsub.f32 %v1670_v2, %v1719_v26 }
 0x19c   :  { %v797_v56 = vadd.f32 %v796_v55, %v795_v53  ;;  %v784_v16 = vmul.f32 %v1786_v1, %v1786_v1  ;;  %v804_v17 = vsel %vm681_vm6, %v782_v11, 0.0  ;;  %v1819_v47 = vsub.f32 %v1599_v0, %v1719_v26 }
 0x19d   :  { %v846_v60 = vmul.f32 %v1793_v59, %v1793_v59  ;;  %v1825_v23 = vsub.f32 %v1676_v22, %v1719_v26  ;;  %v785_v2 = vmul.f32 %v1797_v42, %v1797_v42  ;;  %v860_v33 = vsel %vm681_vm6, %v844_v4, 0.0 }
 0x19e   :  { %v799_v37 = vadd.f32 %v798_v48, %v797_v56  ;;  %v806_v34 = vsel %vm681_vm6, %v783_v19, 0.0  ;;  %v1833_v45 = vsub.f32 %v1613_v8, %v1719_v26  ;;  %v847_v0 = vmul.f32 %v1806_v6, %v1806_v6 }
 0x19f   :  { %v861_v58 = vsel %vm681_vm6, %v845_v49, 0.0  ;;  %v1840_v22 = vsub.f32 %v1690_v18, %v1719_v26  ;;  %v786_v13 = vmul.f32 %v1812_v51, %v1812_v51  ;;  %v808_v61 = vsel %vm681_vm6, %v784_v16, 0.0 }
 0x1a0   :  { %v801_v46 = vadd.f32 %v800_v30, %v799_v37  ;;  %v862_v43 = vadd.f32 %v861_v58, %v860_v33  ;;  %v1847_v8 = vsub.f32 %v1619_v14, %v1719_v26  ;;  %v848_v50 = vmul.f32 %v1819_v47, %v1819_v47 }
 0x1a1   :  { %v863_v53 = vsel %vm681_vm6, %v846_v60, 0.0  ;;  %v1854_v18 = vsub.f32 %v1706_v38, %v1719_v26  ;;  %v787_v54 = vmul.f32 %v1825_v23, %v1825_v23  ;;  %v810_v20 = vsel %vm681_vm6, %v785_v2, 0.0 }
 0x1a2   :  { %v803_v7 = vadd.f32 %v802_v5, %v801_v46  ;;  %v864_v56 = vadd.f32 %v863_v53, %v862_v43  ;;  %v1861_v14 = vsub.f32 %v1633_v29, %v1719_v26  ;;  %v849_v48 = vmul.f32 %v1833_v45, %v1833_v45 }
 0x1a3   :  { %v865_v37 = vsel %vm681_vm6, %v847_v0, 0.0  ;;  %v1868_v38 = vsub.f32 %v1700_v36, %v1719_v26  ;;  %v788_v11 = vmul.f32 %v1840_v22, %v1840_v22  ;;  %v812_v4 = vsel %vm681_vm6, %v786_v13, 0.0 }
 0x1a4   :  { %v805_v25 = vadd.f32 %v804_v17, %v803_v7  ;;  %v866_v46 = vadd.f32 %v865_v37, %v864_v56  ;;  %v1875_v29 = vsub.f32 %v1639_v31, %v1719_v26  ;;  %v850_v19 = vmul.f32 %v1847_v8, %v1847_v8 }
 0x1a5   :  { %v867_v5 = vsel %vm681_vm6, %v848_v50, 0.0  ;;  %v789_v36 = vmul.f32 %v1854_v18, %v1854_v18  ;;  %v814_v16 = vsel %vm681_vm6, %v787_v54, 0.0  ;;  %v1885_v17 = vsub.f32 %v1653_v12, %v1719_v26 }
 0x1a6   :  { %v807_v35 = vadd.f32 %v806_v34, %v805_v25  ;;  %v868_v7 = vadd.f32 %v867_v5, %v866_v46  ;;  %v851_v31 = vmul.f32 %v1861_v14, %v1861_v14  ;;  %v869_v60 = vsel %vm681_vm6, %v849_v48, 0.0 }
 0x1a7   :  { %v790_v2 = vmul.f32 %v1868_v38, %v1868_v38  ;;  %v816_v34 = vsel %vm681_vm6, %v788_v11, 0.0  ;;  %v1895_v0 = vsub.f32 %v1659_v52, %v1719_v26  ;;  %v852_v12 = vmul.f32 %v1875_v29, %v1875_v29 }
 0x1a8   :  { %v809_v55 = vadd.f32 %v808_v61, %v807_v35  ;;  %v870_v33 = vadd.f32 %v869_v60, %v868_v7  ;;  %v871_v58 = vsel %vm681_vm6, %v850_v19, 0.0  ;;  %v818_v43 = vsel %vm681_vm6, %v789_v36, 0.0 }
 0x1a9   :  { %v1903_v61 = vsub.f32 %v1673_v3, %v1719_v26  ;;  %v853_v50 = vmul.f32 %v1885_v17, %v1885_v17  ;;  %v873_v53 = vsel %vm681_vm6, %v851_v31, 0.0  ;;  %v1911_v56 = vsub.f32 %v1679_v15, %v1719_v26 }
 0x1aa   :  { %v811_v30 = vadd.f32 %v810_v20, %v809_v55  ;;  %v872_v35 = vadd.f32 %v871_v58, %v870_v33  ;;  %v820_v55 = vsel %vm681_vm6, %v790_v2, 0.0  ;;  %v854_v20 = vmul.f32 %v1895_v0, %v1895_v0 }
 0x1ab   :  { %v875_v48 = vsel %vm681_vm6, %v852_v12, 0.0  ;;  %v1918_v11 = vsub.f32 %v1693_v21, %v1719_v26  ;;  %v877_v46 = vsel %vm681_vm6, %v853_v50, 0.0  ;;  %v1925_v15 = vsub.f32 %v1709_v39, %v1719_v26 }
 0x1ac   :  { %v813_v49 = vadd.f32 %v812_v4, %v811_v30  ;;  %v874_v54 = vadd.f32 %v873_v53, %v872_v35  ;;  %v855_v30 = vmul.f32 %v1903_v61, %v1903_v61  ;;  %v856_v19 = vmul.f32 %v1911_v56, %v1911_v56 }
 0x1ad   :  { %v879_v5 = vsel %vm681_vm6, %v854_v20, 0.0  ;;  %v1932_v21 = vsub.f32 %v1703_v63, %v1719_v26  ;;  %v857_v7 = vmul.f32 %v1918_v11, %v1918_v11  ;;  %v858_v39 = vmul.f32 %v1925_v15, %v1925_v15 }
 0x1ae   :  { %v815_v25 = vadd.f32 %v814_v16, %v813_v49  ;;  %v876_v37 = vadd.f32 %v875_v48, %v874_v54  ;;  %v881_v16 = vsel %vm681_vm6, %v855_v30, 0.0  ;;  %v883_v60 = vsel %vm681_vm6, %v856_v19, 0.0 }
 0x1af   :  { %v859_v33 = vmul.f32 %v1932_v21, %v1932_v21  ;;  %v887_v26 = vsel %vm681_vm6, %v858_v39, 0.0 }
 0x1b0   :  { %v817_v13 = vadd.f32 %v816_v34, %v815_v25  ;;  %v878_v4 = vadd.f32 %v877_v46, %v876_v37  ;;  %v885_v34 = vsel %vm681_vm6, %v857_v7, 0.0 }
 0x1b2   :  { %v819_v52 = vadd.f32 %v818_v43, %v817_v13  ;;  %v880_v49 = vadd.f32 %v879_v5, %v878_v4  ;;  %v889_v13 = vsel %vm681_vm6, %v859_v33, 0.0 }
 0x1b4   :  { %v821_v3 = vadd.f32 %v820_v55, %v819_v52  ;;  %v882_v31 = vadd.f32 %v881_v16, %v880_v49 }
 0x1b6   :  { %v822_v36 = vrot.slane %v821_v3, 4  ;;  %v884_v25 = vadd.f32 %v883_v60, %v882_v31 }
 0x1b8   :  { %v823_v2 = vadd.f32 %v822_v36, %v821_v3  ;;  %v886_v63 = vadd.f32 %v885_v34, %v884_v25 }
 0x1ba   :  { %v824_v12 = vrot.slane %v823_v2, 2  ;;  %v888_v58 = vadd.f32 %v887_v26, %v886_v63 }
 0x1bc   :  { %v890_v35 = vadd.f32 %v889_v13, %v888_v58  ;;  %v825_v43 = vadd.f32 %v824_v12, %v823_v2 }
 0x1be   :  { %v891_v50 = vrot.slane %v890_v35, 4  ;;  %v826_v52 = vrot.slane %v825_v43, 1 }
 0x1c0   :  { %v892_v53 = vadd.f32 %v891_v50, %v890_v35  ;;  %v827_v20 = vadd.f32 %v826_v52, %v825_v43 }
 0x1c2   :  { %v893_v54 = vrot.slane %v892_v53, 2 }
 0x1c4   :  { %v894_v55 = vadd.f32 %v893_v54, %v892_v53 }
 0x1c6   :  { %v895_v48 = vrot.slane %v894_v55, 1 }
 0x1c8   :  { %v896_v3 = vadd.f32 %v895_v48, %v894_v55 }
 0x1ca   :  { %v897_v37 = vadd.f32 %v896_v3, %v827_v20 }
 0x1cc   :  { %v898_v30 = vmul.f32 0.00390625, %v897_v37 }
 0x1ce   :  { %v899_v46 = vadd.f32 1e-05, %v898_v30 }
 0x1d0   :  { %1168 = vrsqrt.f32 %v899_v46 }
 0x1dd   :  { %v1169_v4 = vpop.eup %1168 }
 0x1de   :  { %v901_v19 = vmul.f32 %v1169_v4, %v1723_v27  ;;  %v902_v5 = vmul.f32 %v1169_v4, %v1727_v28  ;;  %v903_v36 = vmul.f32 %v1169_v4, %v1731_v62  ;;  %v904_v49 = vmul.f32 %v1169_v4, %v1735_v32 }
 0x1df   :  { %v905_v7 = vmul.f32 %v1169_v4, %v1743_v40  ;;  %v906_v16 = vmul.f32 %v1169_v4, %v1749_v10  ;;  %v907_v31 = vmul.f32 %v1169_v4, %v1757_v44  ;;  %v908_v39 = vmul.f32 %v1169_v4, %v1764_v24 }
 0x1e0   :  { %v909_v60 = vmul.f32 %v1169_v4, %v1775_v41  ;;  %v910_v2 = vmul.f32 %v1169_v4, %v1786_v1  ;;  %v911_v27 = vmul.f32 %v1169_v4, %v1797_v42  ;;  %v912_v28 = vmul.f32 %v1169_v4, %v1812_v51  ;;  %917 = vst.msk [vmem:[%s2109_s4] sm:$0xff] %vm681_vm6, %v901_v19 }
 0x1e1   :  { %918 = vst.msk [vmem:[%s2109_s4 + $0x8] sm:$0xff] %vm681_vm6, %v902_v5  ;;  %919 = vst.msk [vmem:[%s2109_s4 + $0x10] sm:$0xff] %vm681_vm6, %v903_v36  ;;  %v913_v62 = vmul.f32 %v1169_v4, %v1825_v23  ;;  %v914_v32 = vmul.f32 %v1169_v4, %v1840_v22  ;;  %v915_v40 = vmul.f32 %v1169_v4, %v1854_v18 }
 0x1e2   :  { %920 = vst.msk [vmem:[%s2109_s4 + $0x18] sm:$0xff] %vm681_vm6, %v904_v49  ;;  %v916_v10 = vmul.f32 %v1169_v4, %v1868_v38  ;;  %921 = vst.msk [vmem:[%s2109_s4 + $0x20] sm:$0xff] %vm681_vm6, %v905_v7  ;;  %v933_v44 = vmul.f32 %v1169_v4, %v1771_v9  ;;  %v934_v24 = vmul.f32 %v1169_v4, %v1782_v57 }
 0x1e3   :  { %922 = vst.msk [vmem:[%s2109_s4 + $0x28] sm:$0xff] %vm681_vm6, %v906_v16  ;;  %923 = vst.msk [vmem:[%s2109_s4 + $0x30] sm:$0xff] %vm681_vm6, %v907_v31  ;;  %v935_v41 = vmul.f32 %v1169_v4, %v1793_v59  ;;  %v936_v1 = vmul.f32 %v1169_v4, %v1806_v6  ;;  %v937_v9 = vmul.f32 %v1169_v4, %v1819_v47 }
 0x1e4   :  { %924 = vst.msk [vmem:[%s2109_s4 + $0x38] sm:$0xff] %vm681_vm6, %v908_v39  ;;  %925 = vst.msk [vmem:[%s2109_s4 + $0x40] sm:$0xff] %vm681_vm6, %v909_v60  ;;  %v938_v57 = vmul.f32 %v1169_v4, %v1833_v45  ;;  %v939_v59 = vmul.f32 %v1169_v4, %v1847_v8  ;;  %v940_v42 = vmul.f32 %v1169_v4, %v1861_v14 }
 0x1e5   :  { %926 = vst.msk [vmem:[%s2109_s4 + $0x48] sm:$0xff] %vm681_vm6, %v910_v2  ;;  %927 = vst.msk [vmem:[%s2109_s4 + $0x50] sm:$0xff] %vm681_vm6, %v911_v27  ;;  %v941_v6 = vmul.f32 %v1169_v4, %v1875_v29  ;;  %v942_v51 = vmul.f32 %v1169_v4, %v1885_v17  ;;  %v943_v23 = vmul.f32 %v1169_v4, %v1895_v0 }
 0x1e6   :  { %928 = vst.msk [vmem:[%s2109_s4 + $0x58] sm:$0xff] %vm681_vm6, %v912_v28  ;;  %929 = vst.msk [vmem:[%s2109_s4 + $0x60] sm:$0xff] %vm681_vm6, %v913_v62  ;;  %v944_v22 = vmul.f32 %v1169_v4, %v1903_v61  ;;  %v945_v47 = vmul.f32 %v1169_v4, %v1911_v56  ;;  %v946_v45 = vmul.f32 %v1169_v4, %v1918_v11 }
 0x1e7   :  { %930 = vst.msk [vmem:[%s2109_s4 + $0x68] sm:$0xff] %vm681_vm6, %v914_v32  ;;  %931 = vst.msk [vmem:[%s2109_s4 + $0x70] sm:$0xff] %vm681_vm6, %v915_v40  ;;  %v947_v8 = vmul.f32 %v1169_v4, %v1925_v15  ;;  %v948_v18 = vmul.f32 %v1169_v4, %v1932_v21 }
 0x1e8   :  { %932 = vst.msk [vmem:[%s2109_s4 + $0x78] sm:$0xff] %vm681_vm6, %v916_v10  ;;  %949 = vst.msk [vmem:[%s2110_s5] sm:$0xff] %vm681_vm6, %v933_v44 }
 0x1e9   :  { %950 = vst.msk [vmem:[%s2110_s5 + $0x8] sm:$0xff] %vm681_vm6, %v934_v24  ;;  %951 = vst.msk [vmem:[%s2110_s5 + $0x10] sm:$0xff] %vm681_vm6, %v935_v41 }
 0x1ea   :  { %952 = vst.msk [vmem:[%s2110_s5 + $0x18] sm:$0xff] %vm681_vm6, %v936_v1  ;;  %953 = vst.msk [vmem:[%s2110_s5 + $0x20] sm:$0xff] %vm681_vm6, %v937_v9 }
 0x1eb   :  { %954 = vst.msk [vmem:[%s2110_s5 + $0x28] sm:$0xff] %vm681_vm6, %v938_v57  ;;  %955 = vst.msk [vmem:[%s2110_s5 + $0x30] sm:$0xff] %vm681_vm6, %v939_v59 }
 0x1ec   :  { %956 = vst.msk [vmem:[%s2110_s5 + $0x38] sm:$0xff] %vm681_vm6, %v940_v42  ;;  %957 = vst.msk [vmem:[%s2110_s5 + $0x40] sm:$0xff] %vm681_vm6, %v941_v6 }
 0x1ed   :  { %958 = vst.msk [vmem:[%s2110_s5 + $0x48] sm:$0xff] %vm681_vm6, %v942_v51  ;;  %959 = vst.msk [vmem:[%s2110_s5 + $0x50] sm:$0xff] %vm681_vm6, %v943_v23 }
 0x1ee   :  { %960 = vst.msk [vmem:[%s2110_s5 + $0x58] sm:$0xff] %vm681_vm6, %v944_v22  ;;  %961 = vst.msk [vmem:[%s2110_s5 + $0x60] sm:$0xff] %vm681_vm6, %v945_v47 }
 0x1ef   :  { %962 = vst.msk [vmem:[%s2110_s5 + $0x68] sm:$0xff] %vm681_vm6, %v946_v45  ;;  %963 = vst.msk [vmem:[%s2110_s5 + $0x70] sm:$0xff] %vm681_vm6, %v947_v8 }
 0x1f0   :  { %964 = vst.msk [vmem:[%s2110_s5 + $0x78] sm:$0xff] %vm681_vm6, %v948_v18 }

</bundles_post_ra>
